<compile_context>
chip_gen: v6e
topology: v6e:2x2x1
jax: 0.10.0
libtpu: 0.0.40
codegen_flags: <defaults>
</compile_context>

<pallas_src>
import jax
import jax.numpy as jnp
from jax.experimental import pallas as pl
from jax.experimental.pallas import tpu as pltpu


def adversarial_kernel(x_ref, w1_ref, b1_ref, w2_ref, b2_ref, w3_ref, b3_ref, o_ref):
    # Layer 1: Linear(in_feature, 1024) + ReLU.
    # K=in_feature (e.g. 32) is a poor MXU shape, but this layer is ~1.5% of total
    # FLOPs/bytes; layer 2 drives all tiling/dtype decisions.
    x = x_ref[...].astype(jnp.bfloat16)
    h1 = jnp.dot(x, w1_ref[...], preferred_element_type=jnp.float32)
    h1 = jnp.maximum(h1 + b1_ref[...], 0.0)
    # dropout1 (p=0.5): identity in eval mode.

    # Layer 2: Linear(1024, 1024) + ReLU.  bf16 inputs, f32 accumulation on the MXU.
    h2 = jnp.dot(h1.astype(jnp.bfloat16), w2_ref[...],
                 preferred_element_type=jnp.float32)
    h2 = jnp.maximum(h2 + b2_ref[...], 0.0)
    # dropout2 (p=0.5): identity in eval mode.

    # Layer 3: Linear(1024, 1) + Sigmoid as a VPU multiply + cross-lane reduction.
    # w3 is stored as a [1, H] row (pre-transposed).
    logits = jnp.sum(h2 * w3_ref[...], axis=-1, keepdims=True) + b3_ref[...]
    o_ref[...] = jax.nn.sigmoid(logits).astype(o_ref.dtype)


def _choose_bm(batch, cap=256):
    """Largest batch tile <= cap that divides B, is a multiple of 8 (sublane rule)
    and, when possible, leaves >= 2 grid steps (megacore / v7x dual-TC sharding)."""
    cands = [bm for bm in range(1, min(batch, cap) + 1)
             if batch % bm == 0 and (bm % 8 == 0 or bm == batch)]
    if not cands:
        return batch
    two_step = [bm for bm in cands if batch // bm >= 2]
    return max(two_step) if two_step else max(cands)


def adversarial_network(x, params, *, bm=None):
    """x: [B, in_feature] float32.
    params: w1/w2 pre-transposed [in, out] bf16, w3 as a [1, H] f32 row, f32 biases."""
    B, D = x.shape
    H = params["w1"].shape[1]          # 1024
    if bm is None:
        bm = _choose_bm(B)
    assert B % bm == 0, "batch must be divisible by the batch tile"
    assert bm == B or bm % 8 == 0, "batch tile must be a multiple of 8 (sublane rule)"

    # Constant index_map => weights are DMA'd once and stay VMEM-resident across tiles.
    def resident(shape):
        return pl.BlockSpec(shape, lambda i: (0, 0))

    # Explicit VMEM budget from the chosen sizes (2x margin + headroom), floored at the
    # 32 MiB default so we never under-budget, capped at v7x physical VMEM.
    bytes_w = 2 * (D * H + H * H) * 2          # bf16 W1, W2 (pipeline buffers)
    bytes_small = 2 * (3 * H + 1) * 4          # f32 b1, b2, w3 row, b3
    bytes_x = 2 * bm * D * 4                   # double-buffered x tile
    bytes_o = 2 * bm * 4                       # double-buffered output tile
    bytes_h = 2 * bm * H * 4                   # f32 h1/h2 intermediates
    vmem_limit = int(min(
        max(2 * (bytes_w + bytes_small + bytes_x + bytes_o + bytes_h) + (8 << 20),
            32 << 20),
        64 << 20))

    grid = (B // bm,)
    return pl.pallas_call(
        adversarial_kernel,
        out_shape=jax.ShapeDtypeStruct((B, 1), jnp.float32),
        grid_spec=pltpu.PrefetchScalarGridSpec(
            num_scalar_prefetch=0,
            grid=grid,
            in_specs=[
                pl.BlockSpec((bm, D), lambda i: (i, 0)),   # x tile (pipelined over batch)
                resident((D, H)),                          # W1 (bf16)
                resident((1, H)),                          # b1
                resident((H, H)),                          # W2 (bf16)
                resident((1, H)),                          # b2
                resident((1, H)),                          # W3 row (f32)
                resident((1, 1)),                          # b3
            ],
            out_specs=pl.BlockSpec((bm, 1), lambda i: (i, 0)),
        ),
        compiler_params=pltpu.CompilerParams(
            dimension_semantics=("parallel",),
            vmem_limit_bytes=vmem_limit,
        ),
    )(x, params["w1"], params["b1"], params["w2"], params["b2"],
      params["w3"], params["b3"])


def init_params(key, in_feature, hidden=1024):
    # Matches the PyTorch init: weight ~ N(0, std), bias = 0.
    # nn.Linear stores weight as [out, in]; we keep [in, out] (pre-transposed),
    # W1/W2 in bf16 for HBM/VMEM savings, W3 as an f32 [1, hidden] row.
    k1, k2, k3 = jax.random.split(key, 3)
    w1 = (0.01 * jax.random.normal(k1, (in_feature, hidden), jnp.float32)).astype(jnp.bfloat16)
    w2 = (0.01 * jax.random.normal(k2, (hidden, hidden), jnp.float32)).astype(jnp.bfloat16)
    w3 = 0.3 * jax.random.normal(k3, (1, hidden), jnp.float32)
    return {
        "w1": w1, "b1": jnp.zeros((1, hidden), jnp.float32),
        "w2": w2, "b2": jnp.zeros((1, hidden), jnp.float32),
        "w3": w3, "b3": jnp.zeros((1, 1), jnp.float32),
    }


def reference_forward(x, params):
    """Pure-JAX reference computing exactly the same numerics as the kernel
    (bf16 matmul inputs, f32 accumulation, eval-mode dropout = identity)."""
    h1 = jnp.dot(x.astype(jnp.bfloat16), params["w1"],
                 preferred_element_type=jnp.float32) + params["b1"]
    h1 = jnp.maximum(h1, 0.0)
    h2 = jnp.dot(h1.astype(jnp.bfloat16), params["w2"],
                 preferred_element_type=jnp.float32) + params["b2"]
    h2 = jnp.maximum(h2, 0.0)
    logits = jnp.sum(h2 * params["w3"], axis=-1, keepdims=True) + params["b3"]
    return jax.nn.sigmoid(logits)


if __name__ == "__main__":
    key = jax.random.PRNGKey(0)
    k_x, k_p = jax.random.split(key)

    B, in_feature = 16, 32          # small batch; hidden=1024 is fixed by the module
    x = jax.random.normal(k_x, (B, in_feature), jnp.float32)
    params = init_params(k_p, in_feature)

    out = adversarial_network(x, params)     # bm=8 -> grid=(2,), exercises pipelining
    out = jax.block_until_ready(out)
    assert out.shape == (B, 1)

    ref = jax.block_until_ready(reference_forward(x, params))
    max_err = float(jnp.max(jnp.abs(out - ref)))
    assert jnp.allclose(out, ref, atol=1e-3, rtol=1e-3), max_err

    print("KERNEL_OK")
</pallas_src>

<mosaic_0001>
module attributes {stable_mosaic.version = 11 : i64} {
  func.func @adversarial_kernel(%arg0: i32, %arg1: memref<8x32xf32, #tpu.memory_space<vmem>>, %arg2: memref<32x1024xbf16, #tpu.memory_space<vmem>>, %arg3: memref<1x1024xf32, #tpu.memory_space<vmem>>, %arg4: memref<1024x1024xbf16, #tpu.memory_space<vmem>>, %arg5: memref<1x1024xf32, #tpu.memory_space<vmem>>, %arg6: memref<1x1024xf32, #tpu.memory_space<vmem>>, %arg7: memref<1x1xf32, #tpu.memory_space<vmem>>, %arg8: memref<8x1xf32, #tpu.memory_space<vmem>>) attributes {dimension_semantics = [#tpu.dimension_semantics<parallel>], iteration_bounds = array<i64: 2>, scalar_prefetch = 0 : i64, scratch_operands = 0 : i64, tpu.core_type = #tpu.core_type<tc>, window_params = [{transform_indices = @transform_0, window_bounds = array<i64: 8, 32>}, {pipeline_mode = #tpu.pipeline_mode<synchronous>, transform_indices = @transform_1, window_bounds = array<i64: 32, 1024>}, {pipeline_mode = #tpu.pipeline_mode<synchronous>, transform_indices = @transform_2, window_bounds = array<i64: 1, 1024>}, {pipeline_mode = #tpu.pipeline_mode<synchronous>, transform_indices = @transform_3, window_bounds = array<i64: 1024, 1024>}, {pipeline_mode = #tpu.pipeline_mode<synchronous>, transform_indices = @transform_4, window_bounds = array<i64: 1, 1024>}, {pipeline_mode = #tpu.pipeline_mode<synchronous>, transform_indices = @transform_5, window_bounds = array<i64: 1, 1024>}, {pipeline_mode = #tpu.pipeline_mode<synchronous>, transform_indices = @transform_6, window_bounds = array<i64: 1, 1>}, {transform_indices = @transform_7, window_bounds = array<i64: 8, 1>}]} {
    %c0 = arith.constant 0 : index
    %c0_0 = arith.constant 0 : index
    %0 = vector.load %arg1[%c0, %c0_0] : memref<8x32xf32, #tpu.memory_space<vmem>>, vector<8x32xf32>
    %1 = arith.truncf %0 : vector<8x32xf32> to vector<8x32xbf16>
    %c0_1 = arith.constant 0 : index
    %c0_2 = arith.constant 0 : index
    %2 = vector.load %arg2[%c0_1, %c0_2] : memref<32x1024xbf16, #tpu.memory_space<vmem>>, vector<32x1024xbf16>
    %cst = arith.constant dense<0.000000e+00> : vector<8x1024xf32>
    %3 = tpu.matmul %1, %2, %cst {dimension_numbers = #tpu.dot_dimension_numbers<[1], [0], [0], [1], [0, 0, 1, 1], [], []>} : vector<8x32xbf16>, vector<32x1024xbf16>, vector<8x1024xf32> -> vector<8x1024xf32>
    %c0_3 = arith.constant 0 : index
    %c0_4 = arith.constant 0 : index
    %4 = vector.load %arg3[%c0_3, %c0_4] : memref<1x1024xf32, #tpu.memory_space<vmem>>, vector<1x1024xf32>
    %5 = vector.broadcast %4 : vector<1x1024xf32> to vector<8x1024xf32>
    %6 = arith.addf %3, %5 : vector<8x1024xf32>
    %cst_5 = arith.constant 0.000000e+00 : f32
    %7 = vector.broadcast %cst_5 : f32 to vector<8x1024xf32>
    %8 = arith.maximumf %6, %7 : vector<8x1024xf32>
    %9 = arith.truncf %8 : vector<8x1024xf32> to vector<8x1024xbf16>
    %c0_6 = arith.constant 0 : index
    %c0_7 = arith.constant 0 : index
    %10 = vector.load %arg4[%c0_6, %c0_7] : memref<1024x1024xbf16, #tpu.memory_space<vmem>>, vector<1024x1024xbf16>
    %cst_8 = arith.constant dense<0.000000e+00> : vector<8x1024xf32>
    %11 = tpu.matmul %9, %10, %cst_8 {dimension_numbers = #tpu.dot_dimension_numbers<[1], [0], [0], [1], [0, 0, 1, 1], [], []>} : vector<8x1024xbf16>, vector<1024x1024xbf16>, vector<8x1024xf32> -> vector<8x1024xf32>
    %c0_9 = arith.constant 0 : index
    %c0_10 = arith.constant 0 : index
    %12 = vector.load %arg5[%c0_9, %c0_10] : memref<1x1024xf32, #tpu.memory_space<vmem>>, vector<1x1024xf32>
    %13 = vector.broadcast %12 : vector<1x1024xf32> to vector<8x1024xf32>
    %14 = arith.addf %11, %13 : vector<8x1024xf32>
    %cst_11 = arith.constant 0.000000e+00 : f32
    %15 = vector.broadcast %cst_11 : f32 to vector<8x1024xf32>
    %16 = arith.maximumf %14, %15 : vector<8x1024xf32>
    %c0_12 = arith.constant 0 : index
    %c0_13 = arith.constant 0 : index
    %17 = vector.load %arg6[%c0_12, %c0_13] : memref<1x1024xf32, #tpu.memory_space<vmem>>, vector<1x1024xf32>
    %18 = vector.broadcast %17 : vector<1x1024xf32> to vector<8x1024xf32>
    %19 = arith.mulf %16, %18 : vector<8x1024xf32>
    %cst_14 = arith.constant dense<0.000000e+00> : vector<8xf32>
    %20 = vector.multi_reduction <add>, %19, %cst_14 [1] : vector<8x1024xf32> to vector<8xf32>
    %21 = vector.shape_cast %20 : vector<8xf32> to vector<8x1xf32>
    %c0_15 = arith.constant 0 : index
    %c0_16 = arith.constant 0 : index
    %22 = vector.load %arg7[%c0_15, %c0_16] : memref<1x1xf32, #tpu.memory_space<vmem>>, vector<1x1xf32>
    %23 = vector.broadcast %22 : vector<1x1xf32> to vector<8x1xf32>
    %24 = arith.addf %21, %23 : vector<8x1xf32>
    %25 = arith.negf %24 : vector<8x1xf32>
    %26 = math.exp %25 : vector<8x1xf32>
    %cst_17 = arith.constant 1.000000e+00 : f32
    %27 = vector.broadcast %cst_17 : f32 to vector<8x1xf32>
    %28 = arith.addf %27, %26 : vector<8x1xf32>
    %29 = arith.divf %27, %28 : vector<8x1xf32>
    %c0_18 = arith.constant 0 : index
    %c0_19 = arith.constant 0 : index
    %30 = vector.load %arg8[%c0_18, %c0_19] : memref<8x1xf32, #tpu.memory_space<vmem>>, vector<8x1xf32>
    tpu.vector_store %arg8[%c0_18, %c0_19], %29 {strides = array<i32>} : memref<8x1xf32, #tpu.memory_space<vmem>>, vector<8x1xf32>,
    return
  }
  func.func @transform_0(%arg0: i32) -> (i32, i32) {
    %c0_i32 = arith.constant 0 : i32
    %c0_i32_0 = arith.constant 0 : i32
    return %arg0, %c0_i32 : i32, i32
  }
  func.func @transform_1(%arg0: i32) -> (i32, i32) {
    %c0_i32 = arith.constant 0 : i32
    %c0_i32_0 = arith.constant 0 : i32
    %c0_i32_1 = arith.constant 0 : i32
    return %c0_i32, %c0_i32_0 : i32, i32
  }
  func.func @transform_2(%arg0: i32) -> (i32, i32) {
    %c0_i32 = arith.constant 0 : i32
    %c0_i32_0 = arith.constant 0 : i32
    %c0_i32_1 = arith.constant 0 : i32
    return %c0_i32, %c0_i32_0 : i32, i32
  }
  func.func @transform_3(%arg0: i32) -> (i32, i32) {
    %c0_i32 = arith.constant 0 : i32
    %c0_i32_0 = arith.constant 0 : i32
    %c0_i32_1 = arith.constant 0 : i32
    return %c0_i32, %c0_i32_0 : i32, i32
  }
  func.func @transform_4(%arg0: i32) -> (i32, i32) {
    %c0_i32 = arith.constant 0 : i32
    %c0_i32_0 = arith.constant 0 : i32
    %c0_i32_1 = arith.constant 0 : i32
    return %c0_i32, %c0_i32_0 : i32, i32
  }
  func.func @transform_5(%arg0: i32) -> (i32, i32) {
    %c0_i32 = arith.constant 0 : i32
    %c0_i32_0 = arith.constant 0 : i32
    %c0_i32_1 = arith.constant 0 : i32
    return %c0_i32, %c0_i32_0 : i32, i32
  }
  func.func @transform_6(%arg0: i32) -> (i32, i32) {
    %c0_i32 = arith.constant 0 : i32
    %c0_i32_0 = arith.constant 0 : i32
    %c0_i32_1 = arith.constant 0 : i32
    return %c0_i32, %c0_i32_0 : i32, i32
  }
  func.func @transform_7(%arg0: i32) -> (i32, i32) {
    %c0_i32 = arith.constant 0 : i32
    %c0_i32_0 = arith.constant 0 : i32
    return %arg0, %c0_i32 : i32, i32
  }
}

</mosaic_0001>

<bundles_post_ra>
// kernel: tpu_custom_call.1
= control target key start
LH: loop header
LB: loop body
LE: loop exit
PB: predicated region body
PF: predicated region fallthrough
CT: control target
= control target key end

     0   :  { %s5902_s0 = inlined_call_operand.hbm [shape: f32[16,32], index: 0, kind: input, shape index: {}]   ;;  %s5903_s1 = inlined_call_operand.hbm [shape: bf16[32,1024], index: 1, kind: input, shape index: {}]   ;;  %s5904_s2 = inlined_call_operand.hbm [shape: f32[1,1024], index: 2, kind: input, shape index: {}]   ;;  %s5905_s3 = inlined_call_operand.hbm [shape: bf16[1024,1024], index: 3, kind: input, shape index: {}]   ;;  %s5906_s4 = inlined_call_operand.hbm [shape: f32[1,1024], index: 4, kind: input, shape index: {}]   ;;  %s5907_s5 = inlined_call_operand.hbm [shape: f32[1,1024], index: 5, kind: input, shape index: {}]   ;;  %s5908_s6 = inlined_call_operand.<no memory space> [shape: f32[1,1], index: 6, kind: input, shape index: {}]   ;;  %s5909_s7 = inlined_call_operand.vmem [shape: f32[16,1], index: 7, kind: output, shape index: {}]  }
   0x1   :  { %v12_v0 = vstv %s5908_s6 }
   0x2   :  { %13 = vst [vmem:[#allocation2] sm:$0x1] %v12_v0 }
   0x3   :  { %14 = vsyncpa [#allocation4], 0 }
   0x4   :  { %16 = vsyncpa [#allocation4 + $0x1], 0 }
   0x5   :  { %17 = vsyncpa [#allocation6], 0 }
   0x6   :  { %18 = vsyncpa [#allocation9], 0 }
   0x7   :  { %19 = vsyncpa [#allocation12], 0  ;;  %s5565_s26 = smov 0   ;;  %s5567_s27 = smov 0  }
   0x8   :  { %s5569_s28 = smov 0   ;;  %s5571_s29 = smov 0  }
   0x9 LB: > { %s5513_s6 = smov [#allocation5]   ;;  %s5586_s8 = sadd.s32 4294967295, %s5511_s29   ;;  %s5511_s29 = sphi %s5571_s29, %s5930_s29   ;;  %s5507_s28 = sphi %s5569_s28, %s5929_s28   ;;  %s5503_s27 = sphi %s5567_s27, %s5928_s27   ;;  %s5499_s26 = sphi %s5565_s26, %s5927_s26  }
   0xa   : > { %s220_s30 = sshll.u32 %s5513_s6, 4  ;;  %p4655_p0 = scmp.ge.s32.totalorder %s5511_s29, 1  ;;  %s221_s30 = int_to_ptr.vmem [resolvable:$true] %s220_s30 }
   0xb   : > { %p5910_p1 = scmp.eq.s32.totalorder %s5586_s8, 0  ;;  %p208_p2 = scmp.lt.s32.totalorder %s5511_s29, 3 }
   0xc   : > { %s5514_s10 = smov [#allocation8]   ;;  %s5515_s13 = smov [#allocation7]  }
   0xd   : > { %p5591_p3 = pnand %p4655_p0, %p208_p2  ;;  %s244_s11 = sshll.u32 %s5514_s10, 4  ;;  %s5603_s11 = int_to_ptr.vmem [resolvable:$true] %s244_s11 }
   0xe   : > { %s234_s14 = sshll.u32 %s5515_s13, 4  ;;  %s5318_s16 = scalar_lea.vmem %s221_s30, 2048  ;;  %s5605_s14 = int_to_ptr.vmem [resolvable:$true] %s234_s14 }
   0xf   : > { %s5913_s9 = scalar_select %p5591_p3, 1, 0 }
  0x10   : > { %p5230_p4 = pneg %p5591_p3  ;;  %p5319_p7 = scmp.ne.s32.totalorder %s221_s30, %s5318_s16 }
  0x11   : > { %p5326_p10 = scmp.lt.s32.totalorder %s221_s30, %s221_s30  ;;  %p5327_p11 = scmp.lt.s32.totalorder %s5318_s16, %s5318_s16 }
  0x12   : > { %p5599_p5 = pnand %p5230_p4, %p5910_p1 }
  0x13   : > { %p5328_p12 = por %p5327_p11, %p5326_p10 }
  0x14   : > { %p5609_p6 = pneg %p5599_p5 }
  0x16   : > { %p5321_p8 = pnand %p5319_p7, %p5609_p6 }
  0x18   : > { %p5322_p9 = pneg %p5321_p8 }
  0x1a   : > { %p5329_p13 = pnand %p5328_p12, %p5322_p9 }
  0x1c   : > { %5332 = shalt.err (!%p5329_p13)
}
  0x1d   : > { %s5516_s17 = smov 512   ;;  %s5517_s18 = smov 32  }
  0x1e   : > { %5233 = dma.hbm_to_vmem [thread:$0]  (!%p5599_p5), %s5903_s1, 2048, %s221_s30, [#allocation6], %s5516_s17, %s5516_s17, %s5517_s18  }
  0x1f   : > { %s5344_s21 = scalar_lea.vmem %s5603_s11, 65536  ;;  %p5352_p7 = scmp.lt.s32.totalorder %s5603_s11, %s5603_s11 }
  0x20   : > { %p5345_p0 = scmp.ne.s32.totalorder %s5603_s11, %s5344_s21  ;;  %p5353_p8 = scmp.lt.s32.totalorder %s5344_s21, %s5344_s21 }
  0x22   : > { %p5347_p2 = pnand %p5345_p0, %p5609_p6  ;;  %p5354_p9 = por %p5353_p8, %p5352_p7 }
  0x24   : > { %p5348_p4 = pneg %p5347_p2 }
  0x26   : > { %p5355_p10 = pnand %p5354_p9, %p5348_p4 }
  0x28   : > { %5358 = shalt.err (!%p5355_p10)
}
  0x29   : > { %5239 = dma.hbm_to_vmem [thread:$0]  (!%p5599_p5), %s5905_s3, 65536, %s5603_s11, [#allocation9], %s5516_s17, %s5516_s17, %s5517_s18  }
  0x2a   : > { %s5370_s24 = scalar_lea.vmem %s5605_s14, 128  ;;  %p5378_p0 = scmp.lt.s32.totalorder %s5605_s14, %s5605_s14 }
  0x2b   : > { %p5371_p11 = scmp.ne.s32.totalorder %s5605_s14, %s5370_s24  ;;  %p5379_p2 = scmp.lt.s32.totalorder %s5370_s24, %s5370_s24 }
  0x2d   : > { %p5373_p12 = pnand %p5371_p11, %p5609_p6  ;;  %p5380_p4 = por %p5379_p2, %p5378_p0 }
  0x2f   : > { %p5374_p13 = pneg %p5373_p12 }
  0x31   : > { %p5381_p7 = pnand %p5380_p4, %p5374_p13 }
  0x33   : > { %5384 = shalt.err (!%p5381_p7)
}
  0x34   : > { %5236 = dma.hbm_to_vmem [thread:$0]  (!%p5599_p5), %s5904_s2, 128, %s5605_s14, [#allocation6]  }
  0x35   : > { %s5518_s30 = smov [#allocation10]   ;;  %s5519_s11 = smov [#allocation11]  }
  0x36   : > { %s258_s10 = sshll.u32 %s5518_s30, 4  ;;  %s269_s13 = sshll.u32 %s5519_s11, 4  ;;  %s259_s10 = int_to_ptr.vmem [resolvable:$true] %s258_s10  ;;  %s270_s13 = int_to_ptr.vmem [resolvable:$true] %s269_s13 }
  0x37   : > { %s5396_s16 = scalar_lea.vmem %s259_s10, 128  ;;  %p5404_p11 = scmp.lt.s32.totalorder %s259_s10, %s259_s10 }
  0x38   : > { %p5397_p8 = scmp.ne.s32.totalorder %s259_s10, %s5396_s16  ;;  %p5405_p12 = scmp.lt.s32.totalorder %s5396_s16, %s5396_s16 }
  0x3a   : > { %p5399_p9 = pnand %p5397_p8, %p5609_p6  ;;  %p5406_p13 = por %p5405_p12, %p5404_p11 }
  0x3c   : > { %p5400_p10 = pneg %p5399_p9 }
  0x3e   : > { %p5407_p0 = pnand %p5406_p13, %p5400_p10 }
  0x40   : > { %5410 = shalt.err (!%p5407_p0)
}
  0x41   : > { %5242 = dma.hbm_to_vmem [thread:$0]  (!%p5599_p5), %s5906_s4, 128, %s259_s10, [#allocation9]  }
  0x42   : > { %s5422_s14 = scalar_lea.vmem %s270_s13, 128  ;;  %p5430_p8 = scmp.lt.s32.totalorder %s270_s13, %s270_s13 }
  0x43   : > { %p5423_p2 = scmp.ne.s32.totalorder %s270_s13, %s5422_s14  ;;  %p5431_p9 = scmp.lt.s32.totalorder %s5422_s14, %s5422_s14 }
  0x45   : > { %p5425_p4 = pnand %p5423_p2, %p5609_p6  ;;  %p5432_p1 = por %p5431_p9, %p5430_p8 }
  0x47   : > { %p5426_p7 = pneg %p5425_p4 }
  0x49   : > { %p5433_p3 = pnand %p5432_p1, %p5426_p7 }
  0x4b   : > { %5436 = shalt.err (!%p5433_p3)
}
  0x4c   : > { %5245 = dma.hbm_to_vmem [thread:$0]  (!%p5599_p5), %s5907_s5, 128, %s270_s13, [#allocation12]  }
  0x4d   : > { %s5659_s15 = sadd.s32 1, %s5511_s29   ;;  %s32_s21 = sadd.s32 1, %s5507_s28 }
  0x4e   : > { %s29_s12 = ssub.s32 %s5511_s29, %s5659_s15  ;;  %p39_p3 = scmp.ne.s32.totalorder %s5507_s28, %s5503_s27 }
  0x4f   : > { %p30_p1 = scmp.eq.s32.totalorder %s29_s12, 0  ;;  %p40_p6 = scmp.eq.s32.totalorder %s5511_s29, 0 }
  0x50   : > { %p45_p10 = scmp.ne.s32.totalorder %s5503_s27, %s5499_s26  ;;  %p5916_p12 = scmp.eq.s32.totalorder %s5586_s8, 0 }
  0x51   : > { %s5670_s22 = scalar_select %p30_p1, %s5507_s28, %s32_s21  }
  0x52   : > { %p41_p11 = por %p40_p6, %p39_p3  ;;  %p5674_p13 = por %p5916_p12, %p45_p10 }
  0x53   : > { %p5255_p0 = scmp.lt.s32.totalorder %s5511_s29, 2  ;;  %s283_s24 = sand.u32 1, %s5507_s28  }
  0x54   : > { %s5917_s23 = scalar_select %p5674_p13, 1, 0 }
  0x55   : > { %s4662_s25 = sshll.u32 %s283_s24, 3  ;;  %s4663_s6 = sshll.u32 %s5511_s29, 7 }
  0x56   : > { %s5684_s11 = scalar_lea.hbm %s5902_s0, %s4663_s6  ;;  %s287_s26 = scalar_lea.vmem [#allocation3], %s4662_s25 }
  0x57   : > { %s294_s13 = sshll.u32 %s287_s26, 4  ;;  %p5686_p5 = pnand %p5255_p0, %p41_p11  ;;  %s295_s13 = int_to_ptr.vmem [resolvable:$true] %s294_s13 }
  0x58   : > { %s284_s17 = scalar_lea.sflag [#allocation4], %s283_s24  ;;  %s5437_s18 = scalar_lea.hbm %s5684_s11, 128 }
  0x59   : > { %p5438_p2 = scmp.ne.s32.totalorder %s5684_s11, %s5437_s18  ;;  %p5439_p4 = pneg %p5686_p5 }
  0x5a   : > { %s5442_s19 = scalar_lea.hbm %s5902_s0, 256  ;;  %p5443_p9 = scmp.lt.s32.totalorder %s5684_s11, %s5902_s0 }
  0x5b   : > { %p5440_p7 = pnand %p5439_p4, %p5438_p2  ;;  %p5444_p1 = scmp.lt.s32.totalorder %s5442_s19, %s5437_s18 }
  0x5d   : > { %p5441_p8 = pneg %p5440_p7  ;;  %p5445_p3 = por %p5444_p1, %p5443_p9 }
  0x5f   : > { %p5446_p6 = pnand %p5445_p3, %p5441_p8 }
  0x61   : > { %5449 = shalt.err (!%p5446_p6)
}
  0x62   : > { %s5450_s21 = scalar_lea.vmem %s295_s13, 128  ;;  %s5520_s24 = smov [#allocation3]  }
  0x63   : > { %p5451_p10 = scmp.ne.s32.totalorder %s295_s13, %s5450_s21  ;;  %s5455_s25 = sshll.u32 %s5520_s24, 4  ;;  %s5456_s25 = int_to_ptr.vmem [resolvable:$false] %s5455_s25 }
  0x64   : > { %s5457_s6 = scalar_lea.vmem %s5456_s25, 256  ;;  %p5458_p0 = scmp.lt.s32.totalorder %s295_s13, %s5456_s25 }
  0x65   : > { %p5453_p11 = pnand %p5451_p10, %p5439_p4  ;;  %p5459_p2 = scmp.lt.s32.totalorder %s5457_s6, %s5450_s21 }
  0x67   : > { %p5454_p12 = pneg %p5453_p11  ;;  %p5460_p7 = por %p5459_p2, %p5458_p0 }
  0x69   : > { %p5461_p13 = pnand %p5460_p7, %p5454_p12 }
  0x6b   : > { %5464 = shalt.err (!%p5461_p13)
}
  0x6c   : > { %5249 = dma.hbm_to_vmem [thread:$0]  (!%p5686_p5), %s5684_s11, 128, %s295_s13, %s284_s17  }
  0x6d   : > { %p5919_p8 = scmp.ne.s32.totalorder %s5913_s9, 0 }
  0x6e   : > { %s305_s30 = sand.u32 (!%p5919_p8), 1, %s5503_s27   ;;  %p5920_p4 = scmp.ne.s32.totalorder (!%p5919_p8), %s5917_s23, 0 }
  0x6f   : > { %303 = sbr.rel (%p5919_p8) target bundleno = 1167 (0x48f), region = 48  ;;  %s5707_s10 = sshll.u32 (!%p5919_p8), %s305_s30, 3 }
  0x70   : > { %s306_s26 = scalar_lea.sflag (!%p5919_p8), [#allocation4], %s305_s30  ;;  %s309_s18 = scalar_lea.vmem (!%p5919_p8), [#allocation3], %s5707_s10 }
  0x74   : > { %5482 = dma.done.wait (%p5920_p4), %s306_s26, 128  }
  0x75   : > { %5484 = vsyncadd (%p5920_p4), %s306_s26, 4294967168  ;;  %p5921_p13 = scmp.eq.s32.totalorder %s5586_s8, 0 }
  0x77   : > { %5486 = dma.done.wait (%p5921_p13), [#allocation6], 2176   ;;  %p5922_p5 = pmov %p5921_p13 }
  0x79   : > { %5488 = vsyncadd (%p5922_p5), [#allocation6], 4294965120  ;;  %p5923_p9 = pmov %p5922_p5 }
  0x7a   : > { %p5924_p1 = pmov %p5922_p5 }
  0x7b   : > { %5490 = dma.done.wait (%p5923_p9), [#allocation9], 65664  }
  0x7c   : > { %5492 = vsyncadd (%p5924_p1), [#allocation9], 4294901632  ;;  %p5925_p3 = pmov %p5924_p1 }
  0x7d   : > { %p5926_p6 = pmov %p5924_p1 }
  0x7e   : > { %5494 = dma.done.wait (%p5925_p3), [#allocation12], 128  }
  0x7f   : > { %5496 = vsyncadd (%p5926_p6), [#allocation12], 4294967168  ;;  %v5521_v1 = vmov 0   ;;  %v374_v2 = vld [vmem:[#allocation5 + $0x40] sm:$0xff]  ;;  %v375_v4 = vld [vmem:[#allocation5 + $0x48] sm:$0xff]  ;;  %vm504_vm0 = vcmask 261120  }
  0x80   : > { %540 = vmatprep.mubr.bf16.mxu0 %v5521_v1  ;;  %581 = vmatprep.mubr.bf16.mxu1 %v5521_v1  ;;  %v378_v3 = vld [vmem:[#allocation5 + $0x60] sm:$0xff]  ;;  %v379_v6 = vld [vmem:[#allocation5 + $0x68] sm:$0xff]  ;;  %v376_v16 = vld [vmem:[#allocation5 + $0x50] sm:$0xff]  ;;  %p359_p10 = scmp.lt.s32.totalorder %s5586_s8, 1  ;;  %vm4539_vm1 = vcmask 7168  }
  0x81   : > { %v4681_v5 = vcombine.high %v374_v2, %v378_v3  ;;  %v4680_v7 = vcombine.low %v374_v2, %v378_v3  ;;  %v366_v8 = vld [vmem:[#allocation5] sm:$0xff]  ;;  %v4683_v10 = vcombine.high %v375_v4, %v379_v6  ;;  %v4682_v11 = vcombine.low %v375_v4, %v379_v6  ;;  %v367_v13 = vld [vmem:[#allocation5 + $0x8] sm:$0xff]  ;;  %v380_v17 = vld [vmem:[#allocation5 + $0x70] sm:$0xff] }
  0x82   : > { %v370_v9 = vld [vmem:[#allocation5 + $0x20] sm:$0xff]  ;;  %v371_v14 = vld [vmem:[#allocation5 + $0x28] sm:$0xff]  ;;  %v377_v18 = vld [vmem:[#allocation5 + $0x58] sm:$0xff]  ;;  %v4685_v23 = vcombine.high %v376_v16, %v380_v17  ;;  %v4684_v30 = vcombine.low %v376_v16, %v380_v17  ;;  %s5932_s8 = smov (!%p359_p10, %s5586_s8), 1 }
  0x83   : > { %v4673_v12 = vcombine.high %v366_v8, %v370_v9  ;;  %520 = vmatprep.subr.bf16.mxu0 %v4681_v5  ;;  %v4675_v15 = vcombine.high %v367_v13, %v371_v14  ;;  %561 = vmatprep.subr.bf16.mxu1 %v4683_v10  ;;  %v4672_v19 = vcombine.low %v366_v8, %v370_v9  ;;  %v364_v20 = vld [vmem:[%s309_s18] sm:$0xff]  ;;  %v744_v34 = vld [vmem:[#allocation8 + $0x1c0] sm:$0xff]  ;;  %s4671_s9 = sshll.u32 %s5932_s8, 3 }
  0x84   : > { %521 = vmatpush1.bf16.msra.mxu0 %v4680_v7  ;;  %v381_v21 = vld [vmem:[#allocation5 + $0x78] sm:$0xff]  ;;  %562 = vmatpush1.bf16.msra.mxu1 %v4682_v11  ;;  %v4674_v22 = vcombine.low %v367_v13, %v371_v14  ;;  %v368_v25 = vld [vmem:[#allocation5 + $0x10] sm:$0xff]  ;;  %v365_v27 = vpack.c.bf16 %v364_v20, %v364_v20  ;;  %v748_v35 = vld [vmem:[#allocation8 + $0x1e0] sm:$0xff]  ;;  %s362_s13 = scalar_lea.vmem %s5909_s7, %s4671_s9 }
  0x85   : > { %522 = vmatprep.subr.bf16.mxu0 %v4673_v12  ;;  %563 = vmatprep.subr.bf16.mxu1 %v4675_v15  ;;  %v4687_v24 = vcombine.high %v377_v18, %v381_v21  ;;  %v372_v26 = vld [vmem:[#allocation5 + $0x30] sm:$0xff]  ;;  %v369_v28 = vld [vmem:[#allocation5 + $0x18] sm:$0xff]  ;;  %v4686_v31 = vcombine.low %v377_v18, %v381_v21  ;;  %v872_v36 = vld [vmem:[#allocation8 + $0x5c0] sm:$0xff]  ;;  %v4749_v40 = vcombine.high %v744_v34, %v748_v35 }
  0x86   : > { %v373_v29 = vld [vmem:[#allocation5 + $0x38] sm:$0xff]  ;;  %v4677_v32 = vcombine.high %v368_v25, %v372_v26  ;;  %v876_v37 = vld [vmem:[#allocation8 + $0x5e0] sm:$0xff]  ;;  %v4676_v38 = vcombine.low %v368_v25, %v372_v26  ;;  %v4748_v46 = vcombine.low %v744_v34, %v748_v35 }
  0x87   : > { %v4679_v33 = vcombine.high %v369_v28, %v373_v29  ;;  %v4678_v39 = vcombine.low %v369_v28, %v373_v29  ;;  %v4877_v41 = vcombine.high %v872_v36, %v876_v37  ;;  %v736_v42 = vld [vmem:[#allocation8 + $0x180] sm:$0xff]  ;;  %v4876_v47 = vcombine.low %v872_v36, %v876_v37 }
  0x88   : > { %523 = vmatpush1.bf16.msra.mxu0 %v4672_v19  ;;  %564 = vmatpush1.bf16.msra.mxu1 %v4674_v22  ;;  %v740_v43 = vld [vmem:[#allocation8 + $0x1a0] sm:$0xff] }
  0x89   : > { %602 = vmatprep.subr.bf16.mxu0 %v4685_v23  ;;  %643 = vmatprep.subr.bf16.mxu1 %v4687_v24  ;;  %v864_v44 = vld [vmem:[#allocation8 + $0x580] sm:$0xff]  ;;  %v4741_v48 = vcombine.high %v736_v42, %v740_v43  ;;  %v4740_v54 = vcombine.low %v736_v42, %v740_v43 }
  0x8a   : > { %v868_v45 = vld [vmem:[#allocation8 + $0x5a0] sm:$0xff] }
  0x8b   : > { %4688 = vmatmul.mubr.msk.bf16.vlgmr.msra.gmra.mxu0 %vm504_vm0, %v365_v27  ;;  %4689 = vmatmul.mubr.msk.bf16.vlgmr.msra.gmra.mxu1 %vm504_vm0, %v365_v27  ;;  %v4869_v49 = vcombine.high %v864_v44, %v868_v45  ;;  %v728_v50 = vld [vmem:[#allocation8 + $0x140] sm:$0xff]  ;;  %v4868_v55 = vcombine.low %v864_v44, %v868_v45 }
  0x8c   : > { %603 = vmatpush1.bf16.msra.mxu0 %v4684_v30  ;;  %644 = vmatpush1.bf16.msra.mxu1 %v4686_v31  ;;  %v732_v51 = vld [vmem:[#allocation8 + $0x160] sm:$0xff] }
  0x8d   : > { %604 = vmatprep.subr.bf16.mxu0 %v4677_v32  ;;  %645 = vmatprep.subr.bf16.mxu1 %v4679_v33  ;;  %v856_v52 = vld [vmem:[#allocation8 + $0x540] sm:$0xff]  ;;  %v4733_v56 = vcombine.high %v728_v50, %v732_v51  ;;  %v4732_v62 = vcombine.low %v728_v50, %v732_v51 }
  0x8e   : > { %622 = vmatprep.mubr.bf16.mxu0 %v5521_v1  ;;  %663 = vmatprep.mubr.bf16.mxu1 %v5521_v1  ;;  %v860_v53 = vld [vmem:[#allocation8 + $0x560] sm:$0xff] }
  0x8f   : > { %v4861_v57 = vcombine.high %v856_v52, %v860_v53  ;;  %v720_v58 = vld [vmem:[#allocation8 + $0x100] sm:$0xff]  ;;  %v4860_v63 = vcombine.low %v856_v52, %v860_v53 }
  0x90   : > { %605 = vmatpush1.bf16.msra.mxu0 %v4676_v38  ;;  %646 = vmatpush1.bf16.msra.mxu1 %v4678_v39  ;;  %v724_v59 = vld [vmem:[#allocation8 + $0x120] sm:$0xff] }
  0x91   : > { %3802 = vmatprep.subr.bf16.mxu0 %v4749_v40  ;;  %3843 = vmatprep.subr.bf16.mxu1 %v4877_v41  ;;  %v848_v60 = vld [vmem:[#allocation8 + $0x500] sm:$0xff]  ;;  %v4725_v0 = vcombine.high %v720_v58, %v724_v59  ;;  %v4724_v6 = vcombine.low %v720_v58, %v724_v59 }
  0x92   : > { %v852_v61 = vld [vmem:[#allocation8 + $0x520] sm:$0xff] }
  0x93   : > { %4690 = vmatmul.mubr.msk.bf16.vlgmr.msra.gmra.mxu0 %vm504_vm0, %v365_v27  ;;  %4691 = vmatmul.mubr.msk.bf16.vlgmr.msra.gmra.mxu1 %vm504_vm0, %v365_v27  ;;  %v4853_v1 = vcombine.high %v848_v60, %v852_v61  ;;  %v712_v2 = vld [vmem:[#allocation8 + $0xc0] sm:$0xff]  ;;  %v4852_v7 = vcombine.low %v848_v60, %v852_v61 }
  0x94   : > { %3803 = vmatpush1.bf16.msra.mxu0 %v4748_v46  ;;  %3844 = vmatpush1.bf16.msra.mxu1 %v4876_v47  ;;  %v716_v3 = vld [vmem:[#allocation8 + $0xe0] sm:$0xff] }
  0x95   : > { %3804 = vmatprep.subr.bf16.mxu0 %v4741_v48  ;;  %3845 = vmatprep.subr.bf16.mxu1 %v4869_v49  ;;  %v840_v4 = vld [vmem:[#allocation8 + $0x4c0] sm:$0xff]  ;;  %v4717_v8 = vcombine.high %v712_v2, %v716_v3  ;;  %v4716_v14 = vcombine.low %v712_v2, %v716_v3 }
  0x96   : > { %v844_v5 = vld [vmem:[#allocation8 + $0x4e0] sm:$0xff] }
  0x97   : > { %v4845_v9 = vcombine.high %v840_v4, %v844_v5  ;;  %v704_v10 = vld [vmem:[#allocation8 + $0x80] sm:$0xff]  ;;  %v4844_v15 = vcombine.low %v840_v4, %v844_v5 }
  0x98   : > { %3805 = vmatpush1.bf16.msra.mxu0 %v4740_v54  ;;  %3846 = vmatpush1.bf16.msra.mxu1 %v4868_v55  ;;  %v708_v11 = vld [vmem:[#allocation8 + $0xa0] sm:$0xff] }
  0x99   : > { %3806 = vmatprep.subr.bf16.mxu0 %v4733_v56  ;;  %3847 = vmatprep.subr.bf16.mxu1 %v4861_v57  ;;  %v832_v12 = vld [vmem:[#allocation8 + $0x480] sm:$0xff]  ;;  %v4709_v16 = vcombine.high %v704_v10, %v708_v11  ;;  %v4708_v22 = vcombine.low %v704_v10, %v708_v11 }
  0x9a   : > { %v836_v13 = vld [vmem:[#allocation8 + $0x4a0] sm:$0xff] }
  0x9b   : > { %v4837_v17 = vcombine.high %v832_v12, %v836_v13  ;;  %v696_v18 = vld [vmem:[#allocation8 + $0x40] sm:$0xff]  ;;  %v4836_v23 = vcombine.low %v832_v12, %v836_v13 }
  0x9c   : > { %3807 = vmatpush1.bf16.msra.mxu0 %v4732_v62  ;;  %3848 = vmatpush1.bf16.msra.mxu1 %v4860_v63  ;;  %v700_v19 = vld [vmem:[#allocation8 + $0x60] sm:$0xff] }
  0x9d   : > { %3808 = vmatprep.subr.bf16.mxu0 %v4725_v0  ;;  %3849 = vmatprep.subr.bf16.mxu1 %v4853_v1  ;;  %v824_v20 = vld [vmem:[#allocation8 + $0x440] sm:$0xff]  ;;  %v4701_v24 = vcombine.high %v696_v18, %v700_v19  ;;  %v4700_v30 = vcombine.low %v696_v18, %v700_v19 }
  0x9e   : > { %v828_v21 = vld [vmem:[#allocation8 + $0x460] sm:$0xff] }
  0x9f   : > { %v4829_v25 = vcombine.high %v824_v20, %v828_v21  ;;  %v688_v26 = vld [vmem:[#allocation8] sm:$0xff]  ;;  %v4828_v31 = vcombine.low %v824_v20, %v828_v21 }
  0xa0   : > { %3809 = vmatpush1.bf16.msra.mxu0 %v4724_v6  ;;  %3850 = vmatpush1.bf16.msra.mxu1 %v4852_v7  ;;  %v692_v27 = vld [vmem:[#allocation8 + $0x20] sm:$0xff] }
  0xa1   : > { %3810 = vmatprep.subr.bf16.mxu0 %v4717_v8  ;;  %3851 = vmatprep.subr.bf16.mxu1 %v4845_v9  ;;  %v816_v28 = vld [vmem:[#allocation8 + $0x400] sm:$0xff]  ;;  %v4693_v32 = vcombine.high %v688_v26, %v692_v27  ;;  %v4692_v38 = vcombine.low %v688_v26, %v692_v27 }
  0xa2   : > { %v820_v29 = vld [vmem:[#allocation8 + $0x420] sm:$0xff] }
  0xa3   : > { %v4821_v33 = vcombine.high %v816_v28, %v820_v29  ;;  %v808_v34 = vld [vmem:[#allocation8 + $0x3c0] sm:$0xff]  ;;  %v4820_v39 = vcombine.low %v816_v28, %v820_v29 }
  0xa4   : > { %3811 = vmatpush1.bf16.msra.mxu0 %v4716_v14  ;;  %3852 = vmatpush1.bf16.msra.mxu1 %v4844_v15  ;;  %v812_v35 = vld [vmem:[#allocation8 + $0x3e0] sm:$0xff] }
  0xa5   : > { %3812 = vmatprep.subr.bf16.mxu0 %v4709_v16  ;;  %3853 = vmatprep.subr.bf16.mxu1 %v4837_v17  ;;  %v936_v36 = vld [vmem:[#allocation8 + $0x7c0] sm:$0xff]  ;;  %v4813_v40 = vcombine.high %v808_v34, %v812_v35  ;;  %v4812_v46 = vcombine.low %v808_v34, %v812_v35 }
  0xa6   : > { %v940_v37 = vld [vmem:[#allocation8 + $0x7e0] sm:$0xff] }
  0xa7   : > { %v4941_v41 = vcombine.high %v936_v36, %v940_v37  ;;  %v800_v42 = vld [vmem:[#allocation8 + $0x380] sm:$0xff]  ;;  %v4940_v47 = vcombine.low %v936_v36, %v940_v37 }
  0xa8   : > { %3813 = vmatpush1.bf16.msra.mxu0 %v4708_v22  ;;  %3854 = vmatpush1.bf16.msra.mxu1 %v4836_v23  ;;  %v804_v43 = vld [vmem:[#allocation8 + $0x3a0] sm:$0xff] }
  0xa9   : > { %3814 = vmatprep.subr.bf16.mxu0 %v4701_v24  ;;  %3855 = vmatprep.subr.bf16.mxu1 %v4829_v25  ;;  %v928_v44 = vld [vmem:[#allocation8 + $0x780] sm:$0xff]  ;;  %v4805_v48 = vcombine.high %v800_v42, %v804_v43  ;;  %v4804_v54 = vcombine.low %v800_v42, %v804_v43 }
  0xaa   : > { %v932_v45 = vld [vmem:[#allocation8 + $0x7a0] sm:$0xff] }
  0xab   : > { %v4933_v49 = vcombine.high %v928_v44, %v932_v45  ;;  %v792_v50 = vld [vmem:[#allocation8 + $0x340] sm:$0xff]  ;;  %v4932_v55 = vcombine.low %v928_v44, %v932_v45  ;;  %v384_v44 = vlaneseq }
  0xac   : > { %3815 = vmatpush1.bf16.msra.mxu0 %v4700_v30  ;;  %3856 = vmatpush1.bf16.msra.mxu1 %v4828_v31  ;;  %v796_v51 = vld [vmem:[#allocation8 + $0x360] sm:$0xff] }
  0xad   : > { %3816 = vmatprep.subr.bf16.mxu0 %v4693_v32  ;;  %3857 = vmatprep.subr.bf16.mxu1 %v4821_v33  ;;  %v920_v52 = vld [vmem:[#allocation8 + $0x740] sm:$0xff]  ;;  %v4797_v56 = vcombine.high %v792_v50, %v796_v51  ;;  %v4796_v62 = vcombine.low %v792_v50, %v796_v51  ;;  %v5740_v45 = vshrl.u32 %v384_v44, 7 }
  0xae   : > { %v924_v53 = vld [vmem:[#allocation8 + $0x760] sm:$0xff] }
  0xaf   : > { %v4925_v57 = vcombine.high %v920_v52, %v924_v53  ;;  %v784_v58 = vld [vmem:[#allocation8 + $0x300] sm:$0xff]  ;;  %v4924_v63 = vcombine.low %v920_v52, %v924_v53  ;;  %v5754_v50 = vsub.s32 3, %v5740_v45 }
  0xb0   : > { %3817 = vmatpush1.bf16.msra.mxu0 %v4692_v38  ;;  %3858 = vmatpush1.bf16.msra.mxu1 %v4820_v39  ;;  %v788_v59 = vld [vmem:[#allocation8 + $0x320] sm:$0xff] }
  0xb1   : > { %3818 = vmatprep.subr.bf16.mxu0 %v4813_v40  ;;  %3859 = vmatprep.subr.bf16.mxu1 %v4941_v41  ;;  %v912_v60 = vld [vmem:[#allocation8 + $0x700] sm:$0xff]  ;;  %v4789_v0 = vcombine.high %v784_v58, %v788_v59  ;;  %v4788_v6 = vcombine.low %v784_v58, %v788_v59 }
  0xb2   : > { %v916_v61 = vld [vmem:[#allocation8 + $0x720] sm:$0xff] }
  0xb3   : > { %v4917_v1 = vcombine.high %v912_v60, %v916_v61  ;;  %v776_v2 = vld [vmem:[#allocation8 + $0x2c0] sm:$0xff]  ;;  %v4916_v7 = vcombine.low %v912_v60, %v916_v61 }
  0xb4   : > { %3819 = vmatpush2.bf16.msra.mxu0 %v4812_v46  ;;  %3860 = vmatpush2.bf16.msra.mxu1 %v4940_v47  ;;  %v780_v3 = vld [vmem:[#allocation8 + $0x2e0] sm:$0xff]  ;;  %v5743_v46 = vsub.s32 0, %v5740_v45  ;;  %v5745_v47 = vld [vmem:[#allocation7] sm:$0xff] }
  0xb5   : > { %3820 = vmatprep.subr.bf16.mxu0 %v4805_v48  ;;  %3861 = vmatprep.subr.bf16.mxu1 %v4933_v49  ;;  %v904_v4 = vld [vmem:[#allocation8 + $0x6c0] sm:$0xff]  ;;  %v4781_v8 = vcombine.high %v776_v2, %v780_v3  ;;  %v4780_v14 = vcombine.low %v776_v2, %v780_v3  ;;  %v5748_v48 = vsub.s32 2, %v5740_v45  ;;  %v5751_v49 = vsub.s32 1, %v5740_v45 }
  0xb6   : > { %v908_v5 = vld [vmem:[#allocation8 + $0x6e0] sm:$0xff]  ;;  %v387_v51 = vrot.slane %v5745_v47, %v5743_v46  ;;  %v5768_v3 = vsub.s32 7, %v5740_v45 }
  0xb7   : > { %v4909_v9 = vcombine.high %v904_v4, %v908_v5  ;;  %v768_v10 = vld [vmem:[#allocation8 + $0x280] sm:$0xff]  ;;  %v4908_v15 = vcombine.low %v904_v4, %v908_v5  ;;  %v395_v52 = vrot.slane %v5745_v47, %v5748_v48  ;;  %v391_v53 = vrot.slane %v5745_v47, %v5751_v49 }
  0xb8   : > { %3821 = vmatpush2.bf16.msra.mxu0 %v4804_v54  ;;  %3862 = vmatpush2.bf16.msra.mxu1 %v4932_v55  ;;  %v772_v11 = vld [vmem:[#allocation8 + $0x2a0] sm:$0xff]  ;;  %v399_v55 = vrot.slane %v5745_v47, %v5754_v50 }
  0xb9   : > { %3822 = vmatprep.subr.bf16.mxu0 %v4797_v56  ;;  %3863 = vmatprep.subr.bf16.mxu1 %v4925_v57  ;;  %v896_v12 = vld [vmem:[#allocation8 + $0x680] sm:$0xff]  ;;  %v4773_v16 = vcombine.high %v768_v10, %v772_v11  ;;  %v4772_v18 = vcombine.low %v768_v10, %v772_v11 }
  0xba   : > { %v900_v13 = vld [vmem:[#allocation8 + $0x6a0] sm:$0xff] }
  0xbb   : > { %v4901_v17 = vcombine.high %v896_v12, %v900_v13  ;;  %v4900_v19 = vcombine.low %v896_v12, %v900_v13  ;;  %v760_v20 = vld [vmem:[#allocation8 + $0x240] sm:$0xff] }
  0xbc   : > { %3823 = vmatpush2.bf16.msra.mxu0 %v4796_v62  ;;  %3864 = vmatpush2.bf16.msra.mxu1 %v4924_v63  ;;  %v764_v21 = vld [vmem:[#allocation8 + $0x260] sm:$0xff]  ;;  %v5765_v62 = vsub.s32 5, %v5740_v45 }
  0xbd   : > { %3824 = vmatprep.subr.bf16.mxu0 %v4789_v0  ;;  %3865 = vmatprep.subr.bf16.mxu1 %v4917_v1  ;;  %v888_v22 = vld [vmem:[#allocation8 + $0x640] sm:$0xff]  ;;  %v4765_v23 = vcombine.high %v760_v20, %v764_v21  ;;  %v4764_v25 = vcombine.low %v760_v20, %v764_v21  ;;  %v415_v20 = vrot.slane %v5745_v47, %v5768_v3 }
  0xbe   : > { %v892_v24 = vld [vmem:[#allocation8 + $0x660] sm:$0xff] }
  0xbf   : > { %v4892_v26 = vcombine.low %v888_v22, %v892_v24  ;;  %v4893_v27 = vcombine.high %v888_v22, %v892_v24  ;;  %v752_v28 = vld [vmem:[#allocation8 + $0x200] sm:$0xff] }
  0xc0   : > { %3825 = vmatpush2.bf16.msra.mxu0 %v4788_v6  ;;  %3866 = vmatpush2.bf16.msra.mxu1 %v4916_v7  ;;  %v756_v29 = vld [vmem:[#allocation8 + $0x220] sm:$0xff] }
  0xc1   : > { %3826 = vmatprep.subr.bf16.mxu0 %v4781_v8  ;;  %3867 = vmatprep.subr.bf16.mxu1 %v4909_v9  ;;  %v880_v30 = vld [vmem:[#allocation8 + $0x600] sm:$0xff]  ;;  %v4757_v31 = vcombine.high %v752_v28, %v756_v29  ;;  %v4756_v33 = vcombine.low %v752_v28, %v756_v29 }
  0xc2   : > { %v884_v32 = vld [vmem:[#allocation8 + $0x620] sm:$0xff] }
  0xc3   : > { %v4884_v34 = vcombine.low %v880_v30, %v884_v32  ;;  %v4885_v35 = vcombine.high %v880_v30, %v884_v32  ;;  %v5732_v36 = vld [vmem:[#allocation8 + $0x9c0] sm:$0xff] }
  0xc4   : > { %3827 = vmatpush2.bf16.msra.mxu0 %v4780_v14  ;;  %3868 = vmatpush2.bf16.msra.mxu1 %v4908_v15  ;;  %v1004_v37 = vld [vmem:[#allocation8 + $0x9e0] sm:$0xff]  ;;  %v407_v15 = vrot.slane %v5745_v47, %v5765_v62 }
  0xc5   : > { %3828 = vmatprep.subr.bf16.mxu0 %v4773_v16  ;;  %3869 = vmatprep.subr.bf16.mxu1 %v4901_v17  ;;  %v5734_v38 = vld [vmem:[#allocation8 + $0xdc0] sm:$0xff]  ;;  %v5005_v39 = vcombine.high %v5732_v36, %v1004_v37  ;;  %v5004_v41 = vcombine.low %v5732_v36, %v1004_v37 }
  0xc6   : > { %v1132_v40 = vld [vmem:[#allocation8 + $0xde0] sm:$0xff] }
  0xc7   : > { %v5132_v42 = vcombine.low %v5734_v38, %v1132_v40  ;;  %v5133_v43 = vcombine.high %v5734_v38, %v1132_v40  ;;  %v992_v6 = vld [vmem:[#allocation8 + $0x980] sm:$0xff] }
  0xc8   : > { %3829 = vmatpush2.bf16.msra.mxu0 %v4772_v18  ;;  %3870 = vmatpush2.bf16.msra.mxu1 %v4900_v19  ;;  %v996_v7 = vld [vmem:[#allocation8 + $0x9a0] sm:$0xff] }
  0xc9   : > { %3830 = vmatprep.subr.bf16.mxu0 %v4765_v23  ;;  %3871 = vmatprep.subr.bf16.mxu1 %v4893_v27  ;;  %v1120_v10 = vld [vmem:[#allocation8 + $0xd80] sm:$0xff]  ;;  %v4997_v18 = vcombine.high %v992_v6, %v996_v7  ;;  %v4996_v28 = vcombine.low %v992_v6, %v996_v7 }
  0xca   : > { %v1124_v11 = vld [vmem:[#allocation8 + $0xda0] sm:$0xff] }
  0xcb   : > { %v5125_v21 = vcombine.high %v1120_v10, %v1124_v11  ;;  %v984_v22 = vld [vmem:[#allocation8 + $0x940] sm:$0xff] }
  0xcc   : > { %3831 = vmatpush2.bf16.msra.mxu0 %v4764_v25  ;;  %3872 = vmatpush2.bf16.msra.mxu1 %v4892_v26  ;;  %v988_v23 = vld [vmem:[#allocation8 + $0x960] sm:$0xff] }
  0xcd   : > { %3832 = vmatprep.subr.bf16.mxu0 %v4757_v31  ;;  %3873 = vmatprep.subr.bf16.mxu1 %v4885_v35  ;;  %v1112_v25 = vld [vmem:[#allocation8 + $0xd40] sm:$0xff]  ;;  %v5124_v31 = vcombine.low %v1120_v10, %v1124_v11  ;;  %v4989_v32 = vcombine.high %v984_v22, %v988_v23 }
  0xce   : > { %v1116_v26 = vld [vmem:[#allocation8 + $0xd60] sm:$0xff] }
  0xcf   : > { %v5117_v35 = vcombine.high %v1112_v25, %v1116_v26  ;;  %v976_v36 = vld [vmem:[#allocation8 + $0x900] sm:$0xff] }
  0xd0   : > { %3833 = vmatpush2.bf16.msra.mxu0 %v4756_v33  ;;  %3874 = vmatpush2.bf16.msra.mxu1 %v4884_v34  ;;  %v980_v37 = vld [vmem:[#allocation8 + $0x920] sm:$0xff] }
  0xd1   : > { %3884 = vmatprep.subr.bf16.mxu0 %v5005_v39  ;;  %3925 = vmatprep.subr.bf16.mxu1 %v5133_v43  ;;  %v1104_v40 = vld [vmem:[#allocation8 + $0xd00] sm:$0xff] }
  0xd2   : > { %v1108_v43 = vld [vmem:[#allocation8 + $0xd20] sm:$0xff] }
  0xd3   : > { %v1092_v6 = vld [vmem:[#allocation8 + $0xca0] sm:$0xff] }
  0xd4   : > { %v952_v11 = vld [vmem:[#allocation8 + $0x840] sm:$0xff] }
 0x14b   : > { %v542_v54 = vpop.f32.mrf.mxu0  ;;  %v583_v57 = vpop.f32.mrf.mxu1 }
 0x14c   : > { %v543_v56 = vadd.f32 %v542_v54, %v387_v51  ;;  %v584_v58 = vadd.f32 %v583_v57, %v395_v52  ;;  %v4981_v54 = vcombine.high %v976_v36, %v980_v37  ;;  %v968_v57 = vld [vmem:[#allocation8 + $0x8c0] sm:$0xff] }
 0x14d   : > { %v544_v59 = vpop.f32.mrf.mxu0  ;;  %v585_v61 = vpop.f32.mrf.mxu1 }
 0x14e   : > { %v545_v60 = vadd.f32 %v544_v59, %v391_v53  ;;  %v672_v63 = vmax.f32 %v543_v56, 0.0  ;;  %v674_v0 = vmax.f32 %v584_v58, 0.0  ;;  %v586_v1 = vadd.f32 %v585_v61, %v399_v55  ;;  %v972_v58 = vld [vmem:[#allocation8 + $0x8e0] sm:$0xff] }
 0x14f   : > { %v546_v2 = vpop.f32.mrf.mxu0  ;;  %v587_v5 = vpop.f32.mrf.mxu1  ;;  %v5116_v53 = vcombine.low %v1112_v25, %v1116_v26  ;;  %v5109_v56 = vcombine.high %v1104_v40, %v1108_v43  ;;  %v1096_v59 = vld [vmem:[#allocation8 + $0xcc0] sm:$0xff]  ;;  %v4980_v61 = vcombine.low %v976_v36, %v980_v37  ;;  %v4972_v7 = vcombine.low %v968_v57, %v972_v58 }
 0x150   : > { %v673_v4 = vmax.f32 %v545_v60, 0.0  ;;  %v675_v8 = vmax.f32 %v586_v1, 0.0  ;;  %v5770_v12 = vpack.c.bf16 %v674_v0, %v674_v0  ;;  %v5776_v16 = vpack.c.bf16 %v672_v63, %v672_v63  ;;  %v1100_v60 = vld [vmem:[#allocation8 + $0xce0] sm:$0xff] }
 0x151   : > { %v547_v9 = vpop.f32.mrf.mxu0  ;;  %v588_v14 = vpop.f32.mrf.mxu1  ;;  %v5108_v63 = vcombine.low %v1104_v40, %v1108_v43  ;;  %v4973_v0 = vcombine.high %v968_v57, %v972_v58  ;;  %v5101_v1 = vcombine.high %v1096_v59, %v1100_v60  ;;  %v960_v2 = vld [vmem:[#allocation8 + $0x880] sm:$0xff] }
 0x152   : > { %v5772_v13 = vpack.c.bf16 %v673_v4, %v673_v4  ;;  %v5778_v17 = vpack.c.bf16 %v675_v8, %v675_v8  ;;  %v964_v4 = vld [vmem:[#allocation8 + $0x8a0] sm:$0xff]  ;;  %v5100_v8 = vcombine.low %v1096_v59, %v1100_v60 }
 0x153   : > { %v5780_v19 = vpop.f32.mrf.mxu0  ;;  %v5785_v24 = vpop.f32.mrf.mxu1  ;;  %v1088_v5 = vld [vmem:[#allocation8 + $0xc80] sm:$0xff]  ;;  %v4965_v9 = vcombine.high %v960_v2, %v964_v4 }
 0x154   : > { %3834 = vmatprep.mubr.bf16.mxu0 %v5772_v13  ;;  %3875 = vmatprep.mubr.bf16.mxu1 %v5778_v17  ;;  %v5093_v10 = vcombine.high %v1088_v5, %v1092_v6  ;;  %v956_v14 = vld [vmem:[#allocation8 + $0x860] sm:$0xff] }
 0x155   : > { %3835 = vmatmul.mubr.bf16.vlgmr.msra.gmra.mxu0 %v5776_v16  ;;  %v626_v27 = vpop.f32.mrf.mxu0  ;;  %3876 = vmatmul.mubr.bf16.vlgmr.msra.gmra.mxu1 %v5770_v12  ;;  %v667_v30 = vpop.f32.mrf.mxu1  ;;  %v944_v25 = vld [vmem:[#allocation8 + $0x800] sm:$0xff] }
 0x156   : > { %3885 = vmatpush1.bf16.msra.mxu0 %v5004_v41  ;;  %v627_v29 = vadd.f32 %v626_v27, %v407_v15  ;;  %3926 = vmatpush1.bf16.msra.mxu1 %v5132_v42  ;;  %v668_v34 = vadd.f32 %v667_v30, %v415_v20  ;;  %v4988_v41 = vcombine.low %v984_v22, %v988_v23  ;;  %v1080_v15 = vld [vmem:[#allocation8 + $0xc40] sm:$0xff] }
 0x157   : > { %3886 = vmatprep.subr.bf16.mxu0 %v4997_v18  ;;  %v628_v33 = vpop.f32.mrf.mxu0  ;;  %3927 = vmatprep.subr.bf16.mxu1 %v5125_v21  ;;  %v669_v39 = vpop.f32.mrf.mxu1  ;;  %v1084_v18 = vld [vmem:[#allocation8 + $0xc60] sm:$0xff]  ;;  %v4964_v20 = vcombine.low %v960_v2, %v964_v4  ;;  %v5092_v21 = vcombine.low %v1088_v5, %v1092_v6  ;;  %v4957_v22 = vcombine.high %v952_v11, %v956_v14 }
 0x158   : > { %v677_v38 = vmax.f32 %v627_v29, 0.0  ;;  %v679_v44 = vmax.f32 %v668_v34, 0.0  ;;  %v5085_v23 = vcombine.high %v1080_v15, %v1084_v18  ;;  %v948_v26 = vld [vmem:[#allocation8 + $0x820] sm:$0xff]  ;;  %v4956_v29 = vcombine.low %v952_v11, %v956_v14 }
 0x159   : > { %v629_v51 = vpop.f32.mrf.mxu0  ;;  %v670_v42 = vpop.f32.mrf.mxu1  ;;  %v1072_v27 = vld [vmem:[#allocation8 + $0xc00] sm:$0xff]  ;;  %v5084_v30 = vcombine.low %v1080_v15, %v1084_v18  ;;  %v4948_v37 = vcombine.low %v944_v25, %v948_v26 }
 0x15a   : > { %3887 = vmatpush1.bf16.msra.mxu0 %v4996_v28  ;;  %v5790_v52 = vpack.c.bf16 %v677_v38, %v677_v38  ;;  %3928 = vmatpush1.bf16.msra.mxu1 %v5124_v31  ;;  %v5792_v55 = vpack.c.bf16 %v679_v44, %v679_v44  ;;  %v1076_v28 = vld [vmem:[#allocation8 + $0xc20] sm:$0xff]  ;;  %v4949_v31 = vcombine.high %v944_v25, %v948_v26 }
 0x15b   : > { %3888 = vmatprep.subr.bf16.mxu0 %v4989_v32  ;;  %3929 = vmatprep.subr.bf16.mxu1 %v5117_v35  ;;  %v5077_v32 = vcombine.high %v1072_v27, %v1076_v28  ;;  %v1064_v33 = vld [vmem:[#allocation8 + $0xbc0] sm:$0xff]  ;;  %v5076_v38 = vcombine.low %v1072_v27, %v1076_v28 }
 0x15c   : > { %3916 = vmatprep.mubr.bf16.mxu0 %v5790_v52  ;;  %3957 = vmatprep.mubr.bf16.mxu1 %v5792_v55  ;;  %v1068_v34 = vld [vmem:[#allocation8 + $0xbe0] sm:$0xff] }
 0x15d   : > { %v1192_v35 = vld [vmem:[#allocation8 + $0xfc0] sm:$0xff]  ;;  %v5069_v39 = vcombine.high %v1064_v33, %v1068_v34  ;;  %v5068_v42 = vcombine.low %v1064_v33, %v1068_v34 }
 0x15e   : > { %3889 = vmatpush1.bf16.msra.mxu0 %v4988_v41  ;;  %3930 = vmatpush1.bf16.msra.mxu1 %v5116_v53  ;;  %v1196_v36 = vld [vmem:[#allocation8 + $0xfe0] sm:$0xff] }
 0x15f   : > { %3890 = vmatprep.subr.bf16.mxu0 %v4981_v54  ;;  %3931 = vmatprep.subr.bf16.mxu1 %v5109_v56  ;;  %v5197_v40 = vcombine.high %v1192_v35, %v1196_v36  ;;  %v1056_v43 = vld [vmem:[#allocation8 + $0xb80] sm:$0xff]  ;;  %v5196_v53 = vcombine.low %v1192_v35, %v1196_v36 }
 0x160   : > { %v1060_v44 = vld [vmem:[#allocation8 + $0xba0] sm:$0xff] }
 0x161   : > { %v1184_v51 = vld [vmem:[#allocation8 + $0xf80] sm:$0xff]  ;;  %v5061_v54 = vcombine.high %v1056_v43, %v1060_v44 }
 0x162   : > { %3891 = vmatpush1.bf16.msra.mxu0 %v4980_v61  ;;  %3932 = vmatpush1.bf16.msra.mxu1 %v5108_v63  ;;  %v1188_v41 = vld [vmem:[#allocation8 + $0xfa0] sm:$0xff]  ;;  %v5060_v61 = vcombine.low %v1056_v43, %v1060_v44 }
 0x163   : > { %3892 = vmatprep.subr.bf16.mxu0 %v4973_v0  ;;  %3933 = vmatprep.subr.bf16.mxu1 %v5101_v1  ;;  %v5189_v56 = vcombine.high %v1184_v51, %v1188_v41  ;;  %v1048_v57 = vld [vmem:[#allocation8 + $0xb40] sm:$0xff]  ;;  %v5188_v63 = vcombine.low %v1184_v51, %v1188_v41 }
 0x164   : > { %v1052_v58 = vld [vmem:[#allocation8 + $0xb60] sm:$0xff] }
 0x165   : > { %v1176_v59 = vld [vmem:[#allocation8 + $0xf40] sm:$0xff]  ;;  %v5053_v0 = vcombine.high %v1048_v57, %v1052_v58 }
 0x166   : > { %3893 = vmatpush1.bf16.msra.mxu0 %v4972_v7  ;;  %3934 = vmatpush1.bf16.msra.mxu1 %v5100_v8  ;;  %v1180_v60 = vld [vmem:[#allocation8 + $0xf60] sm:$0xff]  ;;  %v5052_v7 = vcombine.low %v1048_v57, %v1052_v58 }
 0x167   : > { %3894 = vmatprep.subr.bf16.mxu0 %v4965_v9  ;;  %3935 = vmatprep.subr.bf16.mxu1 %v5093_v10  ;;  %v5181_v1 = vcombine.high %v1176_v59, %v1180_v60  ;;  %v1040_v2 = vld [vmem:[#allocation8 + $0xb00] sm:$0xff]  ;;  %v5180_v8 = vcombine.low %v1176_v59, %v1180_v60 }
 0x168   : > { %v1044_v4 = vld [vmem:[#allocation8 + $0xb20] sm:$0xff] }
 0x169   : > { %v1168_v5 = vld [vmem:[#allocation8 + $0xf00] sm:$0xff]  ;;  %v5045_v9 = vcombine.high %v1040_v2, %v1044_v4 }
 0x16a   : > { %3895 = vmatpush1.bf16.msra.mxu0 %v4964_v20  ;;  %3936 = vmatpush1.bf16.msra.mxu1 %v5092_v21  ;;  %v1172_v6 = vld [vmem:[#allocation8 + $0xf20] sm:$0xff]  ;;  %v5044_v20 = vcombine.low %v1040_v2, %v1044_v4 }
 0x16b   : > { %3896 = vmatprep.subr.bf16.mxu0 %v4957_v22  ;;  %3937 = vmatprep.subr.bf16.mxu1 %v5085_v23  ;;  %v5173_v10 = vcombine.high %v1168_v5, %v1172_v6  ;;  %v1032_v11 = vld [vmem:[#allocation8 + $0xac0] sm:$0xff]  ;;  %v5172_v21 = vcombine.low %v1168_v5, %v1172_v6 }
 0x16c   : > { %v1036_v14 = vld [vmem:[#allocation8 + $0xae0] sm:$0xff] }
 0x16d   : > { %v1160_v15 = vld [vmem:[#allocation8 + $0xec0] sm:$0xff]  ;;  %v5037_v22 = vcombine.high %v1032_v11, %v1036_v14 }
 0x16e   : > { %3897 = vmatpush1.bf16.msra.mxu0 %v4956_v29  ;;  %3938 = vmatpush1.bf16.msra.mxu1 %v5084_v30  ;;  %v1164_v18 = vld [vmem:[#allocation8 + $0xee0] sm:$0xff]  ;;  %v5036_v29 = vcombine.low %v1032_v11, %v1036_v14  ;;  %v5797_v30 = vsub.s32 6, %v5740_v45  ;;  %v865_v11 = vld [vmem:[#allocation8 + $0x588] sm:$0xff] }
 0x16f   : > { %3898 = vmatprep.subr.bf16.mxu0 %v4949_v31  ;;  %3939 = vmatprep.subr.bf16.mxu1 %v5077_v32  ;;  %v5165_v23 = vcombine.high %v1160_v15, %v1164_v18  ;;  %v1024_v25 = vld [vmem:[#allocation8 + $0xa80] sm:$0xff]  ;;  %v5164_v31 = vcombine.low %v1160_v15, %v1164_v18  ;;  %v5800_v32 = vsub.s32 4, %v5740_v45  ;;  %v869_v14 = vld [vmem:[#allocation8 + $0x5a8] sm:$0xff] }
 0x170   : > { %v1028_v26 = vld [vmem:[#allocation8 + $0xaa0] sm:$0xff] }
 0x171   : > { %v1152_v27 = vld [vmem:[#allocation8 + $0xe80] sm:$0xff]  ;;  %v5029_v33 = vcombine.high %v1024_v25, %v1028_v26  ;;  %v403_v43 = vrot.slane %v5745_v47, %v5800_v32 }
 0x172   : > { %3899 = vmatpush1.bf16.msra.mxu0 %v4948_v37  ;;  %3940 = vmatpush1.bf16.msra.mxu1 %v5076_v38  ;;  %v1156_v28 = vld [vmem:[#allocation8 + $0xea0] sm:$0xff] }
 0x173   : > { %3900 = vmatprep.subr.bf16.mxu0 %v5069_v39  ;;  %3941 = vmatprep.subr.bf16.mxu1 %v5197_v40  ;;  %v5157_v34 = vcombine.high %v1152_v27, %v1156_v28  ;;  %v1016_v35 = vld [vmem:[#allocation8 + $0xa40] sm:$0xff]  ;;  %v411_v39 = vrot.slane %v5745_v47, %v5797_v30  ;;  %v5028_v40 = vcombine.low %v1024_v25, %v1028_v26  ;;  %v857_v25 = vld [vmem:[#allocation8 + $0x548] sm:$0xff] }
 0x174   : > { %v1020_v36 = vld [vmem:[#allocation8 + $0xa60] sm:$0xff]  ;;  %v5156_v44 = vcombine.low %v1152_v27, %v1156_v28  ;;  %v625_v58 = vadd.f32 %v5780_v19, %v403_v43  ;;  %v861_v26 = vld [vmem:[#allocation8 + $0x568] sm:$0xff]  ;;  %v4870_v28 = vcombine.low %v865_v11, %v869_v14 }
 0x175   : > { %v1144_v37 = vld [vmem:[#allocation8 + $0xe40] sm:$0xff]  ;;  %v5021_v45 = vcombine.high %v1016_v35, %v1020_v36  ;;  %v5020_v57 = vcombine.low %v1016_v35, %v1020_v36  ;;  %v849_v35 = vld [vmem:[#allocation8 + $0x508] sm:$0xff] }
 0x176   : > { %3901 = vmatpush2.bf16.msra.mxu0 %v5068_v42  ;;  %3942 = vmatpush2.bf16.msra.mxu1 %v5196_v53  ;;  %v1148_v38 = vld [vmem:[#allocation8 + $0xe60] sm:$0xff]  ;;  %v676_v5 = vmax.f32 %v625_v58, 0.0  ;;  %v853_v36 = vld [vmem:[#allocation8 + $0x528] sm:$0xff] }
 0x177   : > { %3902 = vmatprep.subr.bf16.mxu0 %v5061_v54  ;;  %3943 = vmatprep.subr.bf16.mxu1 %v5189_v56  ;;  %v5149_v51 = vcombine.high %v1144_v37, %v1148_v38  ;;  %v1008_v41 = vld [vmem:[#allocation8 + $0xa00] sm:$0xff]  ;;  %v666_v56 = vadd.f32 %v5785_v24, %v411_v39  ;;  %v5148_v59 = vcombine.low %v1144_v37, %v1148_v38  ;;  %v713_v43 = vld [vmem:[#allocation8 + $0xc8] sm:$0xff] }
 0x178   : > { %v1012_v42 = vld [vmem:[#allocation8 + $0xa20] sm:$0xff]  ;;  %v5810_v15 = vpack.c.bf16 %v676_v5, %v676_v5  ;;  %v4862_v38 = vcombine.low %v857_v25, %v861_v26  ;;  %v833_v58 = vld [vmem:[#allocation8 + $0x488] sm:$0xff] }
 0x179   : > { %v1136_v53 = vld [vmem:[#allocation8 + $0xe00] sm:$0xff]  ;;  %v5013_v47 = vcombine.high %v1008_v41, %v1012_v42  ;;  %v678_v2 = vmax.f32 %v666_v56, 0.0  ;;  %v5012_v4 = vcombine.low %v1008_v41, %v1012_v42  ;;  %v4854_v42 = vcombine.low %v849_v35, %v853_v36  ;;  %v705_v56 = vld [vmem:[#allocation8 + $0x88] sm:$0xff] }
 0x17a   : > { %3903 = vmatpush2.bf16.msra.mxu0 %v5060_v61  ;;  %3944 = vmatpush2.bf16.msra.mxu1 %v5188_v63  ;;  %v1140_v54 = vld [vmem:[#allocation8 + $0xe20] sm:$0xff]  ;;  %v745_v61 = vld [vmem:[#allocation8 + $0x1c8] sm:$0xff] }
 0x17b   : > { %3904 = vmatprep.subr.bf16.mxu0 %v5053_v0  ;;  %3945 = vmatprep.subr.bf16.mxu1 %v5181_v1  ;;  %v5141_v60 = vcombine.high %v1136_v53, %v1140_v54  ;;  %v749_v63 = vld [vmem:[#allocation8 + $0x1e8] sm:$0xff]  ;;  %v5140_v24 = vcombine.low %v1136_v53, %v1140_v54 }
 0x17c   : > { %v873_v0 = vld [vmem:[#allocation8 + $0x5c8] sm:$0xff]  ;;  %v4751_v6 = vcombine.high %v745_v61, %v749_v63 }
 0x17d   : > { %v877_v1 = vld [vmem:[#allocation8 + $0x5e8] sm:$0xff] }
 0x17e   : > { %3905 = vmatpush2.bf16.msra.mxu0 %v5052_v7  ;;  %3946 = vmatpush2.bf16.msra.mxu1 %v5180_v8  ;;  %v4879_v19 = vcombine.high %v873_v0, %v877_v1  ;;  %v737_v7 = vld [vmem:[#allocation8 + $0x188] sm:$0xff]  ;;  %v4878_v18 = vcombine.low %v873_v0, %v877_v1 }
 0x17f   : > { %3906 = vmatprep.subr.bf16.mxu0 %v5045_v9  ;;  %3947 = vmatprep.subr.bf16.mxu1 %v5173_v10  ;;  %v741_v8 = vld [vmem:[#allocation8 + $0x1a8] sm:$0xff]  ;;  %v5808_v9 = vpack.c.bf16 %v678_v2, %v678_v2  ;;  %v4750_v10 = vcombine.low %v745_v61, %v749_v63 }
 0x180   : > { %v4742_v27 = vcombine.low %v737_v7, %v741_v8  ;;  %v697_v0 = vld [vmem:[#allocation8 + $0x48] sm:$0xff] }
 0x181   : > { %v701_v1 = vld [vmem:[#allocation8 + $0x68] sm:$0xff] }
 0x182   : > { %3907 = vmatpush2.bf16.msra.mxu0 %v5044_v20  ;;  %3948 = vmatpush2.bf16.msra.mxu1 %v5172_v21  ;;  %v4743_v20 = vcombine.high %v737_v7, %v741_v8  ;;  %v729_v21 = vld [vmem:[#allocation8 + $0x148] sm:$0xff] }
 0x183   : > { %3908 = vmatprep.subr.bf16.mxu0 %v5037_v22  ;;  %3949 = vmatprep.subr.bf16.mxu1 %v5165_v23  ;;  %v733_v22 = vld [vmem:[#allocation8 + $0x168] sm:$0xff]  ;;  %v4871_v23 = vcombine.high %v865_v11, %v869_v14  ;;  %v4702_v14 = vcombine.low %v697_v0, %v701_v1 }
 0x184   : > { %v4734_v37 = vcombine.low %v729_v21, %v733_v22  ;;  %v825_v2 = vld [vmem:[#allocation8 + $0x448] sm:$0xff] }
 0x185   : > { %v689_v7 = vld [vmem:[#allocation8 + $0x8] sm:$0xff] }
 0x186   : > { %3909 = vmatpush2.bf16.msra.mxu0 %v5036_v29  ;;  %3950 = vmatpush2.bf16.msra.mxu1 %v5164_v31  ;;  %v4735_v29 = vcombine.high %v729_v21, %v733_v22  ;;  %v4863_v31 = vcombine.high %v857_v25, %v861_v26  ;;  %v693_v8 = vld [vmem:[#allocation8 + $0x28] sm:$0xff] }
 0x187   : > { %3910 = vmatprep.subr.bf16.mxu0 %v5029_v33  ;;  %3951 = vmatprep.subr.bf16.mxu1 %v5157_v34  ;;  %v721_v33 = vld [vmem:[#allocation8 + $0x108] sm:$0xff] }
 0x188   : > { %v725_v34 = vld [vmem:[#allocation8 + $0x128] sm:$0xff] }
 0x189   : > { %v4727_v39 = vcombine.high %v721_v33, %v725_v34  ;;  %v4726_v41 = vcombine.low %v721_v33, %v725_v34  ;;  %v821_v11 = vld [vmem:[#allocation8 + $0x428] sm:$0xff] }
 0x18a   : > { %3911 = vmatpush2.bf16.msra.mxu0 %v5028_v40  ;;  %3952 = vmatpush2.bf16.msra.mxu1 %v5156_v44  ;;  %v4855_v40 = vcombine.high %v849_v35, %v853_v36  ;;  %v717_v44 = vld [vmem:[#allocation8 + $0xe8] sm:$0xff] }
 0x18b   : > { %3912 = vmatprep.subr.bf16.mxu0 %v5021_v45  ;;  %3953 = vmatprep.subr.bf16.mxu1 %v5149_v51  ;;  %v841_v45 = vld [vmem:[#allocation8 + $0x4c8] sm:$0xff]  ;;  %v4719_v53 = vcombine.high %v713_v43, %v717_v44 }
 0x18c   : > { %v845_v51 = vld [vmem:[#allocation8 + $0x4e8] sm:$0xff] }
 0x18d   : > { %v4847_v54 = vcombine.high %v841_v45, %v845_v51  ;;  %v809_v22 = vld [vmem:[#allocation8 + $0x3c8] sm:$0xff] }
 0x18e   : > { %3913 = vmatpush2.bf16.msra.mxu0 %v5020_v57  ;;  %3954 = vmatpush2.bf16.msra.mxu1 %v5148_v59  ;;  %v709_v57 = vld [vmem:[#allocation8 + $0xa8] sm:$0xff] }
 0x18f   : > { %3914 = vmatprep.subr.bf16.mxu0 %v5013_v47  ;;  %3955 = vmatprep.subr.bf16.mxu1 %v5141_v60  ;;  %v837_v59 = vld [vmem:[#allocation8 + $0x4a8] sm:$0xff]  ;;  %v4718_v47 = vcombine.low %v713_v43, %v717_v44  ;;  %v4846_v60 = vcombine.low %v841_v45, %v845_v51  ;;  %v4711_v61 = vcombine.high %v705_v56, %v709_v57 }
 0x190   : > { %v4839_v63 = vcombine.high %v833_v58, %v837_v59  ;;  %v4710_v5 = vcombine.low %v705_v56, %v709_v57  ;;  %v937_v25 = vld [vmem:[#allocation8 + $0x7c8] sm:$0xff] }
 0x191   : > { %v941_v26 = vld [vmem:[#allocation8 + $0x7e8] sm:$0xff] }
 0x192   : > { %3915 = vmatpush2.bf16.msra.mxu0 %v5012_v4  ;;  %3956 = vmatpush2.bf16.msra.mxu1 %v5140_v24  ;;  %v829_v4 = vld [vmem:[#allocation8 + $0x468] sm:$0xff]  ;;  %v4838_v24 = vcombine.low %v833_v58, %v837_v59 }
 0x193   : > { %3966 = vmatprep.subr.bf16.mxu0 %v4751_v6  ;;  %4007 = vmatprep.subr.bf16.mxu1 %v4879_v19  ;;  %v4703_v6 = vcombine.high %v697_v0, %v701_v1  ;;  %v4831_v19 = vcombine.high %v825_v2, %v829_v4  ;;  %v801_v33 = vld [vmem:[#allocation8 + $0x388] sm:$0xff] }
 0x194   : > { %v805_v34 = vld [vmem:[#allocation8 + $0x3a8] sm:$0xff] }
 0x195   : > { %3917 = vmatmul.mubr.bf16.vlgmr.msra.gmra.mxu0 %v5810_v15  ;;  %3958 = vmatmul.mubr.bf16.vlgmr.msra.gmra.mxu1 %v5808_v9  ;;  %v929_v35 = vld [vmem:[#allocation8 + $0x788] sm:$0xff] }
 0x196   : > { %3967 = vmatpush1.bf16.msra.mxu0 %v4750_v10  ;;  %3998 = vmatprep.mubr.bf16.mxu0 %v5772_v13  ;;  %v817_v10 = vld [vmem:[#allocation8 + $0x408] sm:$0xff] }
 0x197   : > { %4008 = vmatpush1.bf16.msra.mxu1 %v4878_v18  ;;  %4039 = vmatprep.mubr.bf16.mxu1 %v5778_v17  ;;  %v4830_v18 = vcombine.low %v825_v2, %v829_v4  ;;  %v4823_v21 = vcombine.high %v817_v10, %v821_v11  ;;  %v933_v36 = vld [vmem:[#allocation8 + $0x7a8] sm:$0xff] }
 0x198   : > { %3968 = vmatprep.subr.bf16.mxu0 %v4743_v20  ;;  %4009 = vmatprep.subr.bf16.mxu1 %v4871_v23  ;;  %v4695_v20 = vcombine.high %v689_v7, %v693_v8  ;;  %v813_v23 = vld [vmem:[#allocation8 + $0x3e8] sm:$0xff] }
 0x199   : > { %v793_v43 = vld [vmem:[#allocation8 + $0x348] sm:$0xff] }
 0x19a   : > { %3969 = vmatpush1.bf16.msra.mxu0 %v4742_v27  ;;  %v4694_v27 = vcombine.low %v689_v7, %v693_v8  ;;  %v797_v44 = vld [vmem:[#allocation8 + $0x368] sm:$0xff] }
 0x19b   : > { %4010 = vmatpush1.bf16.msra.mxu1 %v4870_v28  ;;  %3970 = vmatprep.subr.bf16.mxu0 %v4735_v29  ;;  %v4822_v28 = vcombine.low %v817_v10, %v821_v11  ;;  %v4815_v29 = vcombine.high %v809_v22, %v813_v23  ;;  %v921_v45 = vld [vmem:[#allocation8 + $0x748] sm:$0xff] }
 0x19c   : > { %4011 = vmatprep.subr.bf16.mxu1 %v4863_v31  ;;  %v4943_v31 = vcombine.high %v937_v25, %v941_v26  ;;  %v925_v51 = vld [vmem:[#allocation8 + $0x768] sm:$0xff] }
 0x19d   : > { %v785_v56 = vld [vmem:[#allocation8 + $0x308] sm:$0xff] }
 0x19e   : > { %3971 = vmatpush1.bf16.msra.mxu0 %v4734_v37  ;;  %v4814_v37 = vcombine.low %v809_v22, %v813_v23  ;;  %v789_v57 = vld [vmem:[#allocation8 + $0x328] sm:$0xff] }
 0x19f   : > { %4012 = vmatpush1.bf16.msra.mxu1 %v4862_v38  ;;  %3972 = vmatprep.subr.bf16.mxu0 %v4727_v39  ;;  %v4942_v38 = vcombine.low %v937_v25, %v941_v26  ;;  %v4807_v39 = vcombine.high %v801_v33, %v805_v34  ;;  %v913_v58 = vld [vmem:[#allocation8 + $0x708] sm:$0xff] }
 0x1a0   : > { %4013 = vmatprep.subr.bf16.mxu1 %v4855_v40  ;;  %v4935_v40 = vcombine.high %v929_v35, %v933_v36  ;;  %v917_v59 = vld [vmem:[#allocation8 + $0x728] sm:$0xff] }
 0x1a1   : > { %v777_v0 = vld [vmem:[#allocation8 + $0x2c8] sm:$0xff] }
 0x1a2   : > { %3973 = vmatpush1.bf16.msra.mxu0 %v4726_v41  ;;  %v4806_v41 = vcombine.low %v801_v33, %v805_v34  ;;  %v781_v1 = vld [vmem:[#allocation8 + $0x2e8] sm:$0xff] }
 0x1a3   : > { %4014 = vmatpush1.bf16.msra.mxu1 %v4854_v42  ;;  %3974 = vmatprep.subr.bf16.mxu0 %v4719_v53  ;;  %v4934_v42 = vcombine.low %v929_v35, %v933_v36  ;;  %v4799_v53 = vcombine.high %v793_v43, %v797_v44  ;;  %v905_v2 = vld [vmem:[#allocation8 + $0x6c8] sm:$0xff] }
 0x1a4   : > { %4015 = vmatprep.subr.bf16.mxu1 %v4847_v54  ;;  %v4927_v54 = vcombine.high %v921_v45, %v925_v51  ;;  %v909_v4 = vld [vmem:[#allocation8 + $0x6e8] sm:$0xff] }
 0x1a5   : > { %v769_v7 = vld [vmem:[#allocation8 + $0x288] sm:$0xff] }
 0x1a6   : > { %3975 = vmatpush1.bf16.msra.mxu0 %v4718_v47  ;;  %v4798_v47 = vcombine.low %v793_v43, %v797_v44  ;;  %v773_v8 = vld [vmem:[#allocation8 + $0x2a8] sm:$0xff] }
 0x1a7   : > { %4016 = vmatpush1.bf16.msra.mxu1 %v4846_v60  ;;  %3976 = vmatprep.subr.bf16.mxu0 %v4711_v61  ;;  %v4926_v60 = vcombine.low %v921_v45, %v925_v51  ;;  %v4791_v61 = vcombine.high %v785_v56, %v789_v57  ;;  %v897_v10 = vld [vmem:[#allocation8 + $0x688] sm:$0xff] }
 0x1a8   : > { %4017 = vmatprep.subr.bf16.mxu1 %v4839_v63  ;;  %v4919_v63 = vcombine.high %v913_v58, %v917_v59  ;;  %v901_v11 = vld [vmem:[#allocation8 + $0x6a8] sm:$0xff] }
 0x1a9   : > { %v761_v22 = vld [vmem:[#allocation8 + $0x248] sm:$0xff] }
 0x1aa   : > { %3977 = vmatpush1.bf16.msra.mxu0 %v4710_v5  ;;  %v4790_v5 = vcombine.low %v785_v56, %v789_v57  ;;  %v765_v23 = vld [vmem:[#allocation8 + $0x268] sm:$0xff] }
 0x1ab   : > { %4018 = vmatpush1.bf16.msra.mxu1 %v4838_v24  ;;  %3978 = vmatprep.subr.bf16.mxu0 %v4703_v6  ;;  %v4918_v24 = vcombine.low %v913_v58, %v917_v59  ;;  %v4783_v6 = vcombine.high %v777_v0, %v781_v1  ;;  %v889_v25 = vld [vmem:[#allocation8 + $0x648] sm:$0xff] }
 0x1ac   : > { %4019 = vmatprep.subr.bf16.mxu1 %v4831_v19  ;;  %v4911_v19 = vcombine.high %v905_v2, %v909_v4  ;;  %v893_v26 = vld [vmem:[#allocation8 + $0x668] sm:$0xff] }
 0x1ad   : > { %v753_v33 = vld [vmem:[#allocation8 + $0x208] sm:$0xff] }
 0x1ae   : > { %3979 = vmatpush1.bf16.msra.mxu0 %v4702_v14  ;;  %v4782_v14 = vcombine.low %v777_v0, %v781_v1  ;;  %v757_v34 = vld [vmem:[#allocation8 + $0x228] sm:$0xff] }
 0x1af   : > { %4020 = vmatpush1.bf16.msra.mxu1 %v4830_v18  ;;  %3980 = vmatprep.subr.bf16.mxu0 %v4695_v20  ;;  %v4910_v18 = vcombine.low %v905_v2, %v909_v4  ;;  %v4775_v20 = vcombine.high %v769_v7, %v773_v8  ;;  %v881_v35 = vld [vmem:[#allocation8 + $0x608] sm:$0xff] }
 0x1b0   : > { %4021 = vmatprep.subr.bf16.mxu1 %v4823_v21  ;;  %v4903_v21 = vcombine.high %v897_v10, %v901_v11  ;;  %v885_v36 = vld [vmem:[#allocation8 + $0x628] sm:$0xff] }
 0x1b1   : > { %v1001_v43 = vld [vmem:[#allocation8 + $0x9c8] sm:$0xff] }
 0x1b2   : > { %3981 = vmatpush1.bf16.msra.mxu0 %v4694_v27  ;;  %v4774_v27 = vcombine.low %v769_v7, %v773_v8  ;;  %v1005_v44 = vld [vmem:[#allocation8 + $0x9e8] sm:$0xff] }
 0x1b3   : > { %4022 = vmatpush1.bf16.msra.mxu1 %v4822_v28  ;;  %3982 = vmatprep.subr.bf16.mxu0 %v4815_v29  ;;  %v4902_v28 = vcombine.low %v897_v10, %v901_v11  ;;  %v4767_v29 = vcombine.high %v761_v22, %v765_v23  ;;  %v1129_v45 = vld [vmem:[#allocation8 + $0xdc8] sm:$0xff]  ;;  %v5006_v58 = vcombine.low %v1001_v43, %v1005_v44 }
 0x1b4   : > { %4023 = vmatprep.subr.bf16.mxu1 %v4943_v31  ;;  %v4895_v31 = vcombine.high %v889_v25, %v893_v26  ;;  %v1133_v51 = vld [vmem:[#allocation8 + $0xde8] sm:$0xff] }
 0x1b5   : > { %v993_v56 = vld [vmem:[#allocation8 + $0x988] sm:$0xff] }
 0x1b6   : > { %3983 = vmatpush2.bf16.msra.mxu0 %v4814_v37  ;;  %v4766_v37 = vcombine.low %v761_v22, %v765_v23  ;;  %v997_v57 = vld [vmem:[#allocation8 + $0x9a8] sm:$0xff] }
 0x1b7   : > { %4024 = vmatpush2.bf16.msra.mxu1 %v4942_v38  ;;  %3984 = vmatprep.subr.bf16.mxu0 %v4807_v39  ;;  %v4894_v38 = vcombine.low %v889_v25, %v893_v26  ;;  %v4759_v39 = vcombine.high %v753_v33, %v757_v34  ;;  %v1121_v59 = vld [vmem:[#allocation8 + $0xd88] sm:$0xff] }
 0x1b8   : > { %4025 = vmatprep.subr.bf16.mxu1 %v4935_v40  ;;  %v4887_v40 = vcombine.high %v881_v35, %v885_v36  ;;  %v989_v0 = vld [vmem:[#allocation8 + $0x968] sm:$0xff] }
 0x1b9   : > { %v1113_v2 = vld [vmem:[#allocation8 + $0xd48] sm:$0xff] }
 0x1ba   : > { %3985 = vmatpush2.bf16.msra.mxu0 %v4806_v41  ;;  %v4758_v41 = vcombine.low %v753_v33, %v757_v34  ;;  %v1117_v4 = vld [vmem:[#allocation8 + $0xd68] sm:$0xff] }
 0x1bb   : > { %4026 = vmatpush2.bf16.msra.mxu1 %v4934_v42  ;;  %3986 = vmatprep.subr.bf16.mxu0 %v4799_v53  ;;  %v4886_v42 = vcombine.low %v881_v35, %v885_v36  ;;  %v5007_v53 = vcombine.high %v1001_v43, %v1005_v44  ;;  %v977_v7 = vld [vmem:[#allocation8 + $0x908] sm:$0xff] }
 0x1bc   : > { %4027 = vmatprep.subr.bf16.mxu1 %v4927_v54  ;;  %v5135_v54 = vcombine.high %v1129_v45, %v1133_v51  ;;  %v981_v8 = vld [vmem:[#allocation8 + $0x928] sm:$0xff] }
 0x1bd   : > { %v1105_v10 = vld [vmem:[#allocation8 + $0xd08] sm:$0xff] }
 0x1be   : > { %3987 = vmatpush2.bf16.msra.mxu0 %v4798_v47  ;;  %v1125_v47 = vld [vmem:[#allocation8 + $0xda8] sm:$0xff] }
 0x1bf   : > { %4028 = vmatpush2.bf16.msra.mxu1 %v4926_v60  ;;  %3988 = vmatprep.subr.bf16.mxu0 %v4791_v61  ;;  %v5134_v60 = vcombine.low %v1129_v45, %v1133_v51  ;;  %v4999_v61 = vcombine.high %v993_v56, %v997_v57  ;;  %v5127_v1 = vcombine.high %v1121_v59, %v1125_v47  ;;  %v1109_v11 = vld [vmem:[#allocation8 + $0xd28] sm:$0xff] }
 0x1c0   : > { %4029 = vmatprep.subr.bf16.mxu1 %v4919_v63  ;;  %v985_v63 = vld [vmem:[#allocation8 + $0x948] sm:$0xff] }
 0x1c1   : > { %v969_v22 = vld [vmem:[#allocation8 + $0x8c8] sm:$0xff] }
 0x1c2   : > { %3989 = vmatpush2.bf16.msra.mxu0 %v4790_v5  ;;  %v4998_v5 = vcombine.low %v993_v56, %v997_v57  ;;  %v973_v23 = vld [vmem:[#allocation8 + $0x8e8] sm:$0xff] }
 0x1c3   : > { %4030 = vmatpush2.bf16.msra.mxu1 %v4918_v24  ;;  %3990 = vmatprep.subr.bf16.mxu0 %v4783_v6  ;;  %v5126_v24 = vcombine.low %v1121_v59, %v1125_v47  ;;  %v4991_v6 = vcombine.high %v985_v63, %v989_v0  ;;  %v1097_v25 = vld [vmem:[#allocation8 + $0xcc8] sm:$0xff] }
 0x1c4   : > { %4031 = vmatprep.subr.bf16.mxu1 %v4911_v19  ;;  %v5119_v19 = vcombine.high %v1113_v2, %v1117_v4  ;;  %v1101_v26 = vld [vmem:[#allocation8 + $0xce8] sm:$0xff] }
 0x1c5   : > { %v961_v33 = vld [vmem:[#allocation8 + $0x888] sm:$0xff] }
 0x1c6   : > { %3991 = vmatpush2.bf16.msra.mxu0 %v4782_v14  ;;  %v4990_v14 = vcombine.low %v985_v63, %v989_v0  ;;  %v965_v34 = vld [vmem:[#allocation8 + $0x8a8] sm:$0xff] }
 0x1c7   : > { %4032 = vmatpush2.bf16.msra.mxu1 %v4910_v18  ;;  %3992 = vmatprep.subr.bf16.mxu0 %v4775_v20  ;;  %v5118_v18 = vcombine.low %v1113_v2, %v1117_v4  ;;  %v4983_v20 = vcombine.high %v977_v7, %v981_v8  ;;  %v1089_v35 = vld [vmem:[#allocation8 + $0xc88] sm:$0xff] }
 0x1c8   : > { %4033 = vmatprep.subr.bf16.mxu1 %v4903_v21  ;;  %v5111_v21 = vcombine.high %v1105_v10, %v1109_v11  ;;  %v1093_v36 = vld [vmem:[#allocation8 + $0xca8] sm:$0xff] }
 0x1c9   : > { %v953_v43 = vld [vmem:[#allocation8 + $0x848] sm:$0xff] }
 0x1ca   : > { %3993 = vmatpush2.bf16.msra.mxu0 %v4774_v27  ;;  %v4982_v27 = vcombine.low %v977_v7, %v981_v8  ;;  %v957_v44 = vld [vmem:[#allocation8 + $0x868] sm:$0xff] }
 0x1cb   : > { %4034 = vmatpush2.bf16.msra.mxu1 %v4902_v28  ;;  %3994 = vmatprep.subr.bf16.mxu0 %v4767_v29  ;;  %v5110_v28 = vcombine.low %v1105_v10, %v1109_v11  ;;  %v4975_v29 = vcombine.high %v969_v22, %v973_v23  ;;  %v1081_v45 = vld [vmem:[#allocation8 + $0xc48] sm:$0xff]  ;;  %v4958_v47 = vcombine.low %v953_v43, %v957_v44 }
 0x1cc   : > { %4035 = vmatprep.subr.bf16.mxu1 %v4895_v31  ;;  %v5103_v31 = vcombine.high %v1097_v25, %v1101_v26  ;;  %v1085_v51 = vld [vmem:[#allocation8 + $0xc68] sm:$0xff] }
 0x1cd   : > { %v945_v56 = vld [vmem:[#allocation8 + $0x808] sm:$0xff] }
 0x1ce   : > { %3995 = vmatpush2.bf16.msra.mxu0 %v4766_v37  ;;  %v4974_v37 = vcombine.low %v969_v22, %v973_v23  ;;  %v949_v57 = vld [vmem:[#allocation8 + $0x828] sm:$0xff] }
 0x1cf   : > { %4036 = vmatpush2.bf16.msra.mxu1 %v4894_v38  ;;  %3996 = vmatprep.subr.bf16.mxu0 %v4759_v39  ;;  %v5102_v38 = vcombine.low %v1097_v25, %v1101_v26  ;;  %v4967_v39 = vcombine.high %v961_v33, %v965_v34  ;;  %v1077_v59 = vld [vmem:[#allocation8 + $0xc28] sm:$0xff] }
 0x1d0   : > { %4037 = vmatprep.subr.bf16.mxu1 %v4887_v40  ;;  %v5095_v40 = vcombine.high %v1089_v35, %v1093_v36  ;;  %v1065_v0 = vld [vmem:[#allocation8 + $0xbc8] sm:$0xff] }
 0x1d1   : > { %v1193_v2 = vld [vmem:[#allocation8 + $0xfc8] sm:$0xff] }
 0x1d2   : > { %3997 = vmatpush2.bf16.msra.mxu0 %v4758_v41  ;;  %v4966_v41 = vcombine.low %v961_v33, %v965_v34  ;;  %v1197_v4 = vld [vmem:[#allocation8 + $0xfe8] sm:$0xff] }
 0x1d3   : > { %4038 = vmatpush2.bf16.msra.mxu1 %v4886_v42  ;;  %4048 = vmatprep.subr.bf16.mxu0 %v5007_v53  ;;  %v5094_v42 = vcombine.low %v1089_v35, %v1093_v36  ;;  %v4959_v53 = vcombine.high %v953_v43, %v957_v44  ;;  %v1057_v7 = vld [vmem:[#allocation8 + $0xb88] sm:$0xff] }
 0x1d4   : > { %4089 = vmatprep.subr.bf16.mxu1 %v5135_v54  ;;  %v5087_v54 = vcombine.high %v1081_v45, %v1085_v51  ;;  %v1061_v8 = vld [vmem:[#allocation8 + $0xba8] sm:$0xff] }
 0x1d5   : > { %3999 = vmatmul.mubr.bf16.vlgmr.msra.gmra.mxu0 %v5776_v16  ;;  %v1185_v10 = vld [vmem:[#allocation8 + $0xf88] sm:$0xff] }
 0x1d6   : > { %4040 = vmatmul.mubr.bf16.vlgmr.msra.gmra.mxu1 %v5770_v12  ;;  %4049 = vmatpush1.bf16.msra.mxu0 %v5006_v58  ;;  %v1073_v58 = vld [vmem:[#allocation8 + $0xc08] sm:$0xff] }
 0x1d7   : > { %4080 = vmatprep.mubr.bf16.mxu0 %v5790_v52  ;;  %4090 = vmatpush1.bf16.msra.mxu1 %v5134_v60  ;;  %v5086_v60 = vcombine.low %v1081_v45, %v1085_v51  ;;  %v5079_v63 = vcombine.high %v1073_v58, %v1077_v59  ;;  %v1189_v11 = vld [vmem:[#allocation8 + $0xfa8] sm:$0xff] }
 0x1d8   : > { %4121 = vmatprep.mubr.bf16.mxu1 %v5792_v55  ;;  %4050 = vmatprep.subr.bf16.mxu0 %v4999_v61  ;;  %v4951_v61 = vcombine.high %v945_v56, %v949_v57  ;;  %v1049_v22 = vld [vmem:[#allocation8 + $0xb48] sm:$0xff] }
 0x1d9   : > { %4091 = vmatprep.subr.bf16.mxu1 %v5127_v1  ;;  %v1069_v1 = vld [vmem:[#allocation8 + $0xbe8] sm:$0xff] }
 0x1da   : > { %4051 = vmatpush1.bf16.msra.mxu0 %v4998_v5  ;;  %v4950_v5 = vcombine.low %v945_v56, %v949_v57  ;;  %v1053_v23 = vld [vmem:[#allocation8 + $0xb68] sm:$0xff] }
 0x1db   : > { %4092 = vmatpush1.bf16.msra.mxu1 %v5126_v24  ;;  %4052 = vmatprep.subr.bf16.mxu0 %v4991_v6  ;;  %v5078_v24 = vcombine.low %v1073_v58, %v1077_v59  ;;  %v5071_v6 = vcombine.high %v1065_v0, %v1069_v1  ;;  %v1177_v25 = vld [vmem:[#allocation8 + $0xf48] sm:$0xff] }
 0x1dc   : > { %4093 = vmatprep.subr.bf16.mxu1 %v5119_v19  ;;  %v5199_v19 = vcombine.high %v1193_v2, %v1197_v4  ;;  %v1181_v26 = vld [vmem:[#allocation8 + $0xf68] sm:$0xff] }
 0x1dd   : > { %v1041_v33 = vld [vmem:[#allocation8 + $0xb08] sm:$0xff] }
 0x1de   : > { %4053 = vmatpush1.bf16.msra.mxu0 %v4990_v14  ;;  %v5070_v14 = vcombine.low %v1065_v0, %v1069_v1  ;;  %v1045_v34 = vld [vmem:[#allocation8 + $0xb28] sm:$0xff] }
 0x1df   : > { %4094 = vmatpush1.bf16.msra.mxu1 %v5118_v18  ;;  %4054 = vmatprep.subr.bf16.mxu0 %v4983_v20  ;;  %v5198_v18 = vcombine.low %v1193_v2, %v1197_v4  ;;  %v5063_v20 = vcombine.high %v1057_v7, %v1061_v8  ;;  %v1169_v35 = vld [vmem:[#allocation8 + $0xf08] sm:$0xff] }
 0x1e0   : > { %4095 = vmatprep.subr.bf16.mxu1 %v5111_v21  ;;  %v5191_v21 = vcombine.high %v1185_v10, %v1189_v11  ;;  %v1173_v36 = vld [vmem:[#allocation8 + $0xf28] sm:$0xff] }
 0x1e1   : > { %v1033_v43 = vld [vmem:[#allocation8 + $0xac8] sm:$0xff] }
 0x1e2   : > { %4055 = vmatpush1.bf16.msra.mxu0 %v4982_v27  ;;  %v5062_v27 = vcombine.low %v1057_v7, %v1061_v8  ;;  %v1037_v44 = vld [vmem:[#allocation8 + $0xae8] sm:$0xff] }
 0x1e3   : > { %4096 = vmatpush1.bf16.msra.mxu1 %v5110_v28  ;;  %4056 = vmatprep.subr.bf16.mxu0 %v4975_v29  ;;  %v5190_v28 = vcombine.low %v1185_v10, %v1189_v11  ;;  %v5055_v29 = vcombine.high %v1049_v22, %v1053_v23  ;;  %v1161_v45 = vld [vmem:[#allocation8 + $0xec8] sm:$0xff] }
 0x1e4   : > { %4097 = vmatprep.subr.bf16.mxu1 %v5103_v31  ;;  %v5183_v31 = vcombine.high %v1177_v25, %v1181_v26  ;;  %v1165_v51 = vld [vmem:[#allocation8 + $0xee8] sm:$0xff] }
 0x1e5   : > { %v1025_v56 = vld [vmem:[#allocation8 + $0xa88] sm:$0xff] }
 0x1e6   : > { %4057 = vmatpush1.bf16.msra.mxu0 %v4974_v37  ;;  %v5054_v37 = vcombine.low %v1049_v22, %v1053_v23  ;;  %v1029_v57 = vld [vmem:[#allocation8 + $0xaa8] sm:$0xff]  ;;  %v746_v22 = vld [vmem:[#allocation8 + $0x1d0] sm:$0xff] }
 0x1e7   : > { %4098 = vmatpush1.bf16.msra.mxu1 %v5102_v38  ;;  %4058 = vmatprep.subr.bf16.mxu0 %v4967_v39  ;;  %v5182_v38 = vcombine.low %v1177_v25, %v1181_v26  ;;  %v5047_v39 = vcombine.high %v1041_v33, %v1045_v34  ;;  %v1153_v58 = vld [vmem:[#allocation8 + $0xe88] sm:$0xff]  ;;  %v750_v23 = vld [vmem:[#allocation8 + $0x1f0] sm:$0xff] }
 0x1e8   : > { %4099 = vmatprep.subr.bf16.mxu1 %v5095_v40  ;;  %v5175_v40 = vcombine.high %v1169_v35, %v1173_v36  ;;  %v1157_v59 = vld [vmem:[#allocation8 + $0xea8] sm:$0xff]  ;;  %v874_v25 = vld [vmem:[#allocation8 + $0x5d0] sm:$0xff] }
 0x1e9   : > { %v1017_v0 = vld [vmem:[#allocation8 + $0xa48] sm:$0xff]  ;;  %v878_v26 = vld [vmem:[#allocation8 + $0x5f0] sm:$0xff] }
 0x1ea   : > { %4059 = vmatpush1.bf16.msra.mxu0 %v4966_v41  ;;  %v5046_v41 = vcombine.low %v1041_v33, %v1045_v34  ;;  %v1021_v1 = vld [vmem:[#allocation8 + $0xa68] sm:$0xff]  ;;  %v4881_v33 = vcombine.high %v874_v25, %v878_v26  ;;  %v738_v34 = vld [vmem:[#allocation8 + $0x190] sm:$0xff] }
 0x1eb   : > { %4100 = vmatpush1.bf16.msra.mxu1 %v5094_v42  ;;  %4060 = vmatprep.subr.bf16.mxu0 %v4959_v53  ;;  %v5174_v42 = vcombine.low %v1169_v35, %v1173_v36  ;;  %v5039_v53 = vcombine.high %v1033_v43, %v1037_v44  ;;  %v1145_v2 = vld [vmem:[#allocation8 + $0xe48] sm:$0xff]  ;;  %v742_v35 = vld [vmem:[#allocation8 + $0x1b0] sm:$0xff]  ;;  %v4752_v36 = vcombine.low %v746_v22, %v750_v23 }
 0x1ec   : > { %4101 = vmatprep.subr.bf16.mxu1 %v5087_v54  ;;  %v5167_v54 = vcombine.high %v1161_v45, %v1165_v51  ;;  %v1149_v4 = vld [vmem:[#allocation8 + $0xe68] sm:$0xff] }
 0x1ed   : > { %v1009_v7 = vld [vmem:[#allocation8 + $0xa08] sm:$0xff] }
 0x1ee   : > { %4061 = vmatpush1.bf16.msra.mxu0 %v4958_v47  ;;  %v5038_v47 = vcombine.low %v1033_v43, %v1037_v44  ;;  %v1013_v8 = vld [vmem:[#allocation8 + $0xa28] sm:$0xff]  ;;  %v4745_v44 = vcombine.high %v738_v34, %v742_v35 }
 0x1ef   : > { %4102 = vmatpush1.bf16.msra.mxu1 %v5086_v60  ;;  %4062 = vmatprep.subr.bf16.mxu0 %v4951_v61  ;;  %v5166_v60 = vcombine.low %v1161_v45, %v1165_v51  ;;  %v5031_v61 = vcombine.high %v1025_v56, %v1029_v57  ;;  %v1137_v10 = vld [vmem:[#allocation8 + $0xe08] sm:$0xff]  ;;  %v730_v45 = vld [vmem:[#allocation8 + $0x150] sm:$0xff] }
 0x1f0   : > { %4103 = vmatprep.subr.bf16.mxu1 %v5079_v63  ;;  %v5159_v63 = vcombine.high %v1153_v58, %v1157_v59  ;;  %v1141_v11 = vld [vmem:[#allocation8 + $0xe28] sm:$0xff]  ;;  %v734_v51 = vld [vmem:[#allocation8 + $0x170] sm:$0xff] }
 0x1f2   : > { %4063 = vmatpush1.bf16.msra.mxu0 %v4950_v5  ;;  %v5030_v5 = vcombine.low %v1025_v56, %v1029_v57 }
 0x1f3   : > { %4104 = vmatpush1.bf16.msra.mxu1 %v5078_v24  ;;  %4064 = vmatprep.subr.bf16.mxu0 %v5071_v6  ;;  %v5158_v24 = vcombine.low %v1153_v58, %v1157_v59  ;;  %v5023_v6 = vcombine.high %v1017_v0, %v1021_v1  ;;  %v4744_v58 = vcombine.low %v738_v34, %v742_v35  ;;  %v710_v34 = vld [vmem:[#allocation8 + $0xb0] sm:$0xff] }
 0x1f4   : > { %4105 = vmatprep.subr.bf16.mxu1 %v5199_v19  ;;  %v5151_v19 = vcombine.high %v1145_v2, %v1149_v4  ;;  %v834_v35 = vld [vmem:[#allocation8 + $0x490] sm:$0xff] }
 0x1f6   : > { %4065 = vmatpush2.bf16.msra.mxu0 %v5070_v14  ;;  %v5022_v14 = vcombine.low %v1017_v0, %v1021_v1 }
 0x1f7   : > { %4106 = vmatpush2.bf16.msra.mxu1 %v5198_v18  ;;  %4066 = vmatprep.subr.bf16.mxu0 %v5063_v20  ;;  %v5150_v18 = vcombine.low %v1145_v2, %v1149_v4  ;;  %v5015_v20 = vcombine.high %v1009_v7, %v1013_v8  ;;  %v722_v2 = vld [vmem:[#allocation8 + $0x110] sm:$0xff] }
 0x1f8   : > { %4107 = vmatprep.subr.bf16.mxu1 %v5191_v21  ;;  %v5143_v21 = vcombine.high %v1137_v10, %v1141_v11  ;;  %v726_v4 = vld [vmem:[#allocation8 + $0x130] sm:$0xff] }
 0x1fa   : > { %4067 = vmatpush2.bf16.msra.mxu0 %v5062_v27  ;;  %v5014_v27 = vcombine.low %v1009_v7, %v1013_v8  ;;  %v4736_v8 = vcombine.low %v730_v45, %v734_v51 }
 0x1fb   : > { %4108 = vmatpush2.bf16.msra.mxu1 %v5190_v28  ;;  %4068 = vmatprep.subr.bf16.mxu0 %v5055_v29  ;;  %v5142_v28 = vcombine.low %v1137_v10, %v1141_v11  ;;  %v4753_v29 = vcombine.high %v746_v22, %v750_v23  ;;  %v718_v22 = vld [vmem:[#allocation8 + $0xf0] sm:$0xff] }
 0x1fc   : > { %4109 = vmatprep.subr.bf16.mxu1 %v5183_v31  ;;  %v5820_v31 = vld [vmem:[#allocation10] sm:$0xff]  ;;  %v842_v23 = vld [vmem:[#allocation8 + $0x4d0] sm:$0xff] }
 0x1fd   : > { %v1209_v43 = vrot.slane %v5820_v31, %v5751_v49 }
 0x1fe   : > { %4069 = vmatpush2.bf16.msra.mxu0 %v5054_v37  ;;  %v1205_v37 = vrot.slane %v5820_v31, %v5743_v46 }
 0x1ff   : > { %4110 = vmatpush2.bf16.msra.mxu1 %v5182_v38  ;;  %4070 = vmatprep.subr.bf16.mxu0 %v5047_v39  ;;  %v866_v38 = vld [vmem:[#allocation8 + $0x590] sm:$0xff] }
 0x200   : > { %4111 = vmatprep.subr.bf16.mxu1 %v5175_v40  ;;  %v870_v39 = vld [vmem:[#allocation8 + $0x5b0] sm:$0xff]  ;;  %v4880_v40 = vcombine.low %v874_v25, %v878_v26  ;;  %v4728_v26 = vcombine.low %v722_v2, %v726_v4 }
 0x201   : > { %v846_v25 = vld [vmem:[#allocation8 + $0x4f0] sm:$0xff] }
 0x202   : > { %4071 = vmatpush2.bf16.msra.mxu0 %v5046_v41 }
 0x203   : > { %4112 = vmatpush2.bf16.msra.mxu1 %v5174_v42  ;;  %4072 = vmatprep.subr.bf16.mxu0 %v5039_v53  ;;  %v4873_v42 = vcombine.high %v866_v38, %v870_v39  ;;  %v858_v53 = vld [vmem:[#allocation8 + $0x550] sm:$0xff] }
 0x204   : > { %4113 = vmatprep.subr.bf16.mxu1 %v5167_v54  ;;  %v862_v54 = vld [vmem:[#allocation8 + $0x570] sm:$0xff] }
 0x205   : > { %v4865_v1 = vcombine.high %v858_v53, %v862_v54  ;;  %v4864_v11 = vcombine.low %v858_v53, %v862_v54 }
 0x206   : > { %4073 = vmatpush2.bf16.msra.mxu0 %v5038_v47  ;;  %v4872_v47 = vcombine.low %v866_v38, %v870_v39  ;;  %v4848_v38 = vcombine.low %v842_v23, %v846_v25 }
 0x207   : > { %4114 = vmatpush2.bf16.msra.mxu1 %v5166_v60  ;;  %4074 = vmatprep.subr.bf16.mxu0 %v5031_v61  ;;  %v4737_v60 = vcombine.high %v730_v45, %v734_v51  ;;  %v826_v45 = vld [vmem:[#allocation8 + $0x450] sm:$0xff] }
 0x208   : > { %4115 = vmatprep.subr.bf16.mxu1 %v5159_v63  ;;  %v830_v51 = vld [vmem:[#allocation8 + $0x470] sm:$0xff] }
 0x209   : > { %v4833_v54 = vcombine.high %v826_v45, %v830_v51 }
 0x20a   : > { %4075 = vmatpush2.bf16.msra.mxu0 %v5030_v5 }
 0x20b   : > { %4116 = vmatpush2.bf16.msra.mxu1 %v5158_v24  ;;  %4076 = vmatprep.subr.bf16.mxu0 %v5023_v6  ;;  %v850_v24 = vld [vmem:[#allocation8 + $0x510] sm:$0xff] }
 0x20c   : > { %4117 = vmatprep.subr.bf16.mxu1 %v5151_v19  ;;  %v854_v6 = vld [vmem:[#allocation8 + $0x530] sm:$0xff] }
 0x20e   : > { %4077 = vmatpush2.bf16.msra.mxu0 %v5022_v14  ;;  %v4729_v14 = vcombine.high %v722_v2, %v726_v4  ;;  %v814_v2 = vld [vmem:[#allocation8 + $0x3f0] sm:$0xff] }
 0x20f   : > { %4118 = vmatpush2.bf16.msra.mxu1 %v5150_v18  ;;  %4078 = vmatprep.subr.bf16.mxu0 %v5015_v20  ;;  %v4857_v20 = vcombine.high %v850_v24, %v854_v6  ;;  %v938_v4 = vld [vmem:[#allocation8 + $0x7d0] sm:$0xff] }
 0x210   : > { %4119 = vmatprep.subr.bf16.mxu1 %v5143_v21  ;;  %v714_v21 = vld [vmem:[#allocation8 + $0xd0] sm:$0xff] }
 0x212   : > { %4079 = vmatpush2.bf16.msra.mxu0 %v5014_v27  ;;  %v4856_v27 = vcombine.low %v850_v24, %v854_v6 }
 0x213   : > { %4120 = vmatpush2.bf16.msra.mxu1 %v5142_v28  ;;  %4130 = vmatprep.subr.bf16.mxu0 %v4753_v29  ;;  %v4721_v28 = vcombine.high %v714_v21, %v718_v22  ;;  %v4849_v29 = vcombine.high %v842_v23, %v846_v25  ;;  %v794_v25 = vld [vmem:[#allocation8 + $0x350] sm:$0xff] }
 0x214   : > { %4171 = vmatprep.subr.bf16.mxu1 %v4881_v33  ;;  %v706_v33 = vld [vmem:[#allocation8 + $0x90] sm:$0xff] }
 0x215   : > { %4081 = vmatmul.mubr.bf16.vlgmr.msra.gmra.mxu0 %v5810_v15  ;;  %v3836_v41 = vpop.f32.mrf.mxu0  ;;  %v3877_v57 = vpop.f32.mrf.mxu1  ;;  %v4713_v39 = vcombine.high %v706_v33, %v710_v34 }
 0x216   : > { %4122 = vmatmul.mubr.bf16.vlgmr.msra.gmra.mxu1 %v5808_v9  ;;  %v3837_v56 = vadd.f32 %v3836_v41, %v1205_v37  ;;  %4131 = vmatpush1.bf16.msra.mxu0 %v4752_v36  ;;  %v838_v36 = vld [vmem:[#allocation8 + $0x4b0] sm:$0xff]  ;;  %v4720_v37 = vcombine.low %v714_v21, %v718_v22  ;;  %v4712_v41 = vcombine.low %v706_v33, %v710_v34 }
 0x217   : > { %4162 = vmatprep.mubr.bf16.mxu0 %v5772_v13  ;;  %4172 = vmatpush1.bf16.msra.mxu1 %v4880_v40  ;;  %v3838_v59 = vpop.f32.mrf.mxu0  ;;  %v3879_v0 = vpop.f32.mrf.mxu1  ;;  %v4841_v40 = vcombine.high %v834_v35, %v838_v36 }
 0x218   : > { %v5829_v61 = vadd.f32 %v3877_v57, %v3837_v56  ;;  %4203 = vmatprep.mubr.bf16.mxu1 %v5778_v17  ;;  %v3839_v63 = vadd.f32 %v3838_v59, %v1209_v43  ;;  %4132 = vmatprep.subr.bf16.mxu0 %v4745_v44  ;;  %v698_v43 = vld [vmem:[#allocation8 + $0x50] sm:$0xff] }
 0x219   : > { %4173 = vmatprep.subr.bf16.mxu1 %v4873_v42  ;;  %v3840_v5 = vpop.f32.mrf.mxu0  ;;  %v3881_v7 = vpop.f32.mrf.mxu1  ;;  %v702_v44 = vld [vmem:[#allocation8 + $0x70] sm:$0xff]  ;;  %v4840_v42 = vcombine.low %v834_v35, %v838_v36 }
 0x21a   : > { %v5832_v19 = vadd.f32 %v3879_v0, %v3839_v63  ;;  %4133 = vmatpush1.bf16.msra.mxu0 %v4744_v58  ;;  %v4705_v53 = vcombine.high %v698_v43, %v702_v44  ;;  %v690_v56 = vld [vmem:[#allocation8 + $0x10] sm:$0xff] }
 0x21b   : > { %4174 = vmatpush1.bf16.msra.mxu1 %v4872_v47  ;;  %v3841_v10 = vpop.f32.mrf.mxu0  ;;  %4134 = vmatprep.subr.bf16.mxu0 %v4737_v60  ;;  %v3882_v18 = vpop.f32.mrf.mxu1  ;;  %v694_v57 = vld [vmem:[#allocation8 + $0x30] sm:$0xff]  ;;  %v4704_v47 = vcombine.low %v698_v43, %v702_v44  ;;  %v4832_v60 = vcombine.low %v826_v45, %v830_v51 }
 0x21c   : > { %4175 = vmatprep.subr.bf16.mxu1 %v4865_v1  ;;  %v818_v58 = vld [vmem:[#allocation8 + $0x410] sm:$0xff]  ;;  %v4697_v63 = vcombine.high %v690_v56, %v694_v57  ;;  %v4696_v24 = vcombine.low %v690_v56, %v694_v57 }
 0x21d   : > { %v822_v59 = vld [vmem:[#allocation8 + $0x430] sm:$0xff] }
 0x21e   : > { %4135 = vmatpush1.bf16.msra.mxu0 %v4736_v8  ;;  %v4825_v0 = vcombine.high %v818_v58, %v822_v59  ;;  %v810_v1 = vld [vmem:[#allocation8 + $0x3d0] sm:$0xff]  ;;  %v4824_v6 = vcombine.low %v818_v58, %v822_v59 }
 0x21f   : > { %4176 = vmatpush1.bf16.msra.mxu1 %v4864_v11  ;;  %4136 = vmatprep.subr.bf16.mxu0 %v4729_v14  ;;  %v942_v5 = vld [vmem:[#allocation8 + $0x7f0] sm:$0xff]  ;;  %v4817_v7 = vcombine.high %v810_v1, %v814_v2 }
 0x220   : > { %4177 = vmatprep.subr.bf16.mxu1 %v4857_v20  ;;  %v4945_v8 = vcombine.high %v938_v4, %v942_v5  ;;  %v802_v10 = vld [vmem:[#allocation8 + $0x390] sm:$0xff]  ;;  %v4816_v20 = vcombine.low %v810_v1, %v814_v2  ;;  %v4944_v21 = vcombine.low %v938_v4, %v942_v5 }
 0x221   : > { %v806_v11 = vld [vmem:[#allocation8 + $0x3b0] sm:$0xff] }
 0x222   : > { %4137 = vmatpush1.bf16.msra.mxu0 %v4728_v26  ;;  %v930_v14 = vld [vmem:[#allocation8 + $0x790] sm:$0xff]  ;;  %v4809_v22 = vcombine.high %v802_v10, %v806_v11 }
 0x223   : > { %4178 = vmatpush1.bf16.msra.mxu1 %v4856_v27  ;;  %4138 = vmatprep.subr.bf16.mxu0 %v4721_v28  ;;  %v934_v18 = vld [vmem:[#allocation8 + $0x7b0] sm:$0xff] }
 0x224   : > { %4179 = vmatprep.subr.bf16.mxu1 %v4849_v29  ;;  %v4937_v23 = vcombine.high %v930_v14, %v934_v18  ;;  %v798_v26 = vld [vmem:[#allocation8 + $0x370] sm:$0xff]  ;;  %v4808_v29 = vcombine.low %v802_v10, %v806_v11  ;;  %v4936_v33 = vcombine.low %v930_v14, %v934_v18 }
 0x225   : > { %v922_v27 = vld [vmem:[#allocation8 + $0x750] sm:$0xff]  ;;  %v4801_v34 = vcombine.high %v794_v25, %v798_v26 }
 0x226   : > { %4139 = vmatpush1.bf16.msra.mxu0 %v4720_v37  ;;  %v926_v28 = vld [vmem:[#allocation8 + $0x770] sm:$0xff] }
 0x227   : > { %4180 = vmatpush1.bf16.msra.mxu1 %v4848_v38  ;;  %4140 = vmatprep.subr.bf16.mxu0 %v4713_v39  ;;  %v4929_v35 = vcombine.high %v922_v27, %v926_v28  ;;  %v786_v36 = vld [vmem:[#allocation8 + $0x310] sm:$0xff]  ;;  %v4928_v43 = vcombine.low %v922_v27, %v926_v28 }
 0x228   : > { %4181 = vmatprep.subr.bf16.mxu1 %v4841_v40  ;;  %v790_v37 = vld [vmem:[#allocation8 + $0x330] sm:$0xff]  ;;  %v4800_v40 = vcombine.low %v794_v25, %v798_v26 }
 0x229   : > { %v914_v38 = vld [vmem:[#allocation8 + $0x710] sm:$0xff]  ;;  %v4793_v44 = vcombine.high %v786_v36, %v790_v37 }
 0x22a   : > { %4141 = vmatpush1.bf16.msra.mxu0 %v4712_v41  ;;  %v918_v39 = vld [vmem:[#allocation8 + $0x730] sm:$0xff] }
 0x22b   : > { %4182 = vmatpush1.bf16.msra.mxu1 %v4840_v42  ;;  %4142 = vmatprep.subr.bf16.mxu0 %v4705_v53  ;;  %v4921_v45 = vcombine.high %v914_v38, %v918_v39  ;;  %v778_v51 = vld [vmem:[#allocation8 + $0x2d0] sm:$0xff]  ;;  %v4920_v56 = vcombine.low %v914_v38, %v918_v39 }
 0x22c   : > { %4183 = vmatprep.subr.bf16.mxu1 %v4833_v54  ;;  %v782_v41 = vld [vmem:[#allocation8 + $0x2f0] sm:$0xff]  ;;  %v4792_v54 = vcombine.low %v786_v36, %v790_v37 }
 0x22d   : > { %v906_v42 = vld [vmem:[#allocation8 + $0x6d0] sm:$0xff]  ;;  %v4785_v57 = vcombine.high %v778_v51, %v782_v41 }
 0x22e   : > { %4143 = vmatpush1.bf16.msra.mxu0 %v4704_v47  ;;  %v910_v53 = vld [vmem:[#allocation8 + $0x6f0] sm:$0xff] }
 0x22f   : > { %4184 = vmatpush1.bf16.msra.mxu1 %v4832_v60  ;;  %4144 = vmatprep.subr.bf16.mxu0 %v4697_v63  ;;  %v4913_v58 = vcombine.high %v906_v42, %v910_v53  ;;  %v770_v59 = vld [vmem:[#allocation8 + $0x290] sm:$0xff]  ;;  %v4912_v1 = vcombine.low %v906_v42, %v910_v53 }
 0x230   : > { %4185 = vmatprep.subr.bf16.mxu1 %v4825_v0  ;;  %v774_v47 = vld [vmem:[#allocation8 + $0x2b0] sm:$0xff]  ;;  %v4784_v0 = vcombine.low %v778_v51, %v782_v41 }
 0x231   : > { %v898_v60 = vld [vmem:[#allocation8 + $0x690] sm:$0xff]  ;;  %v4777_v2 = vcombine.high %v770_v59, %v774_v47 }
 0x232   : > { %4145 = vmatpush1.bf16.msra.mxu0 %v4696_v24  ;;  %v902_v63 = vld [vmem:[#allocation8 + $0x6b0] sm:$0xff] }
 0x233   : > { %4186 = vmatpush1.bf16.msra.mxu1 %v4824_v6  ;;  %4146 = vmatprep.subr.bf16.mxu0 %v4817_v7  ;;  %v4905_v4 = vcombine.high %v898_v60, %v902_v63  ;;  %v762_v5 = vld [vmem:[#allocation8 + $0x250] sm:$0xff]  ;;  %v4904_v10 = vcombine.low %v898_v60, %v902_v63  ;;  %v5836_v60 = vld [vmem:[#allocation11] sm:$0xff] }
 0x234   : > { %4187 = vmatprep.subr.bf16.mxu1 %v4945_v8  ;;  %v766_v24 = vld [vmem:[#allocation8 + $0x270] sm:$0xff]  ;;  %v4776_v8 = vcombine.low %v770_v59, %v774_v47 }
 0x235   : > { %v890_v6 = vld [vmem:[#allocation8 + $0x650] sm:$0xff]  ;;  %v4769_v11 = vcombine.high %v762_v5, %v766_v24 }
 0x236   : > { %4147 = vmatpush2.bf16.msra.mxu0 %v4816_v20  ;;  %v894_v7 = vld [vmem:[#allocation8 + $0x670] sm:$0xff] }
 0x237   : > { %4188 = vmatpush2.bf16.msra.mxu1 %v4944_v21  ;;  %4148 = vmatprep.subr.bf16.mxu0 %v4809_v22  ;;  %v4897_v14 = vcombine.high %v890_v6, %v894_v7  ;;  %v754_v18 = vld [vmem:[#allocation8 + $0x210] sm:$0xff]  ;;  %v4896_v25 = vcombine.low %v890_v6, %v894_v7 }
 0x238   : > { %4189 = vmatprep.subr.bf16.mxu1 %v4937_v23  ;;  %v758_v20 = vld [vmem:[#allocation8 + $0x230] sm:$0xff]  ;;  %v4768_v23 = vcombine.low %v762_v5, %v766_v24 }
 0x239   : > { %v882_v21 = vld [vmem:[#allocation8 + $0x610] sm:$0xff]  ;;  %v4761_v26 = vcombine.high %v754_v18, %v758_v20 }
 0x23a   : > { %4149 = vmatpush2.bf16.msra.mxu0 %v4808_v29  ;;  %v886_v22 = vld [vmem:[#allocation8 + $0x630] sm:$0xff] }
 0x23b   : > { %4190 = vmatpush2.bf16.msra.mxu1 %v4936_v33  ;;  %4150 = vmatprep.subr.bf16.mxu0 %v4801_v34  ;;  %v4889_v27 = vcombine.high %v882_v21, %v886_v22  ;;  %v1002_v28 = vld [vmem:[#allocation8 + $0x9d0] sm:$0xff]  ;;  %v4888_v36 = vcombine.low %v882_v21, %v886_v22  ;;  %v4475_v21 = vrot.slane %v5836_v60, %v5751_v49 }
 0x23c   : > { %4191 = vmatprep.subr.bf16.mxu1 %v4929_v35  ;;  %v1006_v29 = vld [vmem:[#allocation8 + $0x9f0] sm:$0xff]  ;;  %v4760_v35 = vcombine.low %v754_v18, %v758_v20 }
 0x23d   : > { %v1130_v33 = vld [vmem:[#allocation8 + $0xdd0] sm:$0xff]  ;;  %v5009_v37 = vcombine.high %v1002_v28, %v1006_v29 }
 0x23e   : > { %4151 = vmatpush2.bf16.msra.mxu0 %v4800_v40  ;;  %v1134_v34 = vld [vmem:[#allocation8 + $0xdf0] sm:$0xff] }
 0x23f   : > { %4192 = vmatpush2.bf16.msra.mxu1 %v4928_v43  ;;  %4152 = vmatprep.subr.bf16.mxu0 %v4793_v44  ;;  %v5137_v38 = vcombine.high %v1130_v33, %v1134_v34  ;;  %v994_v39 = vld [vmem:[#allocation8 + $0x990] sm:$0xff]  ;;  %v5008_v43 = vcombine.low %v1002_v28, %v1006_v29  ;;  %v5136_v51 = vcombine.low %v1130_v33, %v1134_v34 }
 0x240   : > { %4193 = vmatprep.subr.bf16.mxu1 %v4921_v45  ;;  %v998_v40 = vld [vmem:[#allocation8 + $0x9b0] sm:$0xff] }
 0x241   : > { %v1122_v44 = vld [vmem:[#allocation8 + $0xd90] sm:$0xff]  ;;  %v5001_v41 = vcombine.high %v994_v39, %v998_v40  ;;  %v5000_v63 = vcombine.low %v994_v39, %v998_v40 }
 0x242   : > { %4153 = vmatpush2.bf16.msra.mxu0 %v4792_v54  ;;  %v1126_v45 = vld [vmem:[#allocation8 + $0xdb0] sm:$0xff] }
 0x243   : > { %4194 = vmatpush2.bf16.msra.mxu1 %v4920_v56  ;;  %4154 = vmatprep.subr.bf16.mxu0 %v4785_v57  ;;  %v986_v42 = vld [vmem:[#allocation8 + $0x950] sm:$0xff]  ;;  %v5129_v56 = vcombine.high %v1122_v44, %v1126_v45 }
 0x244   : > { %4195 = vmatprep.subr.bf16.mxu1 %v4913_v58  ;;  %v990_v53 = vld [vmem:[#allocation8 + $0x970] sm:$0xff] }
 0x245   : > { %v1114_v57 = vld [vmem:[#allocation8 + $0xd50] sm:$0xff] }
 0x246   : > { %4155 = vmatpush2.bf16.msra.mxu0 %v4784_v0  ;;  %v1118_v58 = vld [vmem:[#allocation8 + $0xd70] sm:$0xff] }
 0x247   : > { %4196 = vmatpush2.bf16.msra.mxu1 %v4912_v1  ;;  %4156 = vmatprep.subr.bf16.mxu0 %v4777_v2  ;;  %v5128_v1 = vcombine.low %v1122_v44, %v1126_v45  ;;  %v4993_v2 = vcombine.high %v986_v42, %v990_v53  ;;  %v978_v6 = vld [vmem:[#allocation8 + $0x910] sm:$0xff] }
 0x248   : > { %4197 = vmatprep.subr.bf16.mxu1 %v4905_v4  ;;  %v982_v7 = vld [vmem:[#allocation8 + $0x930] sm:$0xff] }
 0x249   : > { %v970_v29 = vld [vmem:[#allocation8 + $0x8d0] sm:$0xff]  ;;  %v4984_v49 = vcombine.low %v978_v6, %v982_v7 }
 0x24a   : > { %4157 = vmatpush2.bf16.msra.mxu0 %v4776_v8  ;;  %v4471_v8 = vrot.slane %v5836_v60, %v5743_v46  ;;  %v974_v33 = vld [vmem:[#allocation8 + $0x8f0] sm:$0xff] }
 0x24b   : > { %4198 = vmatpush2.bf16.msra.mxu1 %v4904_v10  ;;  %4158 = vmatprep.subr.bf16.mxu0 %v4769_v11  ;;  %v1106_v11 = vld [vmem:[#allocation8 + $0xd10] sm:$0xff]  ;;  %v4977_v39 = vcombine.high %v970_v29, %v974_v33 }
 0x24c   : > { %4199 = vmatprep.subr.bf16.mxu1 %v4897_v14  ;;  %v1110_v14 = vld [vmem:[#allocation8 + $0xd30] sm:$0xff] }
 0x24d   : > { %v5113_v46 = vcombine.high %v1106_v11, %v1110_v14  ;;  %v1098_v34 = vld [vmem:[#allocation8 + $0xcd0] sm:$0xff] }
 0x24e   : > { %4159 = vmatpush2.bf16.msra.mxu0 %v4768_v23  ;;  %v962_v44 = vld [vmem:[#allocation8 + $0x890] sm:$0xff] }
 0x24f   : > { %4200 = vmatpush2.bf16.msra.mxu1 %v4896_v25  ;;  %4160 = vmatprep.subr.bf16.mxu0 %v4761_v26  ;;  %v5120_v25 = vcombine.low %v1114_v57, %v1118_v58  ;;  %v4985_v26 = vcombine.high %v978_v6, %v982_v7  ;;  %v966_v45 = vld [vmem:[#allocation8 + $0x8b0] sm:$0xff] }
 0x250   : > { %4201 = vmatprep.subr.bf16.mxu1 %v4889_v27 }
 0x252   : > { %4161 = vmatpush2.bf16.msra.mxu0 %v4760_v35  ;;  %v1102_v35 = vld [vmem:[#allocation8 + $0xcf0] sm:$0xff] }
 0x253   : > { %4202 = vmatpush2.bf16.msra.mxu1 %v4888_v36  ;;  %4212 = vmatprep.subr.bf16.mxu0 %v5009_v37 }
 0x254   : > { %4253 = vmatprep.subr.bf16.mxu1 %v5137_v38  ;;  %v5112_v38 = vcombine.low %v1106_v11, %v1110_v14  ;;  %v1066_v11 = vld [vmem:[#allocation8 + $0xbd0] sm:$0xff] }
 0x255   : > { %v3918_v54 = vpop.f32.mrf.mxu0  ;;  %4163 = vmatmul.mubr.bf16.vlgmr.msra.gmra.mxu0 %v5776_v16  ;;  %v3959_v47 = vpop.f32.mrf.mxu1  ;;  %v1070_v14 = vld [vmem:[#allocation8 + $0xbf0] sm:$0xff] }
 0x256   : > { %v3919_v59 = vadd.f32 %v3918_v54, %v5829_v61  ;;  %4204 = vmatmul.mubr.bf16.vlgmr.msra.gmra.mxu1 %v5770_v12  ;;  %4213 = vmatpush1.bf16.msra.mxu0 %v5008_v43  ;;  %v5121_v61 = vcombine.high %v1114_v57, %v1118_v58  ;;  %v5105_v43 = vcombine.high %v1098_v34, %v1102_v35  ;;  %v954_v57 = vld [vmem:[#allocation8 + $0x850] sm:$0xff] }
 0x257   : > { %4244 = vmatprep.mubr.bf16.mxu0 %v5790_v52  ;;  %4254 = vmatpush1.bf16.msra.mxu1 %v5136_v51  ;;  %v3920_v0 = vpop.f32.mrf.mxu0  ;;  %v3961_v24 = vpop.f32.mrf.mxu1  ;;  %v1090_v51 = vld [vmem:[#allocation8 + $0xc90] sm:$0xff]  ;;  %v4969_v54 = vcombine.high %v962_v44, %v966_v45 }
 0x258   : > { %v3960_v4 = vadd.f32 %v3959_v47, %v3919_v59  ;;  %4285 = vmatprep.mubr.bf16.mxu1 %v5792_v55  ;;  %v3921_v5 = vadd.f32 %v3920_v0, %v5832_v19  ;;  %4214 = vmatprep.subr.bf16.mxu0 %v5001_v41  ;;  %v4992_v19 = vcombine.low %v986_v42, %v990_v53  ;;  %v1094_v41 = vld [vmem:[#allocation8 + $0xcb0] sm:$0xff] }
 0x259   : > { %v3922_v10 = vpop.f32.mrf.mxu0  ;;  %4255 = vmatprep.subr.bf16.mxu1 %v5129_v56  ;;  %v3963_v22 = vpop.f32.mrf.mxu1  ;;  %v4976_v42 = vcombine.low %v970_v29, %v974_v33  ;;  %v5104_v53 = vcombine.low %v1098_v34, %v1102_v35  ;;  %v5097_v56 = vcombine.high %v1090_v51, %v1094_v41  ;;  %v958_v58 = vld [vmem:[#allocation8 + $0x870] sm:$0xff]  ;;  %v5096_v0 = vcombine.low %v1090_v51, %v1094_v41 }
 0x25a   : > { %v4458_v18 = vmax.f32 %v3960_v4, 0.0  ;;  %v3962_v20 = vadd.f32 %v3961_v24, %v3921_v5  ;;  %4215 = vmatpush1.bf16.msra.mxu0 %v5000_v63  ;;  %v1082_v59 = vld [vmem:[#allocation8 + $0xc50] sm:$0xff]  ;;  %v4968_v63 = vcombine.low %v962_v44, %v966_v45  ;;  %v4960_v6 = vcombine.low %v954_v57, %v958_v58 }
 0x25b   : > { %4256 = vmatpush1.bf16.msra.mxu1 %v5128_v1  ;;  %v3923_v23 = vpop.f32.mrf.mxu0  ;;  %4216 = vmatprep.subr.bf16.mxu0 %v4993_v2  ;;  %v3964_v28 = vpop.f32.mrf.mxu1  ;;  %v1086_v47 = vld [vmem:[#allocation8 + $0xc70] sm:$0xff]  ;;  %v4961_v1 = vcombine.high %v954_v57, %v958_v58 }
 0x25c   : > { %v4459_v27 = vmax.f32 %v3962_v20, 0.0  ;;  %4257 = vmatprep.subr.bf16.mxu1 %v5121_v61  ;;  %v4508_v36 = vmul.f32 %v4471_v8, %v4458_v18  ;;  %v5089_v2 = vcombine.high %v1082_v59, %v1086_v47  ;;  %v946_v4 = vld [vmem:[#allocation8 + $0x810] sm:$0xff]  ;;  %v5088_v7 = vcombine.low %v1082_v59, %v1086_v47 }
 0x25d   : > { %v950_v5 = vld [vmem:[#allocation8 + $0x830] sm:$0xff] }
 0x25e   : > { %v4509_v37 = vmul.f32 %v4475_v21, %v4459_v27  ;;  %4217 = vmatpush1.bf16.msra.mxu0 %v4992_v19  ;;  %v1074_v24 = vld [vmem:[#allocation8 + $0xc10] sm:$0xff]  ;;  %v4953_v8 = vcombine.high %v946_v4, %v950_v5  ;;  %v4952_v21 = vcombine.low %v946_v4, %v950_v5  ;;  %v5073_v19 = vcombine.high %v1066_v11, %v1070_v14 }
 0x25f   : > { %4258 = vmatpush1.bf16.msra.mxu1 %v5120_v25  ;;  %4218 = vmatprep.subr.bf16.mxu0 %v4985_v26  ;;  %v1078_v61 = vld [vmem:[#allocation8 + $0xc30] sm:$0xff] }
 0x260   : > { %v5846_v40 = vadd.f32 %v4509_v37, %v4508_v36  ;;  %4259 = vmatprep.subr.bf16.mxu1 %v5113_v46  ;;  %v5081_v10 = vcombine.high %v1074_v24, %v1078_v61  ;;  %v1194_v18 = vld [vmem:[#allocation8 + $0xfd0] sm:$0xff]  ;;  %v5080_v22 = vcombine.low %v1074_v24, %v1078_v61  ;;  %v5072_v46 = vcombine.low %v1066_v11, %v1070_v14 }
 0x261   : > { %v1198_v20 = vld [vmem:[#allocation8 + $0xff0] sm:$0xff] }
 0x262   : > { %4219 = vmatpush1.bf16.msra.mxu0 %v4984_v49  ;;  %v5201_v23 = vcombine.high %v1194_v18, %v1198_v20  ;;  %v1058_v25 = vld [vmem:[#allocation8 + $0xb90] sm:$0xff]  ;;  %v5200_v29 = vcombine.low %v1194_v18, %v1198_v20 }
 0x263   : > { %4260 = vmatpush1.bf16.msra.mxu1 %v5112_v38  ;;  %4220 = vmatprep.subr.bf16.mxu0 %v4977_v39  ;;  %v1062_v26 = vld [vmem:[#allocation8 + $0xbb0] sm:$0xff] }
 0x264   : > { %4261 = vmatprep.subr.bf16.mxu1 %v5105_v43  ;;  %v1186_v27 = vld [vmem:[#allocation8 + $0xf90] sm:$0xff]  ;;  %v5065_v33 = vcombine.high %v1058_v25, %v1062_v26  ;;  %v5064_v38 = vcombine.low %v1058_v25, %v1062_v26 }
 0x265   : > { %v1190_v28 = vld [vmem:[#allocation8 + $0xfb0] sm:$0xff] }
 0x266   : > { %4221 = vmatpush1.bf16.msra.mxu0 %v4976_v42  ;;  %v5193_v34 = vcombine.high %v1186_v27, %v1190_v28  ;;  %v1050_v35 = vld [vmem:[#allocation8 + $0xb50] sm:$0xff]  ;;  %v5192_v39 = vcombine.low %v1186_v27, %v1190_v28 }
 0x267   : > { %4262 = vmatpush1.bf16.msra.mxu1 %v5104_v53  ;;  %4222 = vmatprep.subr.bf16.mxu0 %v4969_v54  ;;  %v1054_v36 = vld [vmem:[#allocation8 + $0xb70] sm:$0xff] }
 0x268   : > { %4263 = vmatprep.subr.bf16.mxu1 %v5097_v56  ;;  %v1178_v37 = vld [vmem:[#allocation8 + $0xf50] sm:$0xff]  ;;  %v5057_v43 = vcombine.high %v1050_v35, %v1054_v36  ;;  %v5056_v53 = vcombine.low %v1050_v35, %v1054_v36  ;;  %v747_v36 = vld [vmem:[#allocation8 + $0x1d8] sm:$0xff] }
 0x269   : > { %v1182_v49 = vld [vmem:[#allocation8 + $0xf70] sm:$0xff] }
 0x26a   : > { %4223 = vmatpush1.bf16.msra.mxu0 %v4968_v63  ;;  %v5185_v44 = vcombine.high %v1178_v37, %v1182_v49  ;;  %v1042_v45 = vld [vmem:[#allocation8 + $0xb10] sm:$0xff]  ;;  %v5184_v54 = vcombine.low %v1178_v37, %v1182_v49  ;;  %v751_v37 = vld [vmem:[#allocation8 + $0x1f8] sm:$0xff] }
 0x26b   : > { %4264 = vmatpush1.bf16.msra.mxu1 %v5096_v0  ;;  %4224 = vmatprep.subr.bf16.mxu0 %v4961_v1  ;;  %v1046_v51 = vld [vmem:[#allocation8 + $0xb30] sm:$0xff]  ;;  %v875_v49 = vld [vmem:[#allocation8 + $0x5d8] sm:$0xff] }
 0x26c   : > { %4265 = vmatprep.subr.bf16.mxu1 %v5089_v2  ;;  %v1170_v41 = vld [vmem:[#allocation8 + $0xf10] sm:$0xff]  ;;  %v5049_v56 = vcombine.high %v1042_v45, %v1046_v51  ;;  %v5048_v0 = vcombine.low %v1042_v45, %v1046_v51  ;;  %v739_v51 = vld [vmem:[#allocation8 + $0x198] sm:$0xff] }
 0x26d   : > { %v1174_v42 = vld [vmem:[#allocation8 + $0xf30] sm:$0xff] }
 0x26e   : > { %4225 = vmatpush1.bf16.msra.mxu0 %v4960_v6  ;;  %v5177_v57 = vcombine.high %v1170_v41, %v1174_v42  ;;  %v1034_v58 = vld [vmem:[#allocation8 + $0xad0] sm:$0xff]  ;;  %v5176_v1 = vcombine.low %v1170_v41, %v1174_v42  ;;  %v743_v41 = vld [vmem:[#allocation8 + $0x1b8] sm:$0xff]  ;;  %v1213_v42 = vrot.slane %v5820_v31, %v5748_v48 }
 0x26f   : > { %4266 = vmatpush1.bf16.msra.mxu1 %v5088_v7  ;;  %4226 = vmatprep.subr.bf16.mxu0 %v4953_v8  ;;  %v1038_v59 = vld [vmem:[#allocation8 + $0xaf0] sm:$0xff] }
 0x270   : > { %4267 = vmatprep.subr.bf16.mxu1 %v5081_v10  ;;  %v1162_v47 = vld [vmem:[#allocation8 + $0xed0] sm:$0xff]  ;;  %v5041_v2 = vcombine.high %v1034_v58, %v1038_v59  ;;  %v5040_v7 = vcombine.low %v1034_v58, %v1038_v59  ;;  %v1217_v58 = vrot.slane %v5820_v31, %v5754_v50  ;;  %v4747_v59 = vcombine.high %v739_v51, %v743_v41 }
 0x271   : > { %v1166_v63 = vld [vmem:[#allocation8 + $0xef0] sm:$0xff] }
 0x272   : > { %4227 = vmatpush1.bf16.msra.mxu0 %v4952_v21  ;;  %v5169_v4 = vcombine.high %v1162_v47, %v1166_v63  ;;  %v1026_v5 = vld [vmem:[#allocation8 + $0xa90] sm:$0xff]  ;;  %v5168_v8 = vcombine.low %v1162_v47, %v1166_v63  ;;  %v731_v47 = vld [vmem:[#allocation8 + $0x158] sm:$0xff] }
 0x273   : > { %4268 = vmatpush1.bf16.msra.mxu1 %v5080_v22  ;;  %4228 = vmatprep.subr.bf16.mxu0 %v5073_v19  ;;  %v1030_v24 = vld [vmem:[#allocation8 + $0xab0] sm:$0xff]  ;;  %v735_v63 = vld [vmem:[#allocation8 + $0x178] sm:$0xff] }
 0x274   : > { %4269 = vmatprep.subr.bf16.mxu1 %v5201_v23  ;;  %v1154_v61 = vld [vmem:[#allocation8 + $0xe90] sm:$0xff]  ;;  %v5033_v10 = vcombine.high %v1026_v5, %v1030_v24  ;;  %v5032_v22 = vcombine.low %v1026_v5, %v1030_v24 }
 0x275   : > { %v1158_v6 = vld [vmem:[#allocation8 + $0xeb0] sm:$0xff] }
 0x276   : > { %4229 = vmatpush2.bf16.msra.mxu0 %v5072_v46  ;;  %v5161_v11 = vcombine.high %v1154_v61, %v1158_v6  ;;  %v1018_v14 = vld [vmem:[#allocation8 + $0xa50] sm:$0xff]  ;;  %v5160_v19 = vcombine.low %v1154_v61, %v1158_v6  ;;  %v4746_v61 = vcombine.low %v739_v51, %v743_v41 }
 0x277   : > { %4270 = vmatpush2.bf16.msra.mxu1 %v5200_v29  ;;  %4230 = vmatprep.subr.bf16.mxu0 %v5065_v33  ;;  %v1022_v18 = vld [vmem:[#allocation8 + $0xa70] sm:$0xff] }
 0x278   : > { %4271 = vmatprep.subr.bf16.mxu1 %v5193_v34  ;;  %v1146_v20 = vld [vmem:[#allocation8 + $0xe50] sm:$0xff]  ;;  %v5025_v23 = vcombine.high %v1018_v14, %v1022_v18  ;;  %v5024_v29 = vcombine.low %v1018_v14, %v1022_v18  ;;  %v723_v18 = vld [vmem:[#allocation8 + $0x118] sm:$0xff] }
 0x279   : > { %v1150_v21 = vld [vmem:[#allocation8 + $0xe70] sm:$0xff] }
 0x27a   : > { %4231 = vmatpush2.bf16.msra.mxu0 %v5064_v38  ;;  %v5153_v25 = vcombine.high %v1146_v20, %v1150_v21  ;;  %v1010_v26 = vld [vmem:[#allocation8 + $0xa10] sm:$0xff]  ;;  %v5152_v33 = vcombine.low %v1146_v20, %v1150_v21  ;;  %v879_v38 = vld [vmem:[#allocation8 + $0x5f8] sm:$0xff] }
 0x27b   : > { %4272 = vmatpush2.bf16.msra.mxu1 %v5192_v39  ;;  %4232 = vmatprep.subr.bf16.mxu0 %v5057_v43  ;;  %v1014_v27 = vld [vmem:[#allocation8 + $0xa30] sm:$0xff]  ;;  %v4883_v45 = vcombine.high %v875_v49, %v879_v38  ;;  %v727_v20 = vld [vmem:[#allocation8 + $0x138] sm:$0xff] }
 0x27c   : > { %4273 = vmatprep.subr.bf16.mxu1 %v5185_v44  ;;  %v1138_v28 = vld [vmem:[#allocation8 + $0xe10] sm:$0xff]  ;;  %v5017_v34 = vcombine.high %v1010_v26, %v1014_v27  ;;  %v5016_v39 = vcombine.low %v1010_v26, %v1014_v27  ;;  %v4755_v44 = vcombine.high %v747_v36, %v751_v37 }
 0x27d   : > { %v1142_v46 = vld [vmem:[#allocation8 + $0xe30] sm:$0xff] }
 0x27e   : > { %4233 = vmatpush2.bf16.msra.mxu0 %v5056_v53  ;;  %v5145_v35 = vcombine.high %v1138_v28, %v1142_v46  ;;  %v5144_v43 = vcombine.low %v1138_v28, %v1142_v46  ;;  %v4754_v53 = vcombine.low %v747_v36, %v751_v37  ;;  %v4730_v36 = vcombine.low %v723_v18, %v727_v20 }
 0x27f   : > { %4274 = vmatpush2.bf16.msra.mxu1 %v5184_v54  ;;  %4234 = vmatprep.subr.bf16.mxu0 %v5049_v56  ;;  %v867_v54 = vld [vmem:[#allocation8 + $0x598] sm:$0xff] }
 0x280   : > { %4275 = vmatprep.subr.bf16.mxu1 %v5177_v57  ;;  %v871_v56 = vld [vmem:[#allocation8 + $0x5b8] sm:$0xff]  ;;  %v4882_v57 = vcombine.low %v875_v49, %v879_v38 }
 0x281   : > { %v4874_v31 = vcombine.low %v867_v54, %v871_v56 }
 0x282   : > { %4235 = vmatpush2.bf16.msra.mxu0 %v5048_v0 }
 0x283   : > { %4276 = vmatpush2.bf16.msra.mxu1 %v5176_v1  ;;  %4236 = vmatprep.subr.bf16.mxu0 %v5041_v2  ;;  %v4875_v1 = vcombine.high %v867_v54, %v871_v56  ;;  %v859_v2 = vld [vmem:[#allocation8 + $0x558] sm:$0xff] }
 0x284   : > { %4277 = vmatprep.subr.bf16.mxu1 %v5169_v4  ;;  %v863_v4 = vld [vmem:[#allocation8 + $0x578] sm:$0xff] }
 0x285   : > { %v4867_v14 = vcombine.high %v859_v2, %v863_v4  ;;  %v4866_v27 = vcombine.low %v859_v2, %v863_v4  ;;  %v699_v54 = vld [vmem:[#allocation8 + $0x58] sm:$0xff] }
 0x286   : > { %4237 = vmatpush2.bf16.msra.mxu0 %v5040_v7  ;;  %v4739_v7 = vcombine.high %v731_v47, %v735_v63  ;;  %v703_v56 = vld [vmem:[#allocation8 + $0x78] sm:$0xff] }
 0x287   : > { %4278 = vmatpush2.bf16.msra.mxu1 %v5168_v8  ;;  %4238 = vmatprep.subr.bf16.mxu0 %v5033_v10  ;;  %v695_v2 = vld [vmem:[#allocation8 + $0x38] sm:$0xff] }
 0x288   : > { %4279 = vmatprep.subr.bf16.mxu1 %v5161_v11  ;;  %v819_v4 = vld [vmem:[#allocation8 + $0x418] sm:$0xff] }
 0x28a   : > { %4239 = vmatpush2.bf16.msra.mxu0 %v5032_v22  ;;  %v851_v22 = vld [vmem:[#allocation8 + $0x518] sm:$0xff] }
 0x28b   : > { %4280 = vmatpush2.bf16.msra.mxu1 %v5160_v19  ;;  %4240 = vmatprep.subr.bf16.mxu0 %v5025_v23  ;;  %v855_v19 = vld [vmem:[#allocation8 + $0x538] sm:$0xff] }
 0x28c   : > { %4281 = vmatprep.subr.bf16.mxu1 %v5153_v25  ;;  %v4738_v25 = vcombine.low %v731_v47, %v735_v63  ;;  %v4859_v46 = vcombine.high %v851_v22, %v855_v19  ;;  %v4858_v37 = vcombine.low %v851_v22, %v855_v19  ;;  %v4707_v63 = vcombine.high %v699_v54, %v703_v56  ;;  %v803_v19 = vld [vmem:[#allocation8 + $0x398] sm:$0xff] }
 0x28e   : > { %4241 = vmatpush2.bf16.msra.mxu0 %v5024_v29  ;;  %v715_v29 = vld [vmem:[#allocation8 + $0xd8] sm:$0xff] }
 0x28f   : > { %4282 = vmatpush2.bf16.msra.mxu1 %v5152_v33  ;;  %4242 = vmatprep.subr.bf16.mxu0 %v5017_v34  ;;  %v719_v33 = vld [vmem:[#allocation8 + $0xf8] sm:$0xff] }
 0x290   : > { %4283 = vmatprep.subr.bf16.mxu1 %v5145_v35  ;;  %v843_v34 = vld [vmem:[#allocation8 + $0x4d8] sm:$0xff]  ;;  %v4723_v49 = vcombine.high %v715_v29, %v719_v33  ;;  %v4722_v51 = vcombine.low %v715_v29, %v719_v33 }
 0x291   : > { %v847_v35 = vld [vmem:[#allocation8 + $0x4f8] sm:$0xff] }
 0x292   : > { %4243 = vmatpush2.bf16.msra.mxu0 %v5016_v39  ;;  %v4851_v38 = vcombine.high %v843_v34, %v847_v35  ;;  %v707_v39 = vld [vmem:[#allocation8 + $0x98] sm:$0xff]  ;;  %v4850_v41 = vcombine.low %v843_v34, %v847_v35 }
 0x293   : > { %4284 = vmatpush2.bf16.msra.mxu1 %v5144_v43  ;;  %4294 = vmatprep.subr.bf16.mxu0 %v4755_v44  ;;  %v711_v43 = vld [vmem:[#allocation8 + $0xb8] sm:$0xff] }
 0x294   : > { %4335 = vmatprep.subr.bf16.mxu1 %v4883_v45  ;;  %v835_v44 = vld [vmem:[#allocation8 + $0x498] sm:$0xff] }
 0x295   : > { %v4000_v0 = vpop.f32.mrf.mxu0  ;;  %4245 = vmatmul.mubr.bf16.vlgmr.msra.gmra.mxu0 %v5810_v15  ;;  %v839_v45 = vld [vmem:[#allocation8 + $0x4b8] sm:$0xff] }
 0x296   : > { %v4001_v5 = vadd.f32 %v4000_v0, %v1213_v42  ;;  %v4041_v24 = vpop.f32.mrf.mxu1  ;;  %4286 = vmatmul.mubr.bf16.vlgmr.msra.gmra.mxu1 %v5808_v9  ;;  %4295 = vmatpush1.bf16.msra.mxu0 %v4754_v53  ;;  %v4715_v42 = vcombine.high %v707_v39, %v711_v43  ;;  %v4843_v53 = vcombine.high %v835_v44, %v839_v45  ;;  %v795_v29 = vld [vmem:[#allocation8 + $0x358] sm:$0xff] }
 0x297   : > { %4326 = vmatprep.mubr.bf16.mxu0 %v5772_v13  ;;  %4336 = vmatpush1.bf16.msra.mxu1 %v4882_v57  ;;  %v4002_v6 = vpop.f32.mrf.mxu0  ;;  %v827_v57 = vld [vmem:[#allocation8 + $0x458] sm:$0xff]  ;;  %v4842_v47 = vcombine.low %v835_v44, %v839_v45 }
 0x298   : > { %v5855_v8 = vadd.f32 %v4041_v24, %v4001_v5  ;;  %4367 = vmatprep.mubr.bf16.mxu1 %v5778_v17  ;;  %v4003_v10 = vadd.f32 %v4002_v6, %v1217_v58  ;;  %v4043_v11 = vpop.f32.mrf.mxu1  ;;  %4296 = vmatprep.subr.bf16.mxu0 %v4747_v59  ;;  %v4731_v17 = vcombine.high %v723_v18, %v727_v20  ;;  %v831_v58 = vld [vmem:[#allocation8 + $0x478] sm:$0xff] }
 0x299   : > { %v4004_v21 = vpop.f32.mrf.mxu0  ;;  %4337 = vmatprep.subr.bf16.mxu1 %v4875_v1  ;;  %v4714_v59 = vcombine.low %v707_v39, %v711_v43  ;;  %v4835_v0 = vcombine.high %v827_v57, %v831_v58  ;;  %v691_v1 = vld [vmem:[#allocation8 + $0x18] sm:$0xff]  ;;  %v4706_v24 = vcombine.low %v699_v54, %v703_v56 }
 0x29a   : > { %v5858_v23 = vadd.f32 %v4043_v11, %v4003_v10  ;;  %v4045_v13 = vpop.f32.mrf.mxu1  ;;  %4297 = vmatpush1.bf16.msra.mxu0 %v4746_v61  ;;  %v823_v5 = vld [vmem:[#allocation8 + $0x438] sm:$0xff]  ;;  %v4834_v61 = vcombine.low %v827_v57, %v831_v58  ;;  %v4699_v6 = vcombine.high %v691_v1, %v695_v2  ;;  %v4698_v18 = vcombine.low %v691_v1, %v695_v2 }
 0x29b   : > { %4338 = vmatpush1.bf16.msra.mxu1 %v4874_v31  ;;  %v4005_v26 = vpop.f32.mrf.mxu0  ;;  %4298 = vmatprep.subr.bf16.mxu0 %v4739_v7  ;;  %v4827_v31 = vcombine.high %v819_v4, %v823_v5  ;;  %v811_v7 = vld [vmem:[#allocation8 + $0x3d8] sm:$0xff]  ;;  %v4826_v20 = vcombine.low %v819_v4, %v823_v5 }
 0x29c   : > { %v4046_v28 = vpop.f32.mrf.mxu1  ;;  %4339 = vmatprep.subr.bf16.mxu1 %v4867_v14  ;;  %v815_v10 = vld [vmem:[#allocation8 + $0x3f8] sm:$0xff] }
 0x29d   : > { %v939_v11 = vld [vmem:[#allocation8 + $0x7d8] sm:$0xff]  ;;  %v4819_v21 = vcombine.high %v811_v7, %v815_v10 }
 0x29e   : > { %4299 = vmatpush1.bf16.msra.mxu0 %v4738_v25  ;;  %v943_v14 = vld [vmem:[#allocation8 + $0x7f8] sm:$0xff] }
 0x29f   : > { %4340 = vmatpush1.bf16.msra.mxu1 %v4866_v27  ;;  %4300 = vmatprep.subr.bf16.mxu0 %v4731_v17  ;;  %v4947_v22 = vcombine.high %v939_v11, %v943_v14  ;;  %v807_v13 = vld [vmem:[#allocation8 + $0x3b8] sm:$0xff]  ;;  %v4818_v27 = vcombine.low %v811_v7, %v815_v10  ;;  %v4946_v17 = vcombine.low %v939_v11, %v943_v14 }
 0x2a0   : > { %4341 = vmatprep.subr.bf16.mxu1 %v4859_v46  ;;  %v931_v25 = vld [vmem:[#allocation8 + $0x798] sm:$0xff]  ;;  %v4811_v28 = vcombine.high %v803_v19, %v807_v13 }
 0x2a1   : > { %v935_v26 = vld [vmem:[#allocation8 + $0x7b8] sm:$0xff] }
 0x2a2   : > { %4301 = vmatpush1.bf16.msra.mxu0 %v4730_v36  ;;  %v4939_v46 = vcombine.high %v931_v25, %v935_v26  ;;  %v799_v33 = vld [vmem:[#allocation8 + $0x378] sm:$0xff]  ;;  %v4810_v36 = vcombine.low %v803_v19, %v807_v13 }
 0x2a3   : > { %4342 = vmatpush1.bf16.msra.mxu1 %v4858_v37  ;;  %4302 = vmatprep.subr.bf16.mxu0 %v4723_v49  ;;  %v923_v34 = vld [vmem:[#allocation8 + $0x758] sm:$0xff]  ;;  %v4938_v37 = vcombine.low %v931_v25, %v935_v26  ;;  %v4803_v49 = vcombine.high %v795_v29, %v799_v33 }
 0x2a4   : > { %4343 = vmatprep.subr.bf16.mxu1 %v4851_v38  ;;  %v927_v35 = vld [vmem:[#allocation8 + $0x778] sm:$0xff] }
 0x2a5   : > { %v4931_v38 = vcombine.high %v923_v34, %v927_v35  ;;  %v787_v39 = vld [vmem:[#allocation8 + $0x318] sm:$0xff] }
 0x2a6   : > { %4303 = vmatpush1.bf16.msra.mxu0 %v4722_v51  ;;  %v791_v43 = vld [vmem:[#allocation8 + $0x338] sm:$0xff]  ;;  %v4802_v51 = vcombine.low %v795_v29, %v799_v33 }
 0x2a7   : > { %4344 = vmatpush1.bf16.msra.mxu1 %v4850_v41  ;;  %4304 = vmatprep.subr.bf16.mxu0 %v4715_v42  ;;  %v915_v44 = vld [vmem:[#allocation8 + $0x718] sm:$0xff]  ;;  %v4930_v41 = vcombine.low %v923_v34, %v927_v35  ;;  %v4795_v42 = vcombine.high %v787_v39, %v791_v43 }
 0x2a8   : > { %4345 = vmatprep.subr.bf16.mxu1 %v4843_v53  ;;  %v919_v45 = vld [vmem:[#allocation8 + $0x738] sm:$0xff] }
 0x2a9   : > { %v4923_v53 = vcombine.high %v915_v44, %v919_v45  ;;  %v779_v54 = vld [vmem:[#allocation8 + $0x2d8] sm:$0xff] }
 0x2aa   : > { %4305 = vmatpush1.bf16.msra.mxu0 %v4714_v59  ;;  %v783_v56 = vld [vmem:[#allocation8 + $0x2f8] sm:$0xff]  ;;  %v4794_v59 = vcombine.low %v787_v39, %v791_v43 }
 0x2ab   : > { %4346 = vmatpush1.bf16.msra.mxu1 %v4842_v47  ;;  %4306 = vmatprep.subr.bf16.mxu0 %v4707_v63  ;;  %v907_v57 = vld [vmem:[#allocation8 + $0x6d8] sm:$0xff]  ;;  %v4922_v47 = vcombine.low %v915_v44, %v919_v45  ;;  %v4787_v63 = vcombine.high %v779_v54, %v783_v56 }
 0x2ac   : > { %4347 = vmatprep.subr.bf16.mxu1 %v4835_v0  ;;  %v911_v58 = vld [vmem:[#allocation8 + $0x6f8] sm:$0xff] }
 0x2ad   : > { %v4915_v0 = vcombine.high %v907_v57, %v911_v58  ;;  %v771_v1 = vld [vmem:[#allocation8 + $0x298] sm:$0xff] }
 0x2ae   : > { %4307 = vmatpush1.bf16.msra.mxu0 %v4706_v24  ;;  %v775_v2 = vld [vmem:[#allocation8 + $0x2b8] sm:$0xff]  ;;  %v4786_v24 = vcombine.low %v779_v54, %v783_v56 }
 0x2af   : > { %4348 = vmatpush1.bf16.msra.mxu1 %v4834_v61  ;;  %4308 = vmatprep.subr.bf16.mxu0 %v4699_v6  ;;  %v899_v4 = vld [vmem:[#allocation8 + $0x698] sm:$0xff]  ;;  %v4914_v61 = vcombine.low %v907_v57, %v911_v58  ;;  %v4779_v6 = vcombine.high %v771_v1, %v775_v2 }
 0x2b0   : > { %4349 = vmatprep.subr.bf16.mxu1 %v4827_v31  ;;  %v903_v5 = vld [vmem:[#allocation8 + $0x6b8] sm:$0xff] }
 0x2b1   : > { %v4907_v31 = vcombine.high %v899_v4, %v903_v5  ;;  %v763_v7 = vld [vmem:[#allocation8 + $0x258] sm:$0xff] }
 0x2b2   : > { %4309 = vmatpush1.bf16.msra.mxu0 %v4698_v18  ;;  %v767_v10 = vld [vmem:[#allocation8 + $0x278] sm:$0xff]  ;;  %v4778_v18 = vcombine.low %v771_v1, %v775_v2  ;;  %v4479_v1 = vrot.slane %v5836_v60, %v5748_v48 }
 0x2b3   : > { %4350 = vmatpush1.bf16.msra.mxu1 %v4826_v20  ;;  %4310 = vmatprep.subr.bf16.mxu0 %v4819_v21  ;;  %v891_v11 = vld [vmem:[#allocation8 + $0x658] sm:$0xff]  ;;  %v4906_v20 = vcombine.low %v899_v4, %v903_v5  ;;  %v4771_v21 = vcombine.high %v763_v7, %v767_v10 }
 0x2b4   : > { %4351 = vmatprep.subr.bf16.mxu1 %v4947_v22  ;;  %v895_v14 = vld [vmem:[#allocation8 + $0x678] sm:$0xff] }
 0x2b5   : > { %v4899_v22 = vcombine.high %v891_v11, %v895_v14  ;;  %v755_v19 = vld [vmem:[#allocation8 + $0x218] sm:$0xff] }
 0x2b6   : > { %4311 = vmatpush2.bf16.msra.mxu0 %v4818_v27  ;;  %v759_v13 = vld [vmem:[#allocation8 + $0x238] sm:$0xff]  ;;  %v4770_v27 = vcombine.low %v763_v7, %v767_v10 }
 0x2b7   : > { %4352 = vmatpush2.bf16.msra.mxu1 %v4946_v17  ;;  %4312 = vmatprep.subr.bf16.mxu0 %v4811_v28  ;;  %v883_v25 = vld [vmem:[#allocation8 + $0x618] sm:$0xff]  ;;  %v4898_v17 = vcombine.low %v891_v11, %v895_v14  ;;  %v4763_v28 = vcombine.high %v755_v19, %v759_v13  ;;  %v4483_v11 = vrot.slane %v5836_v60, %v5754_v50 }
 0x2b8   : > { %4353 = vmatprep.subr.bf16.mxu1 %v4939_v46  ;;  %v887_v26 = vld [vmem:[#allocation8 + $0x638] sm:$0xff] }
 0x2b9   : > { %v4891_v46 = vcombine.high %v883_v25, %v887_v26  ;;  %v1003_v29 = vld [vmem:[#allocation8 + $0x9d8] sm:$0xff] }
 0x2ba   : > { %4313 = vmatpush2.bf16.msra.mxu0 %v4810_v36  ;;  %v1007_v33 = vld [vmem:[#allocation8 + $0x9f8] sm:$0xff]  ;;  %v4762_v36 = vcombine.low %v755_v19, %v759_v13 }
 0x2bb   : > { %4354 = vmatpush2.bf16.msra.mxu1 %v4938_v37  ;;  %4314 = vmatprep.subr.bf16.mxu0 %v4803_v49  ;;  %v1131_v34 = vld [vmem:[#allocation8 + $0xdd8] sm:$0xff]  ;;  %v4890_v37 = vcombine.low %v883_v25, %v887_v26  ;;  %v5011_v49 = vcombine.high %v1003_v29, %v1007_v33  ;;  %v5010_v44 = vcombine.low %v1003_v29, %v1007_v33 }
 0x2bc   : > { %4355 = vmatprep.subr.bf16.mxu1 %v4931_v38  ;;  %v1135_v35 = vld [vmem:[#allocation8 + $0xdf8] sm:$0xff] }
 0x2bd   : > { %v5139_v38 = vcombine.high %v1131_v34, %v1135_v35  ;;  %v995_v39 = vld [vmem:[#allocation8 + $0x998] sm:$0xff] }
 0x2be   : > { %4315 = vmatpush2.bf16.msra.mxu0 %v4802_v51  ;;  %v999_v43 = vld [vmem:[#allocation8 + $0x9b8] sm:$0xff] }
 0x2bf   : > { %4356 = vmatpush2.bf16.msra.mxu1 %v4930_v41  ;;  %4316 = vmatprep.subr.bf16.mxu0 %v4795_v42  ;;  %v1123_v45 = vld [vmem:[#allocation8 + $0xd98] sm:$0xff]  ;;  %v5138_v41 = vcombine.low %v1131_v34, %v1135_v35  ;;  %v5003_v42 = vcombine.high %v995_v39, %v999_v43 }
 0x2c0   : > { %4357 = vmatprep.subr.bf16.mxu1 %v4923_v53  ;;  %v1127_v51 = vld [vmem:[#allocation8 + $0xdb8] sm:$0xff] }
 0x2c1   : > { %v987_v53 = vld [vmem:[#allocation8 + $0x958] sm:$0xff]  ;;  %v5131_v57 = vcombine.high %v1123_v45, %v1127_v51  ;;  %v5130_v4 = vcombine.low %v1123_v45, %v1127_v51 }
 0x2c2   : > { %4317 = vmatpush2.bf16.msra.mxu0 %v4794_v59  ;;  %v991_v54 = vld [vmem:[#allocation8 + $0x978] sm:$0xff] }
 0x2c3   : > { %4358 = vmatpush2.bf16.msra.mxu1 %v4922_v47  ;;  %4318 = vmatprep.subr.bf16.mxu0 %v4787_v63  ;;  %v1115_v58 = vld [vmem:[#allocation8 + $0xd58] sm:$0xff]  ;;  %v4995_v5 = vcombine.high %v987_v53, %v991_v54 }
 0x2c4   : > { %4359 = vmatprep.subr.bf16.mxu1 %v4915_v0  ;;  %v1119_v59 = vld [vmem:[#allocation8 + $0xd78] sm:$0xff]  ;;  %v5002_v0 = vcombine.low %v995_v39, %v999_v43 }
 0x2c5   : > { %v1107_v7 = vld [vmem:[#allocation8 + $0xd18] sm:$0xff] }
 0x2c6   : > { %4319 = vmatpush2.bf16.msra.mxu0 %v4786_v24  ;;  %v1111_v48 = vld [vmem:[#allocation8 + $0xd38] sm:$0xff] }
 0x2c7   : > { %4360 = vmatpush2.bf16.msra.mxu1 %v4914_v61  ;;  %4320 = vmatprep.subr.bf16.mxu0 %v4779_v6  ;;  %v5123_v61 = vcombine.high %v1115_v58, %v1119_v59  ;;  %v983_v6 = vld [vmem:[#allocation8 + $0x938] sm:$0xff]  ;;  %v5115_v13 = vcombine.high %v1107_v7, %v1111_v48 }
 0x2c8   : > { %4361 = vmatprep.subr.bf16.mxu1 %v4907_v31  ;;  %v971_v25 = vld [vmem:[#allocation8 + $0x8d8] sm:$0xff] }
 0x2c9   : > { %v975_v26 = vld [vmem:[#allocation8 + $0x8f8] sm:$0xff] }
 0x2ca   : > { %4321 = vmatpush2.bf16.msra.mxu0 %v4778_v18  ;;  %v4994_v18 = vcombine.low %v987_v53, %v991_v54  ;;  %v4979_v29 = vcombine.high %v971_v25, %v975_v26  ;;  %v963_v35 = vld [vmem:[#allocation8 + $0x898] sm:$0xff] }
 0x2cb   : > { %4362 = vmatpush2.bf16.msra.mxu1 %v4906_v20  ;;  %4322 = vmatprep.subr.bf16.mxu0 %v4771_v21  ;;  %v959_v45 = vld [vmem:[#allocation8 + $0x878] sm:$0xff] }
 0x2cc   : > { %4363 = vmatprep.subr.bf16.mxu1 %v4899_v22  ;;  %v1083_v51 = vld [vmem:[#allocation8 + $0xc58] sm:$0xff] }
 0x2ce   : > { %4323 = vmatpush2.bf16.msra.mxu0 %v4770_v27  ;;  %v1099_v27 = vld [vmem:[#allocation8 + $0xcd8] sm:$0xff] }
 0x2cf   : > { %4364 = vmatpush2.bf16.msra.mxu1 %v4898_v17  ;;  %4324 = vmatprep.subr.bf16.mxu0 %v4763_v28  ;;  %v1103_v17 = vld [vmem:[#allocation8 + $0xcf8] sm:$0xff] }
 0x2d0   : > { %4365 = vmatprep.subr.bf16.mxu1 %v4891_v46  ;;  %v5114_v46 = vcombine.low %v1107_v7, %v1111_v48  ;;  %v5107_v34 = vcombine.high %v1099_v27, %v1103_v17  ;;  %v1063_v7 = vld [vmem:[#allocation8 + $0xbb8] sm:$0xff] }
 0x2d1   : > { %v1187_v48 = vld [vmem:[#allocation8 + $0xf98] sm:$0xff] }
 0x2d2   : > { %4325 = vmatpush2.bf16.msra.mxu0 %v4762_v36  ;;  %v967_v36 = vld [vmem:[#allocation8 + $0x8b8] sm:$0xff] }
 0x2d3   : > { %4366 = vmatpush2.bf16.msra.mxu1 %v4890_v37  ;;  %4376 = vmatprep.subr.bf16.mxu0 %v5011_v49  ;;  %v1091_v37 = vld [vmem:[#allocation8 + $0xc98] sm:$0xff]  ;;  %v4971_v39 = vcombine.high %v963_v35, %v967_v36 }
 0x2d4   : > { %4417 = vmatprep.subr.bf16.mxu1 %v5139_v38  ;;  %v1095_v49 = vld [vmem:[#allocation8 + $0xcb8] sm:$0xff]  ;;  %v4978_v38 = vcombine.low %v971_v25, %v975_v26 }
 0x2d5   : > { %v4082_v56 = vpop.f32.mrf.mxu0  ;;  %4327 = vmatmul.mubr.bf16.vlgmr.msra.gmra.mxu0 %v5776_v16  ;;  %v5099_v43 = vcombine.high %v1091_v37, %v1095_v49  ;;  %v5098_v53 = vcombine.low %v1091_v37, %v1095_v49  ;;  %v1043_v26 = vld [vmem:[#allocation8 + $0xb18] sm:$0xff] }
 0x2d6   : > { %v4083_v47 = vadd.f32 %v4082_v56, %v5855_v8  ;;  %v4123_v63 = vpop.f32.mrf.mxu1  ;;  %4368 = vmatmul.mubr.bf16.vlgmr.msra.gmra.mxu1 %v5770_v12  ;;  %4377 = vmatpush1.bf16.msra.mxu0 %v5010_v44  ;;  %v979_v12 = vld [vmem:[#allocation8 + $0x918] sm:$0xff] }
 0x2d7   : > { %4408 = vmatprep.mubr.bf16.mxu0 %v5790_v52  ;;  %4418 = vmatpush1.bf16.msra.mxu1 %v5138_v41  ;;  %v4084_v2 = vpop.f32.mrf.mxu0  ;;  %v4987_v20 = vcombine.high %v979_v12, %v983_v6  ;;  %v4986_v60 = vcombine.low %v979_v12, %v983_v6  ;;  %v955_v44 = vld [vmem:[#allocation8 + $0x858] sm:$0xff] }
 0x2d8   : > { %v4124_v16 = vadd.f32 %v4123_v63, %v4083_v47  ;;  %4449 = vmatprep.mubr.bf16.mxu1 %v5792_v55  ;;  %v4085_v24 = vadd.f32 %v4084_v2, %v5858_v23  ;;  %v4125_v8 = vpop.f32.mrf.mxu1  ;;  %4378 = vmatprep.subr.bf16.mxu0 %v5003_v42  ;;  %v5122_v23 = vcombine.low %v1115_v58, %v1119_v59  ;;  %v1087_v41 = vld [vmem:[#allocation8 + $0xc78] sm:$0xff] }
 0x2d9   : > { %v4086_v31 = vpop.f32.mrf.mxu0  ;;  %4419 = vmatprep.subr.bf16.mxu1 %v5131_v57  ;;  %v4970_v42 = vcombine.low %v963_v35, %v967_v36  ;;  %v4963_v54 = vcombine.high %v955_v44, %v959_v45  ;;  %v5091_v56 = vcombine.high %v1083_v51, %v1087_v41  ;;  %v947_v57 = vld [vmem:[#allocation8 + $0x818] sm:$0xff]  ;;  %v4962_v63 = vcombine.low %v955_v44, %v959_v45 }
 0x2da   : > { %v4460_v10 = vmax.f32 %v4124_v16, 0.0  ;;  %v4126_v52 = vadd.f32 %v4125_v8, %v4085_v24  ;;  %v4127_v14 = vpop.f32.mrf.mxu1  ;;  %4379 = vmatpush1.bf16.msra.mxu0 %v5002_v0  ;;  %v951_v58 = vld [vmem:[#allocation8 + $0x838] sm:$0xff]  ;;  %v5090_v0 = vcombine.low %v1083_v51, %v1087_v41 }
 0x2db   : > { %4420 = vmatpush1.bf16.msra.mxu1 %v5130_v4  ;;  %v4087_v55 = vpop.f32.mrf.mxu0  ;;  %4380 = vmatprep.subr.bf16.mxu0 %v4995_v5  ;;  %v1075_v59 = vld [vmem:[#allocation8 + $0xc18] sm:$0xff]  ;;  %v4954_v8 = vcombine.low %v947_v57, %v951_v58 }
 0x2dc   : > { %v4510_v21 = vmul.f32 %v4479_v1, %v4460_v10  ;;  %v4461_v22 = vmax.f32 %v4126_v52, 0.0  ;;  %v4128_v19 = vpop.f32.mrf.mxu1  ;;  %4421 = vmatprep.subr.bf16.mxu1 %v5123_v61  ;;  %v1079_v47 = vld [vmem:[#allocation8 + $0xc38] sm:$0xff]  ;;  %v4955_v1 = vcombine.high %v947_v57, %v951_v58 }
 0x2dd   : > { %v5083_v2 = vcombine.high %v1075_v59, %v1079_v47  ;;  %v1067_v4 = vld [vmem:[#allocation8 + $0xbd8] sm:$0xff]  ;;  %v5082_v61 = vcombine.low %v1075_v59, %v1079_v47 }
 0x2de   : > { %v4517_v28 = vadd.f32 %v5846_v40, %v4510_v21  ;;  %v4511_v50 = vmul.f32 %v4483_v11, %v4461_v22  ;;  %4381 = vmatpush1.bf16.msra.mxu0 %v4994_v18  ;;  %v5106_v40 = vcombine.low %v1099_v27, %v1103_v17  ;;  %v1071_v5 = vld [vmem:[#allocation8 + $0xbf8] sm:$0xff] }
 0x2df   : > { %4422 = vmatpush1.bf16.msra.mxu1 %v5122_v23  ;;  %4382 = vmatprep.subr.bf16.mxu0 %v4987_v20  ;;  %v1195_v16 = vld [vmem:[#allocation8 + $0xfd8] sm:$0xff]  ;;  %v5075_v12 = vcombine.high %v1067_v4, %v1071_v5  ;;  %v5074_v52 = vcombine.low %v1067_v4, %v1071_v5 }
 0x2e0   : > { %v5871_v33 = vadd.f32 %v4517_v28, %v4511_v50  ;;  %4423 = vmatprep.subr.bf16.mxu1 %v5115_v13  ;;  %v1199_v24 = vld [vmem:[#allocation8 + $0xff8] sm:$0xff] }
 0x2e1   : > { %v5203_v6 = vcombine.high %v1195_v16, %v1199_v24  ;;  %v1059_v31 = vld [vmem:[#allocation8 + $0xb98] sm:$0xff]  ;;  %v5202_v11 = vcombine.low %v1195_v16, %v1199_v24 }
 0x2e2   : > { %4383 = vmatpush1.bf16.msra.mxu0 %v4986_v60  ;;  %v1191_v10 = vld [vmem:[#allocation8 + $0xfb8] sm:$0xff]  ;;  %v5067_v14 = vcombine.high %v1059_v31, %v1063_v7  ;;  %v5066_v22 = vcombine.low %v1059_v31, %v1063_v7  ;;  %v5305_v7 = vld [vmem:[#allocation10] sm:$0xff] }
 0x2e3   : > { %4424 = vmatpush1.bf16.msra.mxu1 %v5114_v46  ;;  %4384 = vmatprep.subr.bf16.mxu0 %v4979_v29  ;;  %v5195_v18 = vcombine.high %v1187_v48, %v1191_v10  ;;  %v1051_v55 = vld [vmem:[#allocation8 + $0xb58] sm:$0xff]  ;;  %v5194_v19 = vcombine.low %v1187_v48, %v1191_v10  ;;  %v1221_v48 = vrot.slane %v5305_v7, %v5800_v32 }
 0x2e4   : > { %4425 = vmatprep.subr.bf16.mxu1 %v5107_v34  ;;  %v1055_v23 = vld [vmem:[#allocation8 + $0xb78] sm:$0xff]  ;;  %v1225_v10 = vrot.slane %v5305_v7, %v5765_v62 }
 0x2e5   : > { %v1179_v20 = vld [vmem:[#allocation8 + $0xf58] sm:$0xff]  ;;  %v5059_v13 = vcombine.high %v1051_v55, %v1055_v23  ;;  %v5058_v50 = vcombine.low %v1051_v55, %v1055_v23 }
 0x2e6   : > { %4385 = vmatpush1.bf16.msra.mxu0 %v4978_v38  ;;  %v1183_v21 = vld [vmem:[#allocation8 + $0xf78] sm:$0xff] }
 0x2e7   : > { %4426 = vmatpush1.bf16.msra.mxu1 %v5106_v40  ;;  %4386 = vmatprep.subr.bf16.mxu0 %v4971_v39  ;;  %v5187_v25 = vcombine.high %v1179_v20, %v1183_v21  ;;  %v1047_v27 = vld [vmem:[#allocation8 + $0xb38] sm:$0xff]  ;;  %v5186_v60 = vcombine.low %v1179_v20, %v1183_v21 }
 0x2e8   : > { %4427 = vmatprep.subr.bf16.mxu1 %v5099_v43  ;;  %v1171_v17 = vld [vmem:[#allocation8 + $0xf18] sm:$0xff]  ;;  %v5051_v46 = vcombine.high %v1043_v26, %v1047_v27  ;;  %v5050_v49 = vcombine.low %v1043_v26, %v1047_v27 }
 0x2e9   : > { %v1175_v28 = vld [vmem:[#allocation8 + $0xf38] sm:$0xff] }
 0x2ea   : > { %4387 = vmatpush1.bf16.msra.mxu0 %v4970_v42  ;;  %v5179_v29 = vcombine.high %v1171_v17, %v1175_v28  ;;  %v1035_v34 = vld [vmem:[#allocation8 + $0xad8] sm:$0xff]  ;;  %v5178_v38 = vcombine.low %v1171_v17, %v1175_v28 }
 0x2eb   : > { %4428 = vmatpush1.bf16.msra.mxu1 %v5098_v53  ;;  %4388 = vmatprep.subr.bf16.mxu0 %v4963_v54  ;;  %v1039_v35 = vld [vmem:[#allocation8 + $0xaf8] sm:$0xff] }
 0x2ec   : > { %4429 = vmatprep.subr.bf16.mxu1 %v5091_v56  ;;  %v1163_v36 = vld [vmem:[#allocation8 + $0xed8] sm:$0xff]  ;;  %v5043_v40 = vcombine.high %v1035_v34, %v1039_v35  ;;  %v5042_v41 = vcombine.low %v1035_v34, %v1039_v35 }
 0x2ed   : > { %v1167_v37 = vld [vmem:[#allocation8 + $0xef8] sm:$0xff] }
 0x2ee   : > { %4389 = vmatpush1.bf16.msra.mxu0 %v4962_v63  ;;  %v5171_v39 = vcombine.high %v1163_v36, %v1167_v37  ;;  %v1027_v43 = vld [vmem:[#allocation8 + $0xa98] sm:$0xff]  ;;  %v5170_v42 = vcombine.low %v1163_v36, %v1167_v37 }
 0x2ef   : > { %4430 = vmatpush1.bf16.msra.mxu1 %v5090_v0  ;;  %4390 = vmatprep.subr.bf16.mxu0 %v4955_v1  ;;  %v1031_v44 = vld [vmem:[#allocation8 + $0xab8] sm:$0xff] }
 0x2f0   : > { %4431 = vmatprep.subr.bf16.mxu1 %v5083_v2  ;;  %v1155_v45 = vld [vmem:[#allocation8 + $0xe98] sm:$0xff]  ;;  %v5035_v53 = vcombine.high %v1027_v43, %v1031_v44  ;;  %v5034_v47 = vcombine.low %v1027_v43, %v1031_v44 }
 0x2f1   : > { %v1159_v51 = vld [vmem:[#allocation8 + $0xeb8] sm:$0xff] }
 0x2f2   : > { %4391 = vmatpush1.bf16.msra.mxu0 %v4954_v8  ;;  %v5163_v54 = vcombine.high %v1155_v45, %v1159_v51  ;;  %v1019_v56 = vld [vmem:[#allocation8 + $0xa58] sm:$0xff]  ;;  %v5162_v63 = vcombine.low %v1155_v45, %v1159_v51 }
 0x2f3   : > { %4432 = vmatpush1.bf16.msra.mxu1 %v5082_v61  ;;  %4392 = vmatprep.subr.bf16.mxu0 %v5075_v12  ;;  %v1023_v57 = vld [vmem:[#allocation8 + $0xa78] sm:$0xff] }
 0x2f4   : > { %4433 = vmatprep.subr.bf16.mxu1 %v5203_v6  ;;  %v1147_v58 = vld [vmem:[#allocation8 + $0xe58] sm:$0xff]  ;;  %v5027_v0 = vcombine.high %v1019_v56, %v1023_v57  ;;  %v5026_v24 = vcombine.low %v1019_v56, %v1023_v57 }
 0x2f5   : > { %v1151_v59 = vld [vmem:[#allocation8 + $0xe78] sm:$0xff] }
 0x2f6   : > { %4393 = vmatpush2.bf16.msra.mxu0 %v5074_v52  ;;  %v5155_v1 = vcombine.high %v1147_v58, %v1151_v59  ;;  %v1011_v2 = vld [vmem:[#allocation8 + $0xa18] sm:$0xff]  ;;  %v5154_v8 = vcombine.low %v1147_v58, %v1151_v59  ;;  %v1229_v58 = vrot.slane %v5305_v7, %v5797_v30 }
 0x2f7   : > { %4434 = vmatpush2.bf16.msra.mxu1 %v5202_v11  ;;  %4394 = vmatprep.subr.bf16.mxu0 %v5067_v14  ;;  %v1015_v4 = vld [vmem:[#allocation8 + $0xa38] sm:$0xff] }
 0x2f8   : > { %4435 = vmatprep.subr.bf16.mxu1 %v5195_v18  ;;  %v1139_v5 = vld [vmem:[#allocation8 + $0xe18] sm:$0xff]  ;;  %v5019_v61 = vcombine.high %v1011_v2, %v1015_v4  ;;  %v5018_v6 = vcombine.low %v1011_v2, %v1015_v4 }
 0x2f9   : > { %v1143_v16 = vld [vmem:[#allocation8 + $0xe38] sm:$0xff] }
 0x2fa   : > { %4395 = vmatpush2.bf16.msra.mxu0 %v5066_v22  ;;  %v5147_v12 = vcombine.high %v1139_v5, %v1143_v16  ;;  %v5146_v31 = vcombine.low %v1139_v5, %v1143_v16 }
 0x2fb   : > { %4436 = vmatpush2.bf16.msra.mxu1 %v5194_v19  ;;  %4396 = vmatprep.subr.bf16.mxu0 %v5059_v13 }
 0x2fc   : > { %4437 = vmatprep.subr.bf16.mxu1 %v5187_v25 }
 0x2fe   : > { %4397 = vmatpush2.bf16.msra.mxu0 %v5058_v50 }
 0x2ff   : > { %4438 = vmatpush2.bf16.msra.mxu1 %v5186_v60  ;;  %4398 = vmatprep.subr.bf16.mxu0 %v5051_v46  ;;  %v5306_v60 = vld [vmem:[#allocation11] sm:$0xff] }
 0x300   : > { %4439 = vmatprep.subr.bf16.mxu1 %v5179_v29  ;;  %v4491_v36 = vrot.slane %v5306_v60, %v5765_v62  ;;  %v1233_v62 = vrot.slane %v5305_v7, %v5768_v3  ;;  %v4495_v16 = vrot.slane %v5306_v60, %v5797_v30 }
 0x302   : > { %4399 = vmatpush2.bf16.msra.mxu0 %v5050_v49 }
 0x303   : > { %4440 = vmatpush2.bf16.msra.mxu1 %v5178_v38  ;;  %4400 = vmatprep.subr.bf16.mxu0 %v5043_v40 }
 0x304   : > { %4441 = vmatprep.subr.bf16.mxu1 %v5171_v39 }
 0x306   : > { %4401 = vmatpush2.bf16.msra.mxu0 %v5042_v41 }
 0x307   : > { %4442 = vmatpush2.bf16.msra.mxu1 %v5170_v42  ;;  %4402 = vmatprep.subr.bf16.mxu0 %v5035_v53 }
 0x308   : > { %4443 = vmatprep.subr.bf16.mxu1 %v5163_v54 }
 0x30a   : > { %4403 = vmatpush2.bf16.msra.mxu0 %v5034_v47 }
 0x30b   : > { %4444 = vmatpush2.bf16.msra.mxu1 %v5162_v63  ;;  %4404 = vmatprep.subr.bf16.mxu0 %v5027_v0 }
 0x30c   : > { %4445 = vmatprep.subr.bf16.mxu1 %v5155_v1 }
 0x30e   : > { %4405 = vmatpush2.bf16.msra.mxu0 %v5026_v24 }
 0x30f   : > { %4446 = vmatpush2.bf16.msra.mxu1 %v5154_v8  ;;  %4406 = vmatprep.subr.bf16.mxu0 %v5019_v61 }
 0x310   : > { %4447 = vmatprep.subr.bf16.mxu1 %v5147_v12 }
 0x312   : > { %4407 = vmatpush2.bf16.msra.mxu0 %v5018_v6 }
 0x313   : > { %4448 = vmatpush2.bf16.msra.mxu1 %v5146_v31 }
 0x315   : > { %v4164_v52 = vpop.f32.mrf.mxu0  ;;  %4409 = vmatmul.mubr.bf16.vlgmr.msra.gmra.mxu0 %v5810_v15  ;;  %v4487_v15 = vrot.slane %v5306_v60, %v5800_v32 }
 0x316   : > { %v4165_v11 = vadd.f32 %v4164_v52, %v1221_v48  ;;  %v4205_v14 = vpop.f32.mrf.mxu1  ;;  %4450 = vmatmul.mubr.bf16.vlgmr.msra.gmra.mxu1 %v5808_v9  ;;  %v4499_v48 = vrot.slane %v5306_v60, %v5768_v3 }
 0x317   : > { %v4166_v18 = vpop.f32.mrf.mxu0 }
 0x318   : > { %v4206_v55 = vadd.f32 %v4205_v14, %v4165_v11  ;;  %v4167_v23 = vadd.f32 %v4166_v18, %v1225_v10  ;;  %v4207_v20 = vpop.f32.mrf.mxu1 }
 0x319   : > { %v4168_v21 = vpop.f32.mrf.mxu0 }
 0x31a   : > { %v4208_v22 = vadd.f32 %v4207_v20, %v4167_v23  ;;  %v4209_v19 = vpop.f32.mrf.mxu1  ;;  %v5204_v23 = vld [vmem:[#allocation2] ss:$0 sm:$0xff] }
 0x31b   : > { %v4169_v13 = vpop.f32.mrf.mxu0 }
 0x31c   : > { %v4210_v25 = vpop.f32.mrf.mxu1 }
 0x355   : > { %v4246_v26 = vpop.f32.mrf.mxu0 }
 0x356   : > { %v4247_v27 = vadd.f32 %v4246_v26, %v4206_v55  ;;  %v4287_v17 = vpop.f32.mrf.mxu1 }
 0x357   : > { %v4248_v28 = vpop.f32.mrf.mxu0 }
 0x358   : > { %v4288_v50 = vadd.f32 %v4287_v17, %v4247_v27  ;;  %v4249_v46 = vadd.f32 %v4248_v28, %v4208_v22  ;;  %v4289_v29 = vpop.f32.mrf.mxu1 }
 0x359   : > { %v4250_v9 = vpop.f32.mrf.mxu0 }
 0x35a   : > { %v4462_v34 = vmax.f32 %v4288_v50, 0.0  ;;  %v4290_v35 = vadd.f32 %v4289_v29, %v4249_v46  ;;  %v4291_v37 = vpop.f32.mrf.mxu1 }
 0x35b   : > { %v4251_v49 = vpop.f32.mrf.mxu0 }
 0x35c   : > { %v4512_v38 = vmul.f32 %v4487_v15, %v4462_v34  ;;  %v4463_v40 = vmax.f32 %v4290_v35, 0.0  ;;  %v4292_v39 = vpop.f32.mrf.mxu1 }
 0x35e   : > { %v4519_v43 = vadd.f32 %v5871_v33, %v4512_v38  ;;  %v4513_v44 = vmul.f32 %v4491_v36, %v4463_v40 }
 0x360   : > { %v4520_v45 = vadd.f32 %v4519_v43, %v4513_v44 }
 0x395   : > { %v4328_v51 = vpop.f32.mrf.mxu0 }
 0x396   : > { %v4369_v41 = vpop.f32.mrf.mxu1  ;;  %v4329_v59 = vadd.f32 %v4328_v51, %v1229_v58 }
 0x397   : > { %v4330_v42 = vpop.f32.mrf.mxu0 }
 0x398   : > { %v4371_v32 = vpop.f32.mrf.mxu1  ;;  %v4331_v47 = vadd.f32 %v4330_v42, %v1233_v62  ;;  %v4370_v63 = vadd.f32 %v4369_v41, %v4329_v59 }
 0x399   : > { %v4332_v53 = vpop.f32.mrf.mxu0 }
 0x39a   : > { %v4373_v54 = vpop.f32.mrf.mxu1  ;;  %v4372_v1 = vadd.f32 %v4371_v32, %v4331_v47 }
 0x39b   : > { %v4333_v56 = vpop.f32.mrf.mxu0 }
 0x39c   : > { %v4374_v57 = vpop.f32.mrf.mxu1 }
 0x3d5   : > { %v4410_v0 = vpop.f32.mrf.mxu0 }
 0x3d6   : > { %v4411_v33 = vadd.f32 %v4410_v0, %v4370_v63  ;;  %v4451_v2 = vpop.f32.mrf.mxu1 }
 0x3d7   : > { %v4412_v4 = vpop.f32.mrf.mxu0 }
 0x3d8   : > { %v4452_v5 = vadd.f32 %v4451_v2, %v4411_v33  ;;  %v4413_v24 = vadd.f32 %v4412_v4, %v4372_v1  ;;  %v4453_v8 = vpop.f32.mrf.mxu1 }
 0x3d9   : > { %v4414_v61 = vpop.f32.mrf.mxu0 }
 0x3da   : > { %v4464_v12 = vmax.f32 %v4452_v5, 0.0  ;;  %v4454_v6 = vadd.f32 %v4453_v8, %v4413_v24  ;;  %v4455_v31 = vpop.f32.mrf.mxu1 }
 0x3db   : > { %v4415_v7 = vpop.f32.mrf.mxu0 }
 0x3dc   : > { %v4514_v10 = vmul.f32 %v4495_v16, %v4464_v12  ;;  %v4465_v52 = vmax.f32 %v4454_v6, 0.0  ;;  %v4456_v11 = vpop.f32.mrf.mxu1 }
 0x3de   : > { %v4515_v14 = vmul.f32 %v4499_v48, %v4465_v52  ;;  %v4521_v18 = vadd.f32 %v4520_v45, %v4514_v10 }
 0x3e0   : > { %v4522_v55 = vadd.f32 %v4521_v18, %v4515_v14 }
 0x3e2   : > { %4523 = vadd.xlane.f32.xlu0 %v4522_v55 }
 0x46b   : > { %v4524_v30 = vpop.xlane.xlu0 %4523 }
 0x46c   : > { %v4532_v20 = vadd.f32 %v5204_v23, %v4524_v30 }
 0x46e   : > { %v5205_v21 = vmul.f32 -1.442695, %v4532_v20 }
 0x470   : > { %5301 = vpow2.f32 %v5205_v21 }
 0x47d   : > { %v5302_v22 = vpop.eup %5301 }
 0x47e   : > { %v4536_v19 = vadd.f32 1.0, %v5302_v22 }
 0x480   : > { %5303 = vrcp.f32 %v4536_v19 }
 0x48d   : > { %v5304_v3 = vpop.eup %5303 }
 0x48e   : > { %4540 = vst.msk [vmem:[%s362_s13] sm:$0xff] %vm4539_vm1, %v5304_v3 }
 0x48f PF: > { %p22_p11 = scmp.ge.s32.totalorder %s5659_s15, 4   ;;  %s5927_s26 = smov %s5503_s27 }
 0x490   : > { %s5928_s27 = smov %s5507_s28  ;;  %s5929_s28 = smov %s5670_s22 }
 0x491   : > { %s5930_s29 = smov %s5659_s15  ;;  %24 = sbr.rel (!%p22_p11) target bundleno = 9 (0x9), region = 108 }
 0x496   :  { %4560 = vsyncpa [#allocation4], 1 }
 0x497   :  { %4562 = vsyncpa [#allocation4 + $0x1], 1 }
 0x498   :  { %4563 = vsyncpa [#allocation6], 1 }
 0x499   :  { %4564 = vsyncpa [#allocation9], 1 }
 0x49a   :  { %4565 = vsyncpa [#allocation12], 1 }

</bundles_post_ra>
